<compile_context>
chip_gen: v6e
topology: v6e:2x2x1
jax: 0.10.0
libtpu: 0.0.40
codegen_flags: <defaults>
</compile_context>

<pallas_src>
import functools

import numpy as np
import jax
import jax.numpy as jnp
from jax.experimental import pallas as pl
from jax.experimental.pallas import tpu as pltpu

CONST_SCALE = 0.18215
NUM_TRAIN_TIMESTEPS = 1000

VMEM = pltpu.MemorySpace.VMEM
SMEM = pltpu.MemorySpace.SMEM

# Small-shape configuration (analog of 512x512 image -> 64x64 latent).
H = W = 32            # "512" analog
DOWN = 2              # VAE spatial downsample analog (real VAE is 8x)
HL = WL = H // DOWN   # "64" analog -> 16
P = HL * WL           # latent pixels per stream = 256 (2 x 128 lanes)
LAT_C = 4
IMG_C = 3
SEQ = 8               # text max_length
EMB = 32              # text embed_dim
HID = 32              # surrogate UNet hidden width


# ---------------------------------------------------------------------------
# Pallas kernels (latent tensors are (C, n*P): channels on sublanes, pixels of
# both streams / CFG segments on the lane axis -> always lane-dense)
# ---------------------------------------------------------------------------

def _diffuse_kernel(sched_ref, scal_ref, feats_ref, eps_ref, noise_ref,
                    ewb_ref, w1a_ref, w1b_ref, w2_ref, tb_ref, b2_ref,
                    dwb_ref, raw_ref):
    """Fused: VAE-encode surrogate + add_noise -> unrolled DDIM loop with the
    UNet surrogate + CFG combine + DDIM step -> VAE-decode surrogate.

    Lane layout: [main(P) | mouth(P)] = 2P lanes for latents; CFG-major
    [text(2P) | image(2P) | uncond(2P)] = 6P lanes for cond / eps terms.
    """
    # TODO(synk): the real pretrained InstructPix2Pix UNet / VAE (diffusers
    # checkpoints) are not translatable without their weights; these are
    # deterministic surrogates with matching tensor roles.  On v7x, re-add a
    # 2-core split (and re-derive tiles vs 64 MiB VMEM) once the real UNet
    # makes per-stream work non-trivial.
    nsteps = sched_ref.shape[0]

    eps_std = scal_ref[0]
    sqrt_a0 = scal_ref[1]
    sqrt_1m_a0 = scal_ref[2]

    # ---- VAE-encode surrogate (sample + mode) + DDIM add_noise -------------
    # Single matmul over [img_main | img_mouth | cond_main | cond_mouth].
    ew = ewb_ref[:, :IMG_C].astype(jnp.bfloat16)                 # (4, 3)
    eb = ewb_ref[:, IMG_C:IMG_C + 1]                             # (4, 1) f32
    x = (2.0 * feats_ref[...] - 1.0).astype(jnp.bfloat16)        # (3, 4P)
    mode = jnp.dot(ew, x, preferred_element_type=jnp.float32) + eb  # (4, 4P)
    img_mode = mode[:, :2 * P]
    # NOTE: cond latents intentionally stay UNscaled (diffusers
    # prepare_image_latents uses .mode() without CONST_SCALE).
    cond_mode = mode[:, 2 * P:4 * P]                             # (4, 2P)

    lat = (img_mode + eps_std * eps_ref[...]) * CONST_SCALE      # posterior.sample()
    lat = sqrt_a0 * lat + sqrt_1m_a0 * noise_ref[...]            # add_noise(t0)

    # ---- step-invariant UNet-surrogate terms (hoisted out of the loop) -----
    w1a = w1a_ref[...]                                           # (HID, 4) bf16
    w1b = w1b_ref[...]                                           # (HID, 4) bf16
    w2 = w2_ref[...]                                             # (4, HID) bf16
    b2 = b2_ref[...]                                             # (4, 1)  f32
    h_cond = jnp.dot(w1b, cond_mode.astype(jnp.bfloat16),
                     preferred_element_type=jnp.float32)         # (HID, 2P)
    # CFG segment order assumed [text, image, uncond] to match the reference's
    # noise_pred.chunk(3) and text_embeddings row ordering.
    hb = (h_cond + tb_ref[:, 0:1],                               # text
          h_cond + tb_ref[:, 1:2],                               # image
          jnp.zeros_like(h_cond) + tb_ref[:, 2:3])               # uncond (cond = 0)

    # ---- unrolled DDIM loop (nsteps is static & small) ----------------------
    for step in range(nsteps):
        sqrt_1m_at = sched_ref[step, 0]
        inv_sqrt_at = sched_ref[step, 1]
        sqrt_ap = sched_ref[step, 2]
        sqrt_1m_ap = sched_ref[step, 3]
        temb = sched_ref[step, 4]
        g = sched_ref[step, 5]
        ig = sched_ref[step, 6]

        h_lat = jnp.dot(w1a, lat.astype(jnp.bfloat16),
                        preferred_element_type=jnp.float32)      # (HID, 2P)
        e = []
        for seg in range(3):
            h = jax.nn.gelu(hb[seg] + h_lat + temb, approximate=True)
            e.append(jnp.dot(w2, h.astype(jnp.bfloat16),
                             preferred_element_type=jnp.float32))  # (4, 2P)
        e_txt, e_img, e_unc = e
        # CFG combine.  The shared b2 bias cancels in the differences and
        # survives exactly once -> add it after the combine (algebraically
        # identical to adding it to every eps segment).
        pred = e_unc + g * (e_txt - e_img) + ig * (e_img - e_unc) + b2
        x0 = (lat - sqrt_1m_at * pred) * inv_sqrt_at             # DDIM eta=0
        lat = sqrt_ap * x0 + sqrt_1m_ap * pred

    # ---- VAE-decode surrogate ----------------------------------------------
    dw = dwb_ref[:, :LAT_C].astype(jnp.bfloat16)                 # (3, 4)
    db = dwb_ref[:, LAT_C:LAT_C + 1]                             # (3, 1) f32
    lat_dec = (lat * (1.0 / CONST_SCALE)).astype(jnp.bfloat16)
    raw_ref[...] = (jnp.dot(dw, lat_dec, preferred_element_type=jnp.float32)
                    + db)                                        # (3, 2P)


def _composite_kernel(d2_ref, d_ref, mask_ref, out_ref):
    """Fused postprocess (x/2+0.5 clamp) of both images + head-mask blend."""
    a = jnp.clip(d2_ref[...] * 0.5 + 0.5, 0.0, 1.0)
    b = jnp.clip(d_ref[...] * 0.5 + 0.5, 0.0, 1.0)
    m = mask_ref[...]
    out_ref[...] = a * m + b * (1.0 - m)


# ---------------------------------------------------------------------------
# pallas_call wrappers (no grid -> single invocation, full-array blocks)
# ---------------------------------------------------------------------------

def diffuse_call(sched, scal, feats, eps, noise, ewb, w1a, w1b, w2, tb, b2, dwb):
    return pl.pallas_call(
        _diffuse_kernel,
        out_shape=jax.ShapeDtypeStruct((IMG_C, 2 * P), jnp.float32),
        in_specs=[pl.BlockSpec(memory_space=SMEM),     # sched table
                  pl.BlockSpec(memory_space=SMEM)]     # encode scalars
                 + [pl.BlockSpec(memory_space=VMEM)] * 10,
        out_specs=pl.BlockSpec(memory_space=VMEM),
    )(sched, scal, feats, eps, noise, ewb, w1a, w1b, w2, tb, b2, dwb)


def composite_call(d2, d, mask):
    return pl.pallas_call(
        _composite_kernel,
        out_shape=jax.ShapeDtypeStruct(d.shape, jnp.float32),
        in_specs=[pl.BlockSpec(memory_space=VMEM)] * 3,
        out_specs=pl.BlockSpec(memory_space=VMEM),
    )(d2, d, mask)


# ---------------------------------------------------------------------------
# Jitted device pipeline (plain JAX only for crops / resizes / reshapes)
# ---------------------------------------------------------------------------

@functools.partial(jax.jit, static_argnames=("mouth_rect", "face_aware"))
def _edit_device(params, text_embeddings, image, image_cond, head_mask,
                 sched, enc_scal, eps, noise, *, mouth_rect, face_aware):
    mx, my, mw, mh = mouth_rect

    def to_feat(img):  # (1,3,H,W) -> (3, P): 2x2 avg-pool (VAE downsample analog)
        p = img.reshape(1, IMG_C, HL, DOWN, WL, DOWN).mean(axis=(3, 5))
        return p.reshape(IMG_C, P)

    mouth_image = jax.image.resize(
        image[:, :, my:my + mh, mx:mx + mw], (1, IMG_C, H, W), method="bilinear")
    mouth_image_cond = jax.image.resize(
        image_cond[:, :, my:my + mh, mx:mx + mw], (1, IMG_C, H, W), method="bilinear")

    # [img_main | img_mouth | cond_main | cond_mouth] on the lane axis -> (3, 4P)
    feats = jnp.concatenate(
        [to_feat(image), to_feat(mouth_image),
         to_feat(image_cond), to_feat(mouth_image_cond)], axis=1)

    # pooled text bias of the surrogate UNet, one column per CFG segment
    # (rows of text_embeddings assumed ordered [text, image, uncond]).
    pooled = jnp.mean(text_embeddings, axis=1)                   # (3, EMB)
    tb = (pooled @ params["wt"] + params["b1"]).T                # (HID, 3)

    # ONE pallas_call: encode + add_noise + full DDIM loop + CFG + decode.
    raw = diffuse_call(sched, enc_scal, feats, eps, noise,
                       params["ewb"], params["w1aT"], params["w1bT"],
                       params["w2T"], tb, params["b2T"], params["dwb"])  # (3, 2P)

    dec_up = jax.image.resize(raw[:, :P].reshape(1, IMG_C, HL, WL),
                              (1, IMG_C, H, W), method="bilinear")
    if face_aware:
        mouth_up = jax.image.resize(raw[:, P:].reshape(1, IMG_C, HL, WL),
                                    (1, IMG_C, H, W), method="bilinear")
        # TODO(synk): reference uses F.interpolate(mouth_decoded_img, mw) which
        # assumes mh == mw; resizing to (mh, mw) keeps the paste rect valid.
        mouth_patch = jax.image.resize(mouth_up, (1, IMG_C, mh, mw), method="nearest")
        dec2 = jax.lax.dynamic_update_slice(dec_up, mouth_patch, (0, 0, my, mx))
        out = composite_call(dec2.reshape(IMG_C, H * W),
                             dec_up.reshape(IMG_C, H * W),
                             head_mask.reshape(1, H * W))
    else:
        # Reference returns the plain post-processed decode -> skip the dead
        # mouth-paste / blend work (mask = 0 reduces the kernel to the clamp).
        out = composite_call(dec_up.reshape(IMG_C, H * W),
                             dec_up.reshape(IMG_C, H * W),
                             jnp.zeros((1, H * W), jnp.float32))
    return out.reshape(1, IMG_C, H, W)


# ---------------------------------------------------------------------------
# Host driver: DDIM scheduler bookkeeping, schedule-table precompute
# ---------------------------------------------------------------------------

def edit_image(params, text_embeddings, image, image_cond, head_mask, mouth_rect,
               rng, guidance_scale=7.5, image_guidance_scale=1.5,
               diffusion_steps=3, lower_bound=0.7, upper_bound=0.98,
               face_aware=True, t_seed=0):
    # TODO(synk): diffusers DDIMScheduler config bookkeeping reimplemented here.
    betas = np.linspace(0.00085 ** 0.5, 0.012 ** 0.5, NUM_TRAIN_TIMESTEPS,
                        dtype=np.float64) ** 2
    alphas_cumprod = np.cumprod(1.0 - betas)

    min_step = int(NUM_TRAIN_TIMESTEPS * lower_bound)
    max_step = int(NUM_TRAIN_TIMESTEPS * upper_bound)
    # Random T drawn on host: avoids a device->host sync inside the pipeline.
    T = int(np.random.default_rng(t_seed).integers(min_step, max_step + 1))
    step_ratio = T // diffusion_steps
    timesteps = (np.arange(diffusion_steps) * step_ratio).round()[::-1].astype(np.int64)

    # per-step scalar table (SMEM): all sqrt/sin precomputed on host
    rows = []
    for t in timesteps:
        a_t = float(alphas_cumprod[int(t)])
        prev_t = int(t) - step_ratio
        a_prev = float(alphas_cumprod[prev_t]) if prev_t >= 0 else 1.0
        rows.append([np.sqrt(1.0 - a_t), 1.0 / np.sqrt(a_t),
                     np.sqrt(a_prev), np.sqrt(1.0 - a_prev),
                     np.sin(float(t) * 0.02),
                     guidance_scale, image_guidance_scale, 0.0])
    sched = jnp.asarray(np.asarray(rows, np.float32))            # (nsteps, 8)

    a0 = float(alphas_cumprod[int(timesteps[0])])
    enc_scal = jnp.asarray(
        np.array([0.01, np.sqrt(a0), np.sqrt(1.0 - a0), 0.0], np.float32))

    k1, k2 = jax.random.split(rng)
    eps = jax.random.normal(k1, (LAT_C, 2 * P), jnp.float32)     # encoder posterior noise
    noise = jax.random.normal(k2, (LAT_C, 2 * P), jnp.float32)   # DDIM add_noise noise

    return _edit_device(params, text_embeddings, image, image_cond, head_mask,
                        sched, enc_scal, eps, noise,
                        mouth_rect=tuple(int(v) for v in mouth_rect),
                        face_aware=bool(face_aware))


# ---------------------------------------------------------------------------
# main
# ---------------------------------------------------------------------------

if __name__ == "__main__":
    key = jax.random.PRNGKey(0)
    ks = jax.random.split(key, 12)

    enc_w = 0.3 * jax.random.normal(ks[0], (LAT_C, IMG_C), jnp.float32)
    enc_b = 0.1 * jax.random.normal(ks[1], (LAT_C, 1), jnp.float32)
    dec_w = 0.3 * jax.random.normal(ks[2], (IMG_C, LAT_C), jnp.float32)
    dec_b = 0.1 * jax.random.normal(ks[3], (IMG_C, 1), jnp.float32)
    w1 = 0.2 * jax.random.normal(ks[4], (HID, 2 * LAT_C), jnp.float32)

    params = {
        # packed [W | b] columns -> one tiny DMA each
        "ewb": jnp.concatenate([enc_w, enc_b], axis=1),             # (4, 4)  f32
        "dwb": jnp.concatenate([dec_w, dec_b], axis=1),             # (3, 5)  f32
        # MXU-side weights pre-cast to bf16 (accumulate stays f32 in-kernel)
        "w1aT": w1[:, :LAT_C].astype(jnp.bfloat16),                 # (HID, 4)
        "w1bT": w1[:, LAT_C:].astype(jnp.bfloat16),                 # (HID, 4)
        "w2T": (0.2 * jax.random.normal(ks[6], (LAT_C, HID),
                                        jnp.float32)).astype(jnp.bfloat16),
        "wt": 0.2 * jax.random.normal(ks[5], (EMB, HID), jnp.float32),
        "b1": jnp.zeros((HID,), jnp.float32),
        "b2T": jnp.zeros((LAT_C, 1), jnp.float32),
    }

    image = jax.random.uniform(ks[7], (1, IMG_C, H, W), jnp.float32)
    image_cond = jax.random.uniform(ks[8], (1, IMG_C, H, W), jnp.float32)
    text_embeddings = 0.5 * jax.random.normal(ks[9], (3, SEQ, EMB), jnp.float32)
    head_mask = (jax.random.uniform(ks[10], (H, W)) > 0.5).astype(jnp.float32)
    mouth_rect = (8, 12, 16, 16)  # (x, y, w, h)

    edited = edit_image(params, text_embeddings, image, image_cond, head_mask,
                        mouth_rect, rng=ks[11])
    edited = jax.block_until_ready(edited)
    assert edited.shape == (1, IMG_C, H, W)
    assert bool(jnp.all(jnp.isfinite(edited)))
    print("KERNEL_OK")
</pallas_src>

<mosaic_0001>
module attributes {stable_mosaic.version = 11 : i64} {
  func.func @_diffuse_kernel(%arg0: memref<3x8xf32, #tpu.memory_space<smem>>, %arg1: memref<4xf32, #tpu.memory_space<smem>>, %arg2: memref<3x1024xf32, #tpu.memory_space<vmem>>, %arg3: memref<4x512xf32, #tpu.memory_space<vmem>>, %arg4: memref<4x512xf32, #tpu.memory_space<vmem>>, %arg5: memref<4x4xf32, #tpu.memory_space<vmem>>, %arg6: memref<32x4xbf16, #tpu.memory_space<vmem>>, %arg7: memref<32x4xbf16, #tpu.memory_space<vmem>>, %arg8: memref<4x32xbf16, #tpu.memory_space<vmem>>, %arg9: memref<32x3xf32, #tpu.memory_space<vmem>>, %arg10: memref<4x1xf32, #tpu.memory_space<vmem>>, %arg11: memref<3x5xf32, #tpu.memory_space<vmem>>, %arg12: memref<3x512xf32, #tpu.memory_space<vmem>>) attributes {dimension_semantics = [], scalar_prefetch = 0 : i64, scratch_operands = 0 : i64, tpu.core_type = #tpu.core_type<tc>} {
    %c0 = arith.constant 0 : index
    %0 = memref.load %arg1[%c0] : memref<4xf32, #tpu.memory_space<smem>>
    %c1 = arith.constant 1 : index
    %1 = memref.load %arg1[%c1] : memref<4xf32, #tpu.memory_space<smem>>
    %c2 = arith.constant 2 : index
    %2 = memref.load %arg1[%c2] : memref<4xf32, #tpu.memory_space<smem>>
    %c0_0 = arith.constant 0 : index
    %c0_1 = arith.constant 0 : index
    %3 = vector.load %arg5[%c0_0, %c0_1] : memref<4x4xf32, #tpu.memory_space<vmem>>, vector<4x3xf32>
    %4 = arith.truncf %3 : vector<4x3xf32> to vector<4x3xbf16>
    %c0_2 = arith.constant 0 : index
    %c3 = arith.constant 3 : index
    %5 = vector.load %arg5[%c0_2, %c3] : memref<4x4xf32, #tpu.memory_space<vmem>>, vector<4x1xf32>
    %c0_3 = arith.constant 0 : index
    %c0_4 = arith.constant 0 : index
    %6 = vector.load %arg2[%c0_3, %c0_4] : memref<3x1024xf32, #tpu.memory_space<vmem>>, vector<3x1024xf32>
    %cst = arith.constant 2.000000e+00 : f32
    %7 = vector.broadcast %cst : f32 to vector<3x1024xf32>
    %8 = arith.mulf %7, %6 : vector<3x1024xf32>
    %cst_5 = arith.constant 1.000000e+00 : f32
    %9 = vector.broadcast %cst_5 : f32 to vector<3x1024xf32>
    %10 = arith.subf %8, %9 : vector<3x1024xf32>
    %11 = arith.truncf %10 : vector<3x1024xf32> to vector<3x1024xbf16>
    %cst_6 = arith.constant dense<0.000000e+00> : vector<4x1024xf32>
    %12 = tpu.matmul %4, %11, %cst_6 {dimension_numbers = #tpu.dot_dimension_numbers<[1], [0], [0], [1], [0, 0, 1, 1], [], []>} : vector<4x3xbf16>, vector<3x1024xbf16>, vector<4x1024xf32> -> vector<4x1024xf32>
    %13 = vector.broadcast %5 : vector<4x1xf32> to vector<4x1024xf32>
    %14 = arith.addf %12, %13 : vector<4x1024xf32>
    %15 = vector.extract_strided_slice %14 {offsets = [0, 0], sizes = [4, 512], strides = [1, 1]} : vector<4x1024xf32> to vector<4x512xf32>
    %16 = vector.extract_strided_slice %14 {offsets = [0, 512], sizes = [4, 512], strides = [1, 1]} : vector<4x1024xf32> to vector<4x512xf32>
    %c0_7 = arith.constant 0 : index
    %c0_8 = arith.constant 0 : index
    %17 = vector.load %arg3[%c0_7, %c0_8] : memref<4x512xf32, #tpu.memory_space<vmem>>, vector<4x512xf32>
    %18 = vector.broadcast %0 : f32 to vector<4x512xf32>
    %19 = arith.mulf %18, %17 : vector<4x512xf32>
    %20 = arith.addf %15, %19 : vector<4x512xf32>
    %cst_9 = arith.constant 1.821500e-01 : f32
    %21 = vector.broadcast %cst_9 : f32 to vector<4x512xf32>
    %22 = arith.mulf %20, %21 : vector<4x512xf32>
    %23 = vector.broadcast %1 : f32 to vector<4x512xf32>
    %24 = arith.mulf %23, %22 : vector<4x512xf32>
    %c0_10 = arith.constant 0 : index
    %c0_11 = arith.constant 0 : index
    %25 = vector.load %arg4[%c0_10, %c0_11] : memref<4x512xf32, #tpu.memory_space<vmem>>, vector<4x512xf32>
    %26 = vector.broadcast %2 : f32 to vector<4x512xf32>
    %27 = arith.mulf %26, %25 : vector<4x512xf32>
    %28 = arith.addf %24, %27 : vector<4x512xf32>
    %c0_12 = arith.constant 0 : index
    %c0_13 = arith.constant 0 : index
    %29 = vector.load %arg6[%c0_12, %c0_13] : memref<32x4xbf16, #tpu.memory_space<vmem>>, vector<32x4xbf16>
    %c0_14 = arith.constant 0 : index
    %c0_15 = arith.constant 0 : index
    %30 = vector.load %arg7[%c0_14, %c0_15] : memref<32x4xbf16, #tpu.memory_space<vmem>>, vector<32x4xbf16>
    %c0_16 = arith.constant 0 : index
    %c0_17 = arith.constant 0 : index
    %31 = vector.load %arg8[%c0_16, %c0_17] : memref<4x32xbf16, #tpu.memory_space<vmem>>, vector<4x32xbf16>
    %c0_18 = arith.constant 0 : index
    %c0_19 = arith.constant 0 : index
    %32 = vector.load %arg10[%c0_18, %c0_19] : memref<4x1xf32, #tpu.memory_space<vmem>>, vector<4x1xf32>
    %33 = arith.truncf %16 : vector<4x512xf32> to vector<4x512xbf16>
    %cst_20 = arith.constant dense<0.000000e+00> : vector<32x512xf32>
    %34 = tpu.matmul %30, %33, %cst_20 {dimension_numbers = #tpu.dot_dimension_numbers<[1], [0], [0], [1], [0, 0, 1, 1], [], []>} : vector<32x4xbf16>, vector<4x512xbf16>, vector<32x512xf32> -> vector<32x512xf32>
    %c0_21 = arith.constant 0 : index
    %c0_22 = arith.constant 0 : index
    %35 = vector.load %arg9[%c0_21, %c0_22] : memref<32x3xf32, #tpu.memory_space<vmem>>, vector<32x1xf32>
    %36 = vector.broadcast %35 : vector<32x1xf32> to vector<32x512xf32>
    %37 = arith.addf %34, %36 : vector<32x512xf32>
    %c0_23 = arith.constant 0 : index
    %c1_24 = arith.constant 1 : index
    %38 = vector.load %arg9[%c0_23, %c1_24] : memref<32x3xf32, #tpu.memory_space<vmem>>, vector<32x1xf32>
    %39 = vector.broadcast %38 : vector<32x1xf32> to vector<32x512xf32>
    %40 = arith.addf %34, %39 : vector<32x512xf32>
    %cst_25 = arith.constant 0.000000e+00 : f32
    %41 = vector.broadcast %cst_25 : f32 to vector<32x512xf32>
    %c0_26 = arith.constant 0 : index
    %c2_27 = arith.constant 2 : index
    %42 = vector.load %arg9[%c0_26, %c2_27] : memref<32x3xf32, #tpu.memory_space<vmem>>, vector<32x1xf32>
    %43 = vector.broadcast %42 : vector<32x1xf32> to vector<32x512xf32>
    %44 = arith.addf %41, %43 : vector<32x512xf32>
    %c0_28 = arith.constant 0 : index
    %c0_29 = arith.constant 0 : index
    %45 = memref.load %arg0[%c0_28, %c0_29] : memref<3x8xf32, #tpu.memory_space<smem>>
    %c0_30 = arith.constant 0 : index
    %c1_31 = arith.constant 1 : index
    %46 = memref.load %arg0[%c0_30, %c1_31] : memref<3x8xf32, #tpu.memory_space<smem>>
    %c0_32 = arith.constant 0 : index
    %c2_33 = arith.constant 2 : index
    %47 = memref.load %arg0[%c0_32, %c2_33] : memref<3x8xf32, #tpu.memory_space<smem>>
    %c0_34 = arith.constant 0 : index
    %c3_35 = arith.constant 3 : index
    %48 = memref.load %arg0[%c0_34, %c3_35] : memref<3x8xf32, #tpu.memory_space<smem>>
    %c0_36 = arith.constant 0 : index
    %c4 = arith.constant 4 : index
    %49 = memref.load %arg0[%c0_36, %c4] : memref<3x8xf32, #tpu.memory_space<smem>>
    %c0_37 = arith.constant 0 : index
    %c5 = arith.constant 5 : index
    %50 = memref.load %arg0[%c0_37, %c5] : memref<3x8xf32, #tpu.memory_space<smem>>
    %c0_38 = arith.constant 0 : index
    %c6 = arith.constant 6 : index
    %51 = memref.load %arg0[%c0_38, %c6] : memref<3x8xf32, #tpu.memory_space<smem>>
    %52 = arith.truncf %28 : vector<4x512xf32> to vector<4x512xbf16>
    %cst_39 = arith.constant dense<0.000000e+00> : vector<32x512xf32>
    %53 = tpu.matmul %29, %52, %cst_39 {dimension_numbers = #tpu.dot_dimension_numbers<[1], [0], [0], [1], [0, 0, 1, 1], [], []>} : vector<32x4xbf16>, vector<4x512xbf16>, vector<32x512xf32> -> vector<32x512xf32>
    %54 = arith.addf %37, %53 : vector<32x512xf32>
    %55 = vector.broadcast %49 : f32 to vector<32x512xf32>
    %56 = arith.addf %54, %55 : vector<32x512xf32>
    %57 = arith.mulf %56, %56 : vector<32x512xf32>
    %58 = arith.mulf %56, %57 : vector<32x512xf32>
    %cst_40 = arith.constant 4.471500e-02 : f32
    %59 = vector.broadcast %cst_40 : f32 to vector<32x512xf32>
    %60 = arith.mulf %59, %58 : vector<32x512xf32>
    %61 = arith.addf %56, %60 : vector<32x512xf32>
    %cst_41 = arith.constant 0.797884583 : f32
    %62 = vector.broadcast %cst_41 : f32 to vector<32x512xf32>
    %63 = arith.mulf %62, %61 : vector<32x512xf32>
    %64 = math.tanh %63 : vector<32x512xf32>
    %cst_42 = arith.constant 1.000000e+00 : f32
    %65 = vector.broadcast %cst_42 : f32 to vector<32x512xf32>
    %66 = arith.addf %65, %64 : vector<32x512xf32>
    %cst_43 = arith.constant 5.000000e-01 : f32
    %67 = vector.broadcast %cst_43 : f32 to vector<32x512xf32>
    %68 = arith.mulf %67, %66 : vector<32x512xf32>
    %69 = arith.mulf %56, %68 : vector<32x512xf32>
    %70 = arith.truncf %69 : vector<32x512xf32> to vector<32x512xbf16>
    %cst_44 = arith.constant dense<0.000000e+00> : vector<4x512xf32>
    %71 = tpu.matmul %31, %70, %cst_44 {dimension_numbers = #tpu.dot_dimension_numbers<[1], [0], [0], [1], [0, 0, 1, 1], [], []>} : vector<4x32xbf16>, vector<32x512xbf16>, vector<4x512xf32> -> vector<4x512xf32>
    %72 = arith.addf %40, %53 : vector<32x512xf32>
    %73 = vector.broadcast %49 : f32 to vector<32x512xf32>
    %74 = arith.addf %72, %73 : vector<32x512xf32>
    %75 = arith.mulf %74, %74 : vector<32x512xf32>
    %76 = arith.mulf %74, %75 : vector<32x512xf32>
    %cst_45 = arith.constant 4.471500e-02 : f32
    %77 = vector.broadcast %cst_45 : f32 to vector<32x512xf32>
    %78 = arith.mulf %77, %76 : vector<32x512xf32>
    %79 = arith.addf %74, %78 : vector<32x512xf32>
    %cst_46 = arith.constant 0.797884583 : f32
    %80 = vector.broadcast %cst_46 : f32 to vector<32x512xf32>
    %81 = arith.mulf %80, %79 : vector<32x512xf32>
    %82 = math.tanh %81 : vector<32x512xf32>
    %cst_47 = arith.constant 1.000000e+00 : f32
    %83 = vector.broadcast %cst_47 : f32 to vector<32x512xf32>
    %84 = arith.addf %83, %82 : vector<32x512xf32>
    %cst_48 = arith.constant 5.000000e-01 : f32
    %85 = vector.broadcast %cst_48 : f32 to vector<32x512xf32>
    %86 = arith.mulf %85, %84 : vector<32x512xf32>
    %87 = arith.mulf %74, %86 : vector<32x512xf32>
    %88 = arith.truncf %87 : vector<32x512xf32> to vector<32x512xbf16>
    %cst_49 = arith.constant dense<0.000000e+00> : vector<4x512xf32>
    %89 = tpu.matmul %31, %88, %cst_49 {dimension_numbers = #tpu.dot_dimension_numbers<[1], [0], [0], [1], [0, 0, 1, 1], [], []>} : vector<4x32xbf16>, vector<32x512xbf16>, vector<4x512xf32> -> vector<4x512xf32>
    %90 = arith.addf %44, %53 : vector<32x512xf32>
    %91 = vector.broadcast %49 : f32 to vector<32x512xf32>
    %92 = arith.addf %90, %91 : vector<32x512xf32>
    %93 = arith.mulf %92, %92 : vector<32x512xf32>
    %94 = arith.mulf %92, %93 : vector<32x512xf32>
    %cst_50 = arith.constant 4.471500e-02 : f32
    %95 = vector.broadcast %cst_50 : f32 to vector<32x512xf32>
    %96 = arith.mulf %95, %94 : vector<32x512xf32>
    %97 = arith.addf %92, %96 : vector<32x512xf32>
    %cst_51 = arith.constant 0.797884583 : f32
    %98 = vector.broadcast %cst_51 : f32 to vector<32x512xf32>
    %99 = arith.mulf %98, %97 : vector<32x512xf32>
    %100 = math.tanh %99 : vector<32x512xf32>
    %cst_52 = arith.constant 1.000000e+00 : f32
    %101 = vector.broadcast %cst_52 : f32 to vector<32x512xf32>
    %102 = arith.addf %101, %100 : vector<32x512xf32>
    %cst_53 = arith.constant 5.000000e-01 : f32
    %103 = vector.broadcast %cst_53 : f32 to vector<32x512xf32>
    %104 = arith.mulf %103, %102 : vector<32x512xf32>
    %105 = arith.mulf %92, %104 : vector<32x512xf32>
    %106 = arith.truncf %105 : vector<32x512xf32> to vector<32x512xbf16>
    %cst_54 = arith.constant dense<0.000000e+00> : vector<4x512xf32>
    %107 = tpu.matmul %31, %106, %cst_54 {dimension_numbers = #tpu.dot_dimension_numbers<[1], [0], [0], [1], [0, 0, 1, 1], [], []>} : vector<4x32xbf16>, vector<32x512xbf16>, vector<4x512xf32> -> vector<4x512xf32>
    %108 = arith.subf %71, %89 : vector<4x512xf32>
    %109 = vector.broadcast %50 : f32 to vector<4x512xf32>
    %110 = arith.mulf %109, %108 : vector<4x512xf32>
    %111 = arith.addf %107, %110 : vector<4x512xf32>
    %112 = arith.subf %89, %107 : vector<4x512xf32>
    %113 = vector.broadcast %51 : f32 to vector<4x512xf32>
    %114 = arith.mulf %113, %112 : vector<4x512xf32>
    %115 = arith.addf %111, %114 : vector<4x512xf32>
    %116 = vector.broadcast %32 : vector<4x1xf32> to vector<4x512xf32>
    %117 = arith.addf %115, %116 : vector<4x512xf32>
    %118 = vector.broadcast %45 : f32 to vector<4x512xf32>
    %119 = arith.mulf %118, %117 : vector<4x512xf32>
    %120 = arith.subf %28, %119 : vector<4x512xf32>
    %121 = vector.broadcast %46 : f32 to vector<4x512xf32>
    %122 = arith.mulf %120, %121 : vector<4x512xf32>
    %123 = vector.broadcast %47 : f32 to vector<4x512xf32>
    %124 = arith.mulf %123, %122 : vector<4x512xf32>
    %125 = vector.broadcast %48 : f32 to vector<4x512xf32>
    %126 = arith.mulf %125, %117 : vector<4x512xf32>
    %127 = arith.addf %124, %126 : vector<4x512xf32>
    %c1_55 = arith.constant 1 : index
    %c0_56 = arith.constant 0 : index
    %128 = memref.load %arg0[%c1_55, %c0_56] : memref<3x8xf32, #tpu.memory_space<smem>>
    %c1_57 = arith.constant 1 : index
    %c1_58 = arith.constant 1 : index
    %129 = memref.load %arg0[%c1_57, %c1_58] : memref<3x8xf32, #tpu.memory_space<smem>>
    %c1_59 = arith.constant 1 : index
    %c2_60 = arith.constant 2 : index
    %130 = memref.load %arg0[%c1_59, %c2_60] : memref<3x8xf32, #tpu.memory_space<smem>>
    %c1_61 = arith.constant 1 : index
    %c3_62 = arith.constant 3 : index
    %131 = memref.load %arg0[%c1_61, %c3_62] : memref<3x8xf32, #tpu.memory_space<smem>>
    %c1_63 = arith.constant 1 : index
    %c4_64 = arith.constant 4 : index
    %132 = memref.load %arg0[%c1_63, %c4_64] : memref<3x8xf32, #tpu.memory_space<smem>>
    %c1_65 = arith.constant 1 : index
    %c5_66 = arith.constant 5 : index
    %133 = memref.load %arg0[%c1_65, %c5_66] : memref<3x8xf32, #tpu.memory_space<smem>>
    %c1_67 = arith.constant 1 : index
    %c6_68 = arith.constant 6 : index
    %134 = memref.load %arg0[%c1_67, %c6_68] : memref<3x8xf32, #tpu.memory_space<smem>>
    %135 = arith.truncf %127 : vector<4x512xf32> to vector<4x512xbf16>
    %cst_69 = arith.constant dense<0.000000e+00> : vector<32x512xf32>
    %136 = tpu.matmul %29, %135, %cst_69 {dimension_numbers = #tpu.dot_dimension_numbers<[1], [0], [0], [1], [0, 0, 1, 1], [], []>} : vector<32x4xbf16>, vector<4x512xbf16>, vector<32x512xf32> -> vector<32x512xf32>
    %137 = arith.addf %37, %136 : vector<32x512xf32>
    %138 = vector.broadcast %132 : f32 to vector<32x512xf32>
    %139 = arith.addf %137, %138 : vector<32x512xf32>
    %140 = arith.mulf %139, %139 : vector<32x512xf32>
    %141 = arith.mulf %139, %140 : vector<32x512xf32>
    %cst_70 = arith.constant 4.471500e-02 : f32
    %142 = vector.broadcast %cst_70 : f32 to vector<32x512xf32>
    %143 = arith.mulf %142, %141 : vector<32x512xf32>
    %144 = arith.addf %139, %143 : vector<32x512xf32>
    %cst_71 = arith.constant 0.797884583 : f32
    %145 = vector.broadcast %cst_71 : f32 to vector<32x512xf32>
    %146 = arith.mulf %145, %144 : vector<32x512xf32>
    %147 = math.tanh %146 : vector<32x512xf32>
    %cst_72 = arith.constant 1.000000e+00 : f32
    %148 = vector.broadcast %cst_72 : f32 to vector<32x512xf32>
    %149 = arith.addf %148, %147 : vector<32x512xf32>
    %cst_73 = arith.constant 5.000000e-01 : f32
    %150 = vector.broadcast %cst_73 : f32 to vector<32x512xf32>
    %151 = arith.mulf %150, %149 : vector<32x512xf32>
    %152 = arith.mulf %139, %151 : vector<32x512xf32>
    %153 = arith.truncf %152 : vector<32x512xf32> to vector<32x512xbf16>
    %cst_74 = arith.constant dense<0.000000e+00> : vector<4x512xf32>
    %154 = tpu.matmul %31, %153, %cst_74 {dimension_numbers = #tpu.dot_dimension_numbers<[1], [0], [0], [1], [0, 0, 1, 1], [], []>} : vector<4x32xbf16>, vector<32x512xbf16>, vector<4x512xf32> -> vector<4x512xf32>
    %155 = arith.addf %40, %136 : vector<32x512xf32>
    %156 = vector.broadcast %132 : f32 to vector<32x512xf32>
    %157 = arith.addf %155, %156 : vector<32x512xf32>
    %158 = arith.mulf %157, %157 : vector<32x512xf32>
    %159 = arith.mulf %157, %158 : vector<32x512xf32>
    %cst_75 = arith.constant 4.471500e-02 : f32
    %160 = vector.broadcast %cst_75 : f32 to vector<32x512xf32>
    %161 = arith.mulf %160, %159 : vector<32x512xf32>
    %162 = arith.addf %157, %161 : vector<32x512xf32>
    %cst_76 = arith.constant 0.797884583 : f32
    %163 = vector.broadcast %cst_76 : f32 to vector<32x512xf32>
    %164 = arith.mulf %163, %162 : vector<32x512xf32>
    %165 = math.tanh %164 : vector<32x512xf32>
    %cst_77 = arith.constant 1.000000e+00 : f32
    %166 = vector.broadcast %cst_77 : f32 to vector<32x512xf32>
    %167 = arith.addf %166, %165 : vector<32x512xf32>
    %cst_78 = arith.constant 5.000000e-01 : f32
    %168 = vector.broadcast %cst_78 : f32 to vector<32x512xf32>
    %169 = arith.mulf %168, %167 : vector<32x512xf32>
    %170 = arith.mulf %157, %169 : vector<32x512xf32>
    %171 = arith.truncf %170 : vector<32x512xf32> to vector<32x512xbf16>
    %cst_79 = arith.constant dense<0.000000e+00> : vector<4x512xf32>
    %172 = tpu.matmul %31, %171, %cst_79 {dimension_numbers = #tpu.dot_dimension_numbers<[1], [0], [0], [1], [0, 0, 1, 1], [], []>} : vector<4x32xbf16>, vector<32x512xbf16>, vector<4x512xf32> -> vector<4x512xf32>
    %173 = arith.addf %44, %136 : vector<32x512xf32>
    %174 = vector.broadcast %132 : f32 to vector<32x512xf32>
    %175 = arith.addf %173, %174 : vector<32x512xf32>
    %176 = arith.mulf %175, %175 : vector<32x512xf32>
    %177 = arith.mulf %175, %176 : vector<32x512xf32>
    %cst_80 = arith.constant 4.471500e-02 : f32
    %178 = vector.broadcast %cst_80 : f32 to vector<32x512xf32>
    %179 = arith.mulf %178, %177 : vector<32x512xf32>
    %180 = arith.addf %175, %179 : vector<32x512xf32>
    %cst_81 = arith.constant 0.797884583 : f32
    %181 = vector.broadcast %cst_81 : f32 to vector<32x512xf32>
    %182 = arith.mulf %181, %180 : vector<32x512xf32>
    %183 = math.tanh %182 : vector<32x512xf32>
    %cst_82 = arith.constant 1.000000e+00 : f32
    %184 = vector.broadcast %cst_82 : f32 to vector<32x512xf32>
    %185 = arith.addf %184, %183 : vector<32x512xf32>
    %cst_83 = arith.constant 5.000000e-01 : f32
    %186 = vector.broadcast %cst_83 : f32 to vector<32x512xf32>
    %187 = arith.mulf %186, %185 : vector<32x512xf32>
    %188 = arith.mulf %175, %187 : vector<32x512xf32>
    %189 = arith.truncf %188 : vector<32x512xf32> to vector<32x512xbf16>
    %cst_84 = arith.constant dense<0.000000e+00> : vector<4x512xf32>
    %190 = tpu.matmul %31, %189, %cst_84 {dimension_numbers = #tpu.dot_dimension_numbers<[1], [0], [0], [1], [0, 0, 1, 1], [], []>} : vector<4x32xbf16>, vector<32x512xbf16>, vector<4x512xf32> -> vector<4x512xf32>
    %191 = arith.subf %154, %172 : vector<4x512xf32>
    %192 = vector.broadcast %133 : f32 to vector<4x512xf32>
    %193 = arith.mulf %192, %191 : vector<4x512xf32>
    %194 = arith.addf %190, %193 : vector<4x512xf32>
    %195 = arith.subf %172, %190 : vector<4x512xf32>
    %196 = vector.broadcast %134 : f32 to vector<4x512xf32>
    %197 = arith.mulf %196, %195 : vector<4x512xf32>
    %198 = arith.addf %194, %197 : vector<4x512xf32>
    %199 = vector.broadcast %32 : vector<4x1xf32> to vector<4x512xf32>
    %200 = arith.addf %198, %199 : vector<4x512xf32>
    %201 = vector.broadcast %128 : f32 to vector<4x512xf32>
    %202 = arith.mulf %201, %200 : vector<4x512xf32>
    %203 = arith.subf %127, %202 : vector<4x512xf32>
    %204 = vector.broadcast %129 : f32 to vector<4x512xf32>
    %205 = arith.mulf %203, %204 : vector<4x512xf32>
    %206 = vector.broadcast %130 : f32 to vector<4x512xf32>
    %207 = arith.mulf %206, %205 : vector<4x512xf32>
    %208 = vector.broadcast %131 : f32 to vector<4x512xf32>
    %209 = arith.mulf %208, %200 : vector<4x512xf32>
    %210 = arith.addf %207, %209 : vector<4x512xf32>
    %c2_85 = arith.constant 2 : index
    %c0_86 = arith.constant 0 : index
    %211 = memref.load %arg0[%c2_85, %c0_86] : memref<3x8xf32, #tpu.memory_space<smem>>
    %c2_87 = arith.constant 2 : index
    %c1_88 = arith.constant 1 : index
    %212 = memref.load %arg0[%c2_87, %c1_88] : memref<3x8xf32, #tpu.memory_space<smem>>
    %c2_89 = arith.constant 2 : index
    %c2_90 = arith.constant 2 : index
    %213 = memref.load %arg0[%c2_89, %c2_90] : memref<3x8xf32, #tpu.memory_space<smem>>
    %c2_91 = arith.constant 2 : index
    %c3_92 = arith.constant 3 : index
    %214 = memref.load %arg0[%c2_91, %c3_92] : memref<3x8xf32, #tpu.memory_space<smem>>
    %c2_93 = arith.constant 2 : index
    %c4_94 = arith.constant 4 : index
    %215 = memref.load %arg0[%c2_93, %c4_94] : memref<3x8xf32, #tpu.memory_space<smem>>
    %c2_95 = arith.constant 2 : index
    %c5_96 = arith.constant 5 : index
    %216 = memref.load %arg0[%c2_95, %c5_96] : memref<3x8xf32, #tpu.memory_space<smem>>
    %c2_97 = arith.constant 2 : index
    %c6_98 = arith.constant 6 : index
    %217 = memref.load %arg0[%c2_97, %c6_98] : memref<3x8xf32, #tpu.memory_space<smem>>
    %218 = arith.truncf %210 : vector<4x512xf32> to vector<4x512xbf16>
    %cst_99 = arith.constant dense<0.000000e+00> : vector<32x512xf32>
    %219 = tpu.matmul %29, %218, %cst_99 {dimension_numbers = #tpu.dot_dimension_numbers<[1], [0], [0], [1], [0, 0, 1, 1], [], []>} : vector<32x4xbf16>, vector<4x512xbf16>, vector<32x512xf32> -> vector<32x512xf32>
    %220 = arith.addf %37, %219 : vector<32x512xf32>
    %221 = vector.broadcast %215 : f32 to vector<32x512xf32>
    %222 = arith.addf %220, %221 : vector<32x512xf32>
    %223 = arith.mulf %222, %222 : vector<32x512xf32>
    %224 = arith.mulf %222, %223 : vector<32x512xf32>
    %cst_100 = arith.constant 4.471500e-02 : f32
    %225 = vector.broadcast %cst_100 : f32 to vector<32x512xf32>
    %226 = arith.mulf %225, %224 : vector<32x512xf32>
    %227 = arith.addf %222, %226 : vector<32x512xf32>
    %cst_101 = arith.constant 0.797884583 : f32
    %228 = vector.broadcast %cst_101 : f32 to vector<32x512xf32>
    %229 = arith.mulf %228, %227 : vector<32x512xf32>
    %230 = math.tanh %229 : vector<32x512xf32>
    %cst_102 = arith.constant 1.000000e+00 : f32
    %231 = vector.broadcast %cst_102 : f32 to vector<32x512xf32>
    %232 = arith.addf %231, %230 : vector<32x512xf32>
    %cst_103 = arith.constant 5.000000e-01 : f32
    %233 = vector.broadcast %cst_103 : f32 to vector<32x512xf32>
    %234 = arith.mulf %233, %232 : vector<32x512xf32>
    %235 = arith.mulf %222, %234 : vector<32x512xf32>
    %236 = arith.truncf %235 : vector<32x512xf32> to vector<32x512xbf16>
    %cst_104 = arith.constant dense<0.000000e+00> : vector<4x512xf32>
    %237 = tpu.matmul %31, %236, %cst_104 {dimension_numbers = #tpu.dot_dimension_numbers<[1], [0], [0], [1], [0, 0, 1, 1], [], []>} : vector<4x32xbf16>, vector<32x512xbf16>, vector<4x512xf32> -> vector<4x512xf32>
    %238 = arith.addf %40, %219 : vector<32x512xf32>
    %239 = vector.broadcast %215 : f32 to vector<32x512xf32>
    %240 = arith.addf %238, %239 : vector<32x512xf32>
    %241 = arith.mulf %240, %240 : vector<32x512xf32>
    %242 = arith.mulf %240, %241 : vector<32x512xf32>
    %cst_105 = arith.constant 4.471500e-02 : f32
    %243 = vector.broadcast %cst_105 : f32 to vector<32x512xf32>
    %244 = arith.mulf %243, %242 : vector<32x512xf32>
    %245 = arith.addf %240, %244 : vector<32x512xf32>
    %cst_106 = arith.constant 0.797884583 : f32
    %246 = vector.broadcast %cst_106 : f32 to vector<32x512xf32>
    %247 = arith.mulf %246, %245 : vector<32x512xf32>
    %248 = math.tanh %247 : vector<32x512xf32>
    %cst_107 = arith.constant 1.000000e+00 : f32
    %249 = vector.broadcast %cst_107 : f32 to vector<32x512xf32>
    %250 = arith.addf %249, %248 : vector<32x512xf32>
    %cst_108 = arith.constant 5.000000e-01 : f32
    %251 = vector.broadcast %cst_108 : f32 to vector<32x512xf32>
    %252 = arith.mulf %251, %250 : vector<32x512xf32>
    %253 = arith.mulf %240, %252 : vector<32x512xf32>
    %254 = arith.truncf %253 : vector<32x512xf32> to vector<32x512xbf16>
    %cst_109 = arith.constant dense<0.000000e+00> : vector<4x512xf32>
    %255 = tpu.matmul %31, %254, %cst_109 {dimension_numbers = #tpu.dot_dimension_numbers<[1], [0], [0], [1], [0, 0, 1, 1], [], []>} : vector<4x32xbf16>, vector<32x512xbf16>, vector<4x512xf32> -> vector<4x512xf32>
    %256 = arith.addf %44, %219 : vector<32x512xf32>
    %257 = vector.broadcast %215 : f32 to vector<32x512xf32>
    %258 = arith.addf %256, %257 : vector<32x512xf32>
    %259 = arith.mulf %258, %258 : vector<32x512xf32>
    %260 = arith.mulf %258, %259 : vector<32x512xf32>
    %cst_110 = arith.constant 4.471500e-02 : f32
    %261 = vector.broadcast %cst_110 : f32 to vector<32x512xf32>
    %262 = arith.mulf %261, %260 : vector<32x512xf32>
    %263 = arith.addf %258, %262 : vector<32x512xf32>
    %cst_111 = arith.constant 0.797884583 : f32
    %264 = vector.broadcast %cst_111 : f32 to vector<32x512xf32>
    %265 = arith.mulf %264, %263 : vector<32x512xf32>
    %266 = math.tanh %265 : vector<32x512xf32>
    %cst_112 = arith.constant 1.000000e+00 : f32
    %267 = vector.broadcast %cst_112 : f32 to vector<32x512xf32>
    %268 = arith.addf %267, %266 : vector<32x512xf32>
    %cst_113 = arith.constant 5.000000e-01 : f32
    %269 = vector.broadcast %cst_113 : f32 to vector<32x512xf32>
    %270 = arith.mulf %269, %268 : vector<32x512xf32>
    %271 = arith.mulf %258, %270 : vector<32x512xf32>
    %272 = arith.truncf %271 : vector<32x512xf32> to vector<32x512xbf16>
    %cst_114 = arith.constant dense<0.000000e+00> : vector<4x512xf32>
    %273 = tpu.matmul %31, %272, %cst_114 {dimension_numbers = #tpu.dot_dimension_numbers<[1], [0], [0], [1], [0, 0, 1, 1], [], []>} : vector<4x32xbf16>, vector<32x512xbf16>, vector<4x512xf32> -> vector<4x512xf32>
    %274 = arith.subf %237, %255 : vector<4x512xf32>
    %275 = vector.broadcast %216 : f32 to vector<4x512xf32>
    %276 = arith.mulf %275, %274 : vector<4x512xf32>
    %277 = arith.addf %273, %276 : vector<4x512xf32>
    %278 = arith.subf %255, %273 : vector<4x512xf32>
    %279 = vector.broadcast %217 : f32 to vector<4x512xf32>
    %280 = arith.mulf %279, %278 : vector<4x512xf32>
    %281 = arith.addf %277, %280 : vector<4x512xf32>
    %282 = vector.broadcast %32 : vector<4x1xf32> to vector<4x512xf32>
    %283 = arith.addf %281, %282 : vector<4x512xf32>
    %284 = vector.broadcast %211 : f32 to vector<4x512xf32>
    %285 = arith.mulf %284, %283 : vector<4x512xf32>
    %286 = arith.subf %210, %285 : vector<4x512xf32>
    %287 = vector.broadcast %212 : f32 to vector<4x512xf32>
    %288 = arith.mulf %286, %287 : vector<4x512xf32>
    %289 = vector.broadcast %213 : f32 to vector<4x512xf32>
    %290 = arith.mulf %289, %288 : vector<4x512xf32>
    %291 = vector.broadcast %214 : f32 to vector<4x512xf32>
    %292 = arith.mulf %291, %283 : vector<4x512xf32>
    %293 = arith.addf %290, %292 : vector<4x512xf32>
    %c0_115 = arith.constant 0 : index
    %c0_116 = arith.constant 0 : index
    %294 = vector.load %arg11[%c0_115, %c0_116] : memref<3x5xf32, #tpu.memory_space<vmem>>, vector<3x4xf32>
    %295 = arith.truncf %294 : vector<3x4xf32> to vector<3x4xbf16>
    %c0_117 = arith.constant 0 : index
    %c4_118 = arith.constant 4 : index
    %296 = vector.load %arg11[%c0_117, %c4_118] : memref<3x5xf32, #tpu.memory_space<vmem>>, vector<3x1xf32>
    %cst_119 = arith.constant 5.4899807 : f32
    %297 = vector.broadcast %cst_119 : f32 to vector<4x512xf32>
    %298 = arith.mulf %293, %297 : vector<4x512xf32>
    %299 = arith.truncf %298 : vector<4x512xf32> to vector<4x512xbf16>
    %cst_120 = arith.constant dense<0.000000e+00> : vector<3x512xf32>
    %300 = tpu.matmul %295, %299, %cst_120 {dimension_numbers = #tpu.dot_dimension_numbers<[1], [0], [0], [1], [0, 0, 1, 1], [], []>} : vector<3x4xbf16>, vector<4x512xbf16>, vector<3x512xf32> -> vector<3x512xf32>
    %301 = vector.broadcast %296 : vector<3x1xf32> to vector<3x512xf32>
    %302 = arith.addf %300, %301 : vector<3x512xf32>
    %c0_121 = arith.constant 0 : index
    %c0_122 = arith.constant 0 : index
    %303 = vector.load %arg12[%c0_121, %c0_122] : memref<3x512xf32, #tpu.memory_space<vmem>>, vector<3x512xf32>
    tpu.vector_store %arg12[%c0_121, %c0_122], %302 {strides = array<i32>} : memref<3x512xf32, #tpu.memory_space<vmem>>, vector<3x512xf32>,
    return
  }
}

module attributes {stable_mosaic.version = 11 : i64} {
  func.func @_composite_kernel(%arg0: memref<3x1024xf32, #tpu.memory_space<vmem>>, %arg1: memref<3x1024xf32, #tpu.memory_space<vmem>>, %arg2: memref<1x1024xf32, #tpu.memory_space<vmem>>, %arg3: memref<3x1024xf32, #tpu.memory_space<vmem>>) attributes {dimension_semantics = [], scalar_prefetch = 0 : i64, scratch_operands = 0 : i64, tpu.core_type = #tpu.core_type<tc>} {
    %c0 = arith.constant 0 : index
    %c0_0 = arith.constant 0 : index
    %0 = vector.load %arg0[%c0, %c0_0] : memref<3x1024xf32, #tpu.memory_space<vmem>>, vector<3x1024xf32>
    %cst = arith.constant 5.000000e-01 : f32
    %1 = vector.broadcast %cst : f32 to vector<3x1024xf32>
    %2 = arith.mulf %0, %1 : vector<3x1024xf32>
    %cst_1 = arith.constant 5.000000e-01 : f32
    %3 = vector.broadcast %cst_1 : f32 to vector<3x1024xf32>
    %4 = arith.addf %2, %3 : vector<3x1024xf32>
    %cst_2 = arith.constant 0.000000e+00 : f32
    %cst_3 = arith.constant 1.000000e+00 : f32
    %5 = vector.broadcast %cst_2 : f32 to vector<3x1024xf32>
    %6 = arith.maximumf %5, %4 : vector<3x1024xf32>
    %7 = vector.broadcast %cst_3 : f32 to vector<3x1024xf32>
    %8 = arith.minimumf %7, %6 : vector<3x1024xf32>
    %c0_4 = arith.constant 0 : index
    %c0_5 = arith.constant 0 : index
    %9 = vector.load %arg1[%c0_4, %c0_5] : memref<3x1024xf32, #tpu.memory_space<vmem>>, vector<3x1024xf32>
    %cst_6 = arith.constant 5.000000e-01 : f32
    %10 = vector.broadcast %cst_6 : f32 to vector<3x1024xf32>
    %11 = arith.mulf %9, %10 : vector<3x1024xf32>
    %cst_7 = arith.constant 5.000000e-01 : f32
    %12 = vector.broadcast %cst_7 : f32 to vector<3x1024xf32>
    %13 = arith.addf %11, %12 : vector<3x1024xf32>
    %cst_8 = arith.constant 0.000000e+00 : f32
    %cst_9 = arith.constant 1.000000e+00 : f32
    %14 = vector.broadcast %cst_8 : f32 to vector<3x1024xf32>
    %15 = arith.maximumf %14, %13 : vector<3x1024xf32>
    %16 = vector.broadcast %cst_9 : f32 to vector<3x1024xf32>
    %17 = arith.minimumf %16, %15 : vector<3x1024xf32>
    %c0_10 = arith.constant 0 : index
    %c0_11 = arith.constant 0 : index
    %18 = vector.load %arg2[%c0_10, %c0_11] : memref<1x1024xf32, #tpu.memory_space<vmem>>, vector<1x1024xf32>
    %19 = vector.broadcast %18 : vector<1x1024xf32> to vector<3x1024xf32>
    %20 = arith.mulf %8, %19 : vector<3x1024xf32>
    %cst_12 = arith.constant 1.000000e+00 : f32
    %21 = vector.broadcast %cst_12 : f32 to vector<1x1024xf32>
    %22 = arith.subf %21, %18 : vector<1x1024xf32>
    %23 = vector.broadcast %22 : vector<1x1024xf32> to vector<3x1024xf32>
    %24 = arith.mulf %17, %23 : vector<3x1024xf32>
    %25 = arith.addf %20, %24 : vector<3x1024xf32>
    %c0_13 = arith.constant 0 : index
    %c0_14 = arith.constant 0 : index
    %26 = vector.load %arg3[%c0_13, %c0_14] : memref<3x1024xf32, #tpu.memory_space<vmem>>, vector<3x1024xf32>
    tpu.vector_store %arg3[%c0_13, %c0_14], %25 {strides = array<i32>} : memref<3x1024xf32, #tpu.memory_space<vmem>>, vector<3x1024xf32>,
    return
  }
}

</mosaic_0001>

<bundles_post_ra>
// kernel: _edit_device.3
= control target key start
LH: loop header
LB: loop body
LE: loop exit
PB: predicated region body
PF: predicated region fallthrough
CT: control target
= control target key end

     0   :  { %v56_v0 = vlaneseq  ;;  %s248_s0 = inlined_call_operand.vmem [shape: f32[3,1024], index: 0, kind: input, shape index: {}]   ;;  %s249_s1 = inlined_call_operand.vmem [shape: f32[3,1024], index: 1, kind: input, shape index: {}]   ;;  %s250_s2 = inlined_call_operand.vmem [shape: f32[1,1024], index: 2, kind: input, shape index: {}]   ;;  %s251_s3 = inlined_call_operand.vmem [shape: f32[3,1024], index: 3, kind: output, shape index: {}]  }
   0x1   :  { %v14_v1 = vld [vmem:[%s248_s0] sm:$0x77]  ;;  %v15_v7 = vld [vmem:[%s248_s0 + $0x8] sm:$0x77]  ;;  %v16_v27 = vld [vmem:[%s248_s0 + $0x10] sm:$0x77] }
   0x2   :  { %v34_v2 = vld [vmem:[%s249_s1] sm:$0x77]  ;;  %v18_v4 = vmul.f32 0.5, %v14_v1  ;;  %v189_v6 = vshrl.u32 %v56_v0, 7  ;;  %v19_v9 = vmul.f32 0.5, %v15_v7  ;;  %v20_v40 = vmul.f32 0.5, %v16_v27 }
   0x3   :  { %v187_v3 = vld [vmem:[%s250_s2] sm:$0xff]  ;;  %v38_v5 = vmul.f32 0.5, %v34_v2  ;;  %v35_v10 = vld [vmem:[%s249_s1 + $0x8] sm:$0x77]  ;;  %v36_v32 = vld [vmem:[%s249_s1 + $0x10] sm:$0x77] }
   0x4   :  { %v195_v8 = vsub.f32 1.0, %v187_v3  ;;  %v22_v11 = vadd.f32 0.5, %v18_v4  ;;  %v58_v13 = vsub.s32 0, %v189_v6  ;;  %v62_v14 = vsub.s32 1, %v189_v6  ;;  %v17_v41 = vld [vmem:[%s248_s0 + $0x18] sm:$0x77] }
   0x5   :  { %v42_v12 = vadd.f32 0.5, %v38_v5  ;;  %v23_v15 = vadd.f32 0.5, %v19_v9  ;;  %v39_v16 = vmul.f32 0.5, %v35_v10  ;;  %v66_v17 = vsub.s32 2, %v189_v6  ;;  %v37_v54 = vld [vmem:[%s249_s1 + $0x18] sm:$0x77] }
   0x6   :  { %v70_v18 = vsub.s32 3, %v189_v6  ;;  %v26_v19 = vmax.f32 %v22_v11, 0.0  ;;  %v59_v21 = vrot.slane %v187_v3, %v58_v13  ;;  %v63_v22 = vrot.slane %v187_v3, %v62_v14 }
   0x7   :  { %v46_v20 = vmax.f32 %v42_v12, 0.0  ;;  %v105_v23 = vrot.slane %v195_v8, %v58_v13  ;;  %v109_v24 = vrot.slane %v195_v8, %v62_v14  ;;  %v27_v25 = vmax.f32 %v23_v15, 0.0 }
   0x8   :  { %v43_v26 = vadd.f32 0.5, %v39_v16  ;;  %v30_v28 = vmin.f32 %v26_v19, 1.0  ;;  %v88_v30 = vcombine.low %v59_v21, %v63_v22  ;;  %v67_v31 = vrot.slane %v187_v3, %v66_v17 }
   0x9   :  { %v50_v29 = vmin.f32 %v46_v20, 1.0  ;;  %v134_v33 = vcombine.low %v105_v23, %v109_v24  ;;  %v31_v34 = vmin.f32 %v27_v25, 1.0  ;;  %v71_v36 = vrot.slane %v187_v3, %v70_v18 }
   0xa   :  { %v47_v35 = vmax.f32 %v43_v26, 0.0  ;;  %v96_v37 = vmul.f32 %v88_v30, %v30_v28  ;;  %v113_v38 = vrot.slane %v195_v8, %v66_v17  ;;  %v117_v39 = vrot.slane %v195_v8, %v70_v18 }
   0xb   :  { %v142_v42 = vmul.f32 %v134_v33, %v50_v29  ;;  %v89_v44 = vcombine.low %v67_v31, %v71_v36  ;;  %v40_v45 = vmul.f32 0.5, %v36_v32  ;;  %v24_v47 = vadd.f32 0.5, %v20_v40 }
   0xc   :  { %v51_v43 = vmin.f32 %v47_v35, 1.0  ;;  %v135_v46 = vcombine.low %v113_v38, %v117_v39  ;;  %v74_v48 = vsub.s32 4, %v189_v6  ;;  %v78_v49 = vsub.s32 5, %v189_v6 }
   0xd   :  { %v146_v50 = vadd.f32 %v142_v42, %v96_v37  ;;  %v97_v51 = vmul.f32 %v89_v44, %v31_v34  ;;  %v44_v52 = vadd.f32 0.5, %v40_v45  ;;  %v21_v53 = vmul.f32 0.5, %v17_v41 }
   0xe   :  { %v143_v55 = vmul.f32 %v135_v46, %v51_v43  ;;  %v28_v56 = vmax.f32 %v24_v47, 0.0  ;;  %v75_v57 = vrot.slane %v187_v3, %v74_v48  ;;  %v79_v58 = vrot.slane %v187_v3, %v78_v49 }
   0xf   :  { %150 = vst [vmem:[%s251_s3] sm:$0x77] %v146_v50  ;;  %v48_v59 = vmax.f32 %v44_v52, 0.0  ;;  %v121_v60 = vrot.slane %v195_v8, %v74_v48  ;;  %v125_v61 = vrot.slane %v195_v8, %v78_v49  ;;  %v25_v62 = vadd.f32 0.5, %v21_v53 }
  0x10   :  { %v147_v63 = vadd.f32 %v143_v55, %v97_v51  ;;  %v32_v0 = vmin.f32 %v28_v56, 1.0  ;;  %v90_v1 = vcombine.low %v75_v57, %v79_v58  ;;  %v41_v2 = vmul.f32 0.5, %v37_v54 }
  0x11   :  { %v52_v4 = vmin.f32 %v48_v59, 1.0  ;;  %v136_v5 = vcombine.low %v121_v60, %v125_v61  ;;  %v29_v7 = vmax.f32 %v25_v62, 0.0  ;;  %v82_v9 = vsub.s32 6, %v189_v6 }
  0x12   :  { %151 = vst [vmem:[%s251_s3 + $0x8] sm:$0x77] %v147_v63  ;;  %v98_v10 = vmul.f32 %v90_v1, %v32_v0  ;;  %v45_v11 = vadd.f32 0.5, %v41_v2  ;;  %v86_v12 = vsub.s32 7, %v189_v6 }
  0x13   :  { %v144_v13 = vmul.f32 %v136_v5, %v52_v4  ;;  %v83_v14 = vrot.slane %v187_v3, %v82_v9  ;;  %v129_v15 = vrot.slane %v195_v8, %v82_v9  ;;  %v33_v16 = vmin.f32 %v29_v7, 1.0 }
  0x14   :  { %v49_v17 = vmax.f32 %v45_v11, 0.0  ;;  %v87_v18 = vrot.slane %v187_v3, %v86_v12  ;;  %v133_v19 = vrot.slane %v195_v8, %v86_v12 }
  0x15   :  { %v148_v20 = vadd.f32 %v144_v13, %v98_v10 }
  0x16   :  { %v53_v21 = vmin.f32 %v49_v17, 1.0  ;;  %v91_v22 = vcombine.low %v83_v14, %v87_v18  ;;  %v137_v23 = vcombine.low %v129_v15, %v133_v19 }
  0x17   :  { %152 = vst [vmem:[%s251_s3 + $0x10] sm:$0x77] %v148_v20 }
  0x18   :  { %v99_v6 = vmul.f32 %v91_v22, %v33_v16  ;;  %v145_v24 = vmul.f32 %v137_v23, %v53_v21 }
  0x1a   :  { %v149_v25 = vadd.f32 %v145_v24, %v99_v6 }
  0x1c   :  { %153 = vst [vmem:[%s251_s3 + $0x18] sm:$0x77] %v149_v25 }

// kernel: _edit_device.2
= control target key start
LH: loop header
LB: loop body
LE: loop exit
PB: predicated region body
PF: predicated region fallthrough
CT: control target
= control target key end

     0   :  { %17 = vsyncpa [#allocation3], 0  ;;  %s6312_s0 = inlined_call_operand.vmem [shape: f32[3,8], index: 0, kind: input, shape index: {}]   ;;  %s6313_s1 = inlined_call_operand.vmem [shape: f32[4], index: 1, kind: input, shape index: {}]   ;;  %s6314_s2 = inlined_call_operand.vmem [shape: f32[3,1024], index: 2, kind: input, shape index: {}]   ;;  %s6315_s3 = inlined_call_operand.vmem [shape: f32[4,512], index: 3, kind: input, shape index: {}]   ;;  %s6316_s4 = inlined_call_operand.vmem [shape: f32[4,512], index: 4, kind: input, shape index: {}]   ;;  %s6317_s5 = inlined_call_operand.vmem [shape: f32[4,4], index: 5, kind: input, shape index: {}]   ;;  %s6318_s6 = inlined_call_operand.vmem [shape: bf16[32,4], index: 6, kind: input, shape index: {}]   ;;  %s6319_s7 = inlined_call_operand.vmem [shape: bf16[32,4], index: 7, kind: input, shape index: {}]   ;;  %s6320_s8 = inlined_call_operand.vmem [shape: bf16[4,32], index: 8, kind: input, shape index: {}]   ;;  %s6321_s9 = inlined_call_operand.vmem [shape: f32[32,3], index: 9, kind: input, shape index: {}]   ;;  %s6322_s10 = inlined_call_operand.vmem [shape: f32[4,1], index: 10, kind: input, shape index: {}]   ;;  %s6323_s11 = inlined_call_operand.vmem [shape: f32[3,5], index: 11, kind: input, shape index: {}]   ;;  %s6324_s12 = inlined_call_operand.vmem [shape: f32[3,512], index: 12, kind: output, shape index: {}]  }
   0x1   :  { %s25_s23 = sshll.u32 %s6312_s0, 4  ;;  %s26_s23 = int_to_ptr.vmem [resolvable:$true] %s25_s23 }
   0x2   :  { %18 = vsyncpa [#allocation5], 0  ;;  %s35_s26 = sshll.u32 %s6313_s1, 4  ;;  %s4092_s27 = scalar_lea.vmem %s26_s23, 64  ;;  %s36_s26 = int_to_ptr.vmem [resolvable:$true] %s35_s26 }
   0x3   :  { %p4093_p0 = scmp.ne.s32.totalorder %s26_s23, %s4092_s27  ;;  %p4097_p1 = scmp.lt.s32.totalorder %s26_s23, %s26_s23 }
   0x4   :  { %p4098_p2 = scmp.lt.s32.totalorder %s4092_s27, %s4092_s27 }
   0x6   :  { %p4099_p3 = por %p4098_p2, %p4097_p1 }
   0x8   :  { %p4100_p4 = pnand %p4099_p3, %p4093_p0 }
   0xa   :  { %4103 = shalt.err (!%p4100_p4)
}
   0xb   :  { %s4120_s28 = smov [#allocation2]   ;;  %s4104_s29 = scalar_lea.vmem %s36_s26, 16 }
   0xc   :  { %28 = dma.vmem_to_smem %s26_s23, 64, %s4120_s28, [#allocation3]  }
   0xd   :  { %p4105_p5 = scmp.ne.s32.totalorder %s36_s26, %s4104_s29  ;;  %p4109_p6 = scmp.lt.s32.totalorder %s36_s26, %s36_s26 }
   0xe   :  { %p4110_p7 = scmp.lt.s32.totalorder %s4104_s29, %s4104_s29 }
  0x10   :  { %p4111_p8 = por %p4110_p7, %p4109_p6 }
  0x12   :  { %p4112_p9 = pnand %p4111_p8, %p4105_p5 }
  0x14   :  { %4115 = shalt.err (!%p4112_p9)
}
  0x15   :  { %s4121_s0 = smov [#allocation4]  }
  0x16   :  { %38 = dma.vmem_to_smem %s36_s26, 16, %s4121_s0, [#allocation5]  }
  0x17   :  { %4116 = dma.done.wait [#allocation3], 64  }
  0x18   :  { %4117 = vsyncadd [#allocation3], 4294967232 }
  0x19   :  { %4118 = dma.done.wait [#allocation5], 16  }
  0x1a   :  { %4119 = vsyncadd [#allocation5], 4294967280 }
  0x1b   :  { %65 = sfence }
  0x1c   :  { %v72_v0 = vld [vmem:[%s6314_s2] sm:$0x77]  ;;  %vm113_vm0 = vcmask 1040384   ;;  %v73_v2 = vld [vmem:[%s6314_s2 + $0x8] sm:$0x77]  ;;  %v6325_v3 = vmov 0  }
  0x1d   :  { %v76_v1 = vmul.f32 2.0, %v72_v0  ;;  %173 = vmatprep.mubr.bf16.mxu0 %v6325_v3  ;;  %214 = vmatprep.mubr.bf16.mxu1 %v6325_v3  ;;  %vm114_vm1 = vcmask 1041408   ;;  %v4123_v4 = vmov 65535   ;;  %v77_v6 = vmul.f32 2.0, %v73_v2  ;;  %v74_v7 = vld [vmem:[%s6314_s2 + $0x10] sm:$0x77] }
  0x1e   :  { %v115_v5 = vsel %vm113_vm0, 4294967295, %v4123_v4  ;;  %3786 = vset.pattern.permute.xlu1 %v6325_v3  ;;  %v78_v9 = vmul.f32 2.0, %v74_v7  ;;  %v75_v10 = vld [vmem:[%s6314_s2 + $0x18] sm:$0x77]  ;;  %v70_v12 = vld [vmem:[%s6317_s5] sm:$0xf] }
  0x1f   :  { %v3698_v8 = vadd.f32 -1.0, %v76_v1  ;;  %v3699_v11 = vadd.f32 -1.0, %v77_v6  ;;  %v79_v13 = vmul.f32 2.0, %v75_v10  ;;  %v4124_v14 = vmov 3   ;;  %v496_v39 = vld [vmem:[%s6321_s9 + $0x18] sm:$0xff]  ;;  %v495_v40 = vld [vmem:[%s6321_s9 + $0x10] sm:$0xff] }
  0x20   :  { %3784 = vset.pattern.permute.xlu0 %v4124_v14  ;;  %v116_v16 = vsel %vm114_vm1, %v115_v5, 0  ;;  %v3700_v18 = vadd.f32 -1.0, %v78_v9  ;;  %v71_v34 = vpack.c.bf16 %v70_v12, %v70_v12  ;;  %vm109_vm2 = vcmask 23552   ;;  %514 = vperm.xlu1 %3786, %v496_v39   ;;  %v493_v41 = vld [vmem:[%s6321_s9] sm:$0xff]  ;;  %v494_v42 = vld [vmem:[%s6321_s9 + $0x8] sm:$0xff]  ;;  %s67_s27 = sld [smem:[#allocation4]] }
  0x21   :  { %v88_v15 = vcombine.high %v3698_v8, %v3698_v8  ;;  %v96_v17 = vpack.c.bf16 %v3698_v8, %v3698_v8  ;;  %106 = vperm.xlu0 %3784, %v70_v12   ;;  %v89_v19 = vcombine.high %v3699_v11, %v3699_v11  ;;  %v98_v20 = vpack.c.bf16 %v3699_v11, %v3699_v11  ;;  %s3697_s28 = sld [smem:[#allocation4 + $0x2]]  ;;  %v305_v45 = vld [vmem:[%s6315_s3] sm:$0xff]  ;;  %v306_v47 = vld [vmem:[%s6315_s3 + $0x8] sm:$0xff] }
  0x22   :  { %v3701_v21 = vadd.f32 -1.0, %v79_v13  ;;  %v90_v23 = vcombine.high %v3700_v18, %v3700_v18  ;;  %v100_v27 = vpack.c.bf16 %v3700_v18, %v3700_v18  ;;  %v4125_v43 = vmov 1   ;;  %s3696_s30 = sld [smem:[#allocation4 + $0x1]]  ;;  %v329_v52 = vld [vmem:[%s6316_s4] sm:$0xff]  ;;  %v330_v56 = vld [vmem:[%s6316_s4 + $0x8] sm:$0xff] }
  0x23   :  { %v97_v22 = vpack.c.bf16 %v88_v15, %v88_v15  ;;  %v99_v24 = vpack.c.bf16 %v89_v19, %v89_v19  ;;  %v118_v25 = vand.u32 %v116_v16, %v96_v17  ;;  %v124_v29 = vand.u32 %v116_v16, %v98_v20  ;;  %s3717_s5 = sld [smem:[#allocation2 + $0x4]] }
  0x24   :  { %v91_v26 = vcombine.high %v3701_v21, %v3701_v21  ;;  %v101_v30 = vpack.c.bf16 %v90_v23, %v90_v23  ;;  %v102_v31 = vpack.c.bf16 %v3701_v21, %v3701_v21  ;;  %v130_v37 = vand.u32 %v116_v16, %v100_v27  ;;  %499 = vperm.xlu1 %3786, %v493_v41   ;;  %s3718_s24 = sld [smem:[#allocation2 + $0x5]] }
  0x25   :  { %v121_v28 = vand.u32 %v116_v16, %v97_v22  ;;  %3785 = vset.pattern.permute.xlu0 %v6325_v3  ;;  %v127_v32 = vand.u32 %v116_v16, %v99_v24  ;;  %v4126_v44 = vmov 2   ;;  %vm368_vm3 = vcmask 31744   ;;  %s3719_s25 = sld [smem:[#allocation2 + $0x6]] }
  0x26   :  { %v103_v33 = vpack.c.bf16 %v91_v26, %v91_v26  ;;  %v133_v35 = vand.u32 %v116_v16, %v101_v30  ;;  %v136_v38 = vand.u32 %v116_v16, %v102_v31  ;;  %509 = vperm.xlu0 %3785, %v495_v40   ;;  %v307_v46 = vstv %s67_s27  ;;  %s585_s26 = sld [smem:[#allocation2]] }
  0x27   :  { %155 = vmatprep.subr.bf16.mxu0 %v121_v28  ;;  %196 = vmatprep.subr.bf16.mxu1 %v127_v32  ;;  %v308_v48 = vmul.f32 %v307_v46, %v305_v45  ;;  %v309_v50 = vmul.f32 %v307_v46, %v306_v47  ;;  %v331_v53 = vstv %s3697_s28  ;;  %vm915_vm4 = vcmask 261120   ;;  %s3714_s27 = sld [smem:[#allocation2 + $0x1]] }
  0x28   :  { %156 = vmatpush1.bf16.msra.mxu0 %v118_v25  ;;  %v139_v36 = vand.u32 %v116_v16, %v103_v33  ;;  %197 = vmatpush1.bf16.msra.mxu1 %v124_v29  ;;  %v332_v62 = vmul.f32 %v331_v53, %v329_v52  ;;  %v324_v1 = vstv %s3696_s30  ;;  %v333_v4 = vmul.f32 %v331_v53, %v330_v56  ;;  %v3796_v52 = vld [vmem:[%s6318_s6] sm:$0xff]   ;;  %v3797_v53 = vld [vmem:[%s6318_s6 + $0x8] sm:$0xff]   ;;  %s3715_s28 = sld [smem:[#allocation2 + $0x2]] }
  0x29   :  { %237 = vmatprep.subr.bf16.mxu0 %v133_v35  ;;  %504 = vperm.xlu1 %3786, %v494_v42   ;;  %v312_v57 = vcombine.high %v308_v48, %v308_v48  ;;  %v313_v60 = vcombine.high %v309_v50, %v309_v50  ;;  %s3716_s9 = sld [smem:[#allocation2 + $0x3]] }
  0x2a   :  { %278 = vmatprep.subr.bf16.mxu1 %v139_v36  ;;  %3787 = vset.pattern.permute.xlu0 %v4125_v43  ;;  %v336_v15 = vcombine.high %v332_v62, %v332_v62  ;;  %v337_v19 = vcombine.high %v333_v4, %v333_v4  ;;  %s3738_s13 = sld [smem:[#allocation2 + $0x84]] }
  0x2b   :  { %3702 = vmatmul.mubr.msk.bf16.vlgmr.msra.gmra.mxu0 %vm109_vm2, %v71_v34  ;;  %3703 = vmatmul.mubr.msk.bf16.vlgmr.msra.gmra.mxu1 %vm109_vm2, %v71_v34  ;;  %s3739_s16 = sld [smem:[#allocation2 + $0x85]] }
  0x2c   :  { %238 = vmatpush1.bf16.msra.mxu0 %v130_v37  ;;  %279 = vmatpush1.bf16.msra.mxu1 %v136_v38  ;;  %s3740_s3 = sld [smem:[#allocation2 + $0x86]] }
  0x2d   :  { %255 = vmatprep.mubr.bf16.mxu0 %v6325_v3  ;;  %296 = vmatprep.mubr.bf16.mxu1 %v6325_v3  ;;  %s3734_s4 = sld [smem:[#allocation2 + $0x80]] }
  0x2e   :  { %542 = vperm.xlu0 %3787, %v495_v40   ;;  %3788 = vset.pattern.permute.xlu1 %v4125_v43  ;;  %s5641_s17 = sld [smem:[#allocation2 + $0x81]] }
  0x2f   :  { %546 = vperm.xlu1 %3788, %v496_v39   ;;  %s5643_s18 = sld [smem:[#allocation2 + $0x83]] }
  0x30   :  { %s3736_s19 = sld [smem:[#allocation2 + $0x82]] }
  0x31   :  { %s3757_s21 = sld [smem:[#allocation2 + $0x104]] }
  0x32   :  { %538 = vperm.xlu0 %3787, %v494_v42   ;;  %s3759_s23 = sld [smem:[#allocation2 + $0x106]] }
  0x33   :  { %3704 = vmatmul.mubr.msk.bf16.vlgmr.msra.gmra.mxu0 %vm109_vm2, %v71_v34  ;;  %3705 = vmatmul.mubr.msk.bf16.vlgmr.msra.gmra.mxu1 %vm109_vm2, %v71_v34 }
  0x34   :  { %419 = vmatprep.mubr.bf16.mxu0 %v6325_v3  ;;  %472 = vmatprep.mubr.bf16.mxu1 %v6325_v3 }
  0x35   :  { %534 = vperm.xlu1 %3788, %v493_v41  }
  0x36   :  { %3790 = vset.pattern.permute.xlu0 %v4126_v44 }
  0x37   :  { %578 = vperm.xlu0 %3790, %v496_v39  }
  0x39   :  { %3789 = vset.pattern.permute.xlu1 %v4126_v44  ;;  %v3794_v44 = vld [vmem:[%s6319_s7] sm:$0xff]  }
  0x3a   :  { %574 = vperm.xlu1 %3789, %v495_v40  }
  0x3b   :  { %3791 = vset.pattern.permute.xlu0 %v6325_v3 }
  0x3e   :  { %566 = vperm.xlu1 %3789, %v493_v41  }
  0x42   :  { %570 = vperm.xlu1 %3789, %v494_v42  }
  0x9c   :  { %v107_v49 = vpop.permute.xlu0 %106 }
  0xeb   :  { %v175_v51 = vpop.f32.mrf.mxu0  ;;  %v216_v55 = vpop.f32.mrf.mxu1 }
  0xec   :  { %v176_v54 = vadd.f32 %v175_v51, %v107_v49  ;;  %v217_v58 = vadd.f32 %v216_v55, %v107_v49  ;;  %v3795_v51 = vld [vmem:[%s6319_s7 + $0x8] sm:$0xff]  }
  0xed   :  { %v177_v59 = vpop.f32.mrf.mxu0  ;;  %v218_v0 = vpop.f32.mrf.mxu1 }
  0xee   :  { %v316_v61 = vadd.f32 %v308_v48, %v176_v54  ;;  %v178_v63 = vadd.f32 %v177_v59, %v107_v49  ;;  %v318_v2 = vadd.f32 %v309_v50, %v217_v58  ;;  %v219_v5 = vadd.f32 %v218_v0, %v107_v49  ;;  %v4300_v54 = vpop.permute.xlu1 %514  ;;  %v4304_v58 = vpop.permute.xlu0 %509 }
  0xef   :  { %v179_v6 = vpop.f32.mrf.mxu0  ;;  %v220_v9 = vpop.f32.mrf.mxu1 }
  0xf0   :  { %v320_v7 = vmul.f32 0.18215, %v316_v61  ;;  %v317_v8 = vadd.f32 %v312_v57, %v178_v63  ;;  %v322_v10 = vmul.f32 0.18215, %v318_v2  ;;  %v319_v11 = vadd.f32 %v313_v60, %v219_v5 }
  0xf1   :  { %v180_v12 = vpop.f32.mrf.mxu0  ;;  %v221_v16 = vpop.f32.mrf.mxu1 }
  0xf2   :  { %v325_v13 = vmul.f32 %v324_v1, %v320_v7  ;;  %v321_v14 = vmul.f32 0.18215, %v317_v8  ;;  %v327_v17 = vmul.f32 %v324_v1, %v322_v10  ;;  %v323_v18 = vmul.f32 0.18215, %v319_v11  ;;  %v500_v55 = vpop.permute.xlu1 %499  ;;  %v4306_v2 = vpop.permute.xlu0 %542 }
  0xf3   :  { %v257_v20 = vpop.f32.mrf.mxu0  ;;  %v298_v23 = vpop.f32.mrf.mxu1 }
  0xf4   :  { %v326_v21 = vmul.f32 %v324_v1, %v321_v14  ;;  %v258_v22 = vadd.f32 %v257_v20, %v107_v49  ;;  %v328_v24 = vmul.f32 %v324_v1, %v323_v18  ;;  %v299_v25 = vadd.f32 %v298_v23, %v107_v49 }
  0xf5   :  { %v259_v26 = vpop.f32.mrf.mxu0  ;;  %v4248_v27 = vadd.f32 %v332_v62, %v325_v13  ;;  %v300_v31 = vpop.f32.mrf.mxu1  ;;  %v4252_v32 = vadd.f32 %v333_v4, %v327_v17  ;;  %v4324_v17 = vstv %s3717_s5 }
  0xf6   :  { %v4250_v28 = vadd.f32 %v336_v15, %v326_v21  ;;  %v354_v29 = vpack.c.bf16 %v258_v22, %v258_v22  ;;  %v260_v30 = vadd.f32 %v259_v26, %v107_v49  ;;  %v4254_v33 = vadd.f32 %v337_v19, %v328_v24  ;;  %v505_v56 = vpop.permute.xlu1 %504  ;;  %v539_v11 = vpop.permute.xlu0 %538 }
  0xf7   :  { %6507 = vst [vmem:[#allocation8_spill] sm:$0xff] %v4248_v27  ;;  %6509 = vst [vmem:[#allocation10_spill] sm:$0xff] %v4252_v32  ;;  %v356_v34 = vpack.c.bf16 %v299_v25, %v299_v25  ;;  %v301_v35 = vadd.f32 %v300_v31, %v107_v49  ;;  %v261_v36 = vpop.f32.mrf.mxu0  ;;  %v302_v38 = vpop.f32.mrf.mxu1  ;;  %v592_v45 = vpack.c.bf16 %v4248_v27, %v4248_v27 }
  0xf8   :  { %6508 = vst [vmem:[#allocation9_spill] sm:$0xff] %v4250_v28  ;;  %6510 = vst [vmem:[#allocation11_spill] sm:$0xff] %v4254_v33  ;;  %v355_v37 = vpack.c.bf16 %v260_v30, %v260_v30  ;;  %v376_v41 = vsel %vm114_vm1, %v354_v29, 0  ;;  %v593_v43 = vpack.c.bf16 %v4250_v28, %v4250_v28  ;;  %v595_v47 = vpack.c.bf16 %v4254_v33, %v4254_v33 }
  0xf9   :  { %v357_v39 = vpack.c.bf16 %v301_v35, %v301_v35  ;;  %v262_v40 = vpop.f32.mrf.mxu0  ;;  %v303_v42 = vpop.f32.mrf.mxu1  ;;  %v382_v46 = vsel %vm114_vm1, %v356_v34, 0  ;;  %v594_v48 = vpack.c.bf16 %v4252_v32, %v4252_v32  ;;  %v613_v49 = vsel %vm114_vm1, %v592_v45, 0 }
  0xfa   :  { %3708 = vmatprep.subr.msk.bf16.mxu0 %vm114_vm1, %v355_v37  ;;  %v4302_v57 = vpop.permute.xlu1 %546 }
  0xfb   :  { %3711 = vmatprep.subr.msk.bf16.mxu1 %vm114_vm1, %v357_v39  ;;  %402 = vmatpush1.bf16.msra.mxu0 %v376_v41  ;;  %v619_v50 = vsel %vm114_vm1, %v594_v48, 0 }
  0xfc   :  { %455 = vmatpush1.bf16.msra.mxu1 %v382_v46  ;;  %3722 = vmatprep.subr.msk.bf16.mxu0 %vm114_vm1, %v593_v43 }
  0xfd   :  { %3725 = vmatprep.subr.msk.bf16.mxu1 %vm114_vm1, %v595_v47 }
  0xfe   :  { %3709 = vmatmul.mubr.msk.bf16.vlgmr.msra.gmra.mxu0 %vm368_vm3, %v3794_v44  ;;  %v535_v63 = vpop.permute.xlu1 %534 }
  0xff   :  { %3712 = vmatmul.mubr.msk.bf16.vlgmr.msra.gmra.mxu1 %vm368_vm3, %v3794_v44  ;;  %639 = vmatpush1.bf16.msra.mxu0 %v613_v49 }
 0x100   :  { %692 = vmatpush1.bf16.msra.mxu1 %v619_v50  ;;  %429 = vmatprep.mubr.bf16.mxu0 %v6325_v3 }
 0x101   :  { %482 = vmatprep.mubr.bf16.mxu1 %v6325_v3 }
 0x102   :  { %v4308_v7 = vpop.permute.xlu1 %574 }
 0x103   :  { %6511 = vst [vmem:[#allocation12_spill] sm:$0xff] %v4308_v7 }
 0x106   :  { %3710 = vmatmul.mubr.msk.bf16.gmra.mxu0 %vm368_vm3, %v3795_v51  ;;  %v4336_v23 = vpop.permute.xlu1 %566 }
 0x107   :  { %3713 = vmatmul.mubr.msk.bf16.gmra.mxu1 %vm368_vm3, %v3795_v51  ;;  %656 = vmatprep.mubr.bf16.mxu0 %v6325_v3  ;;  %6519 = vst [vmem:[#allocation20_spill] sm:$0xff] %v4336_v23 }
 0x108   :  { %709 = vmatprep.mubr.bf16.mxu1 %v6325_v3 }
 0x10e   :  { %3723 = vmatmul.mubr.msk.bf16.vlgmr.msra.gmra.mxu0 %vm368_vm3, %v3796_v52 }
 0x10f   :  { %3726 = vmatmul.mubr.msk.bf16.vlgmr.msra.gmra.mxu1 %vm368_vm3, %v3796_v52  ;;  %666 = vmatprep.mubr.bf16.mxu0 %v6325_v3 }
 0x110   :  { %719 = vmatprep.mubr.bf16.mxu1 %v6325_v3 }
 0x116   :  { %3724 = vmatmul.mubr.msk.bf16.gmra.mxu0 %vm368_vm3, %v3797_v53 }
 0x117   :  { %3727 = vmatmul.mubr.msk.bf16.gmra.mxu1 %vm368_vm3, %v3797_v53  ;;  %951 = vmatprep.mubr.bf16.mxu0 %v6325_v3 }
 0x118   :  { %992 = vmatprep.mubr.bf16.mxu1 %v6325_v3 }
 0x1be   :  { %v421_v59 = vpop.f32.mrf.mxu0 }
 0x1bf   :  { %v474_v60 = vpop.f32.mrf.mxu1  ;;  %v4316_v13 = vadd.f32 %v500_v55, %v421_v59  ;;  %v4318_v14 = vadd.f32 %v535_v63, %v421_v59 }
 0x1c0   :  { %v423_v61 = vpop.f32.mrf.mxu0  ;;  %v4320_v15 = vadd.f32 %v500_v55, %v474_v60  ;;  %v4326_v18 = vadd.f32 %v535_v63, %v474_v60 }
 0x1c1   :  { %v476_v62 = vpop.f32.mrf.mxu1  ;;  %6512 = vst [vmem:[#allocation13_spill] sm:$0xff] %v4316_v13  ;;  %6513 = vst [vmem:[#allocation14_spill] sm:$0xff] %v4318_v14  ;;  %v4328_v19 = vadd.f32 %v500_v55, %v423_v61  ;;  %v4330_v20 = vadd.f32 %v535_v63, %v423_v61 }
 0x1c2   :  { %v425_v0 = vpop.f32.mrf.mxu0  ;;  %6514 = vst [vmem:[#allocation15_spill] sm:$0xff] %v4320_v15  ;;  %6515 = vst [vmem:[#allocation16_spill] sm:$0xff] %v4326_v18  ;;  %v4332_v21 = vadd.f32 %v500_v55, %v476_v62  ;;  %v4338_v24 = vadd.f32 %v535_v63, %v476_v62 }
 0x1c3   :  { %v478_v1 = vpop.f32.mrf.mxu1  ;;  %6516 = vst [vmem:[#allocation17_spill] sm:$0xff] %v4328_v19  ;;  %6517 = vst [vmem:[#allocation18_spill] sm:$0xff] %v4330_v20  ;;  %v4340_v25 = vadd.f32 %v505_v56, %v425_v0  ;;  %v4342_v26 = vadd.f32 %v539_v11, %v425_v0 }
 0x1c4   :  { %v427_v4 = vpop.f32.mrf.mxu0  ;;  %6518 = vst [vmem:[#allocation19_spill] sm:$0xff] %v4332_v21  ;;  %6520 = vst [vmem:[#allocation21_spill] sm:$0xff] %v4338_v24  ;;  %v4344_v29 = vadd.f32 %v505_v56, %v478_v1  ;;  %v4348_v31 = vadd.f32 %v539_v11, %v478_v1 }
 0x1c5   :  { %v480_v5 = vpop.f32.mrf.mxu1  ;;  %6521 = vst [vmem:[#allocation22_spill] sm:$0xff] %v4340_v25  ;;  %6522 = vst [vmem:[#allocation23_spill] sm:$0xff] %v4342_v26  ;;  %v4350_v34 = vadd.f32 %v505_v56, %v427_v4  ;;  %v4352_v35 = vadd.f32 %v539_v11, %v427_v4 }
 0x1c6   :  { %v431_v6 = vpop.f32.mrf.mxu0  ;;  %6523 = vst [vmem:[#allocation24_spill] sm:$0xff] %v4344_v29  ;;  %6524 = vst [vmem:[#allocation25_spill] sm:$0xff] %v4348_v31  ;;  %v4354_v36 = vadd.f32 %v505_v56, %v480_v5  ;;  %v4356_v38 = vadd.f32 %v539_v11, %v480_v5 }
 0x1c7   :  { %v484_v8 = vpop.f32.mrf.mxu1  ;;  %6525 = vst [vmem:[#allocation26_spill] sm:$0xff] %v4350_v34  ;;  %6526 = vst [vmem:[#allocation27_spill] sm:$0xff] %v4352_v35  ;;  %v4362_v43 = vadd.f32 %v4304_v58, %v431_v6  ;;  %v4406_v5 = vadd.f32 %v4306_v2, %v431_v6 }
 0x1c8   :  { %v4310_v9 = vpop.f32.mrf.mxu0  ;;  %6527 = vst [vmem:[#allocation28_spill] sm:$0xff] %v4354_v36  ;;  %6528 = vst [vmem:[#allocation29_spill] sm:$0xff] %v4356_v38 }
 0x1c9   :  { %v4312_v10 = vpop.f32.mrf.mxu1  ;;  %6529 = vst [vmem:[#allocation30_spill] sm:$0xff] %v4362_v43  ;;  %6535 = vst [vmem:[#allocation36_spill] sm:$0xff] %v4406_v5 }
 0x1ca   :  { %v4314_v12 = vpop.f32.mrf.mxu0 }
 0x1cb   :  { %v4322_v16 = vpop.f32.mrf.mxu1 }
 0x1cc   :  { %v4334_v22 = vpop.f32.mrf.mxu0 }
 0x1cd   :  { %v4346_v30 = vpop.f32.mrf.mxu1 }
 0x1ce   :  { %v658_v37 = vpop.f32.mrf.mxu0 }
 0x1cf   :  { %v730_v39 = vadd.f32 %v658_v37, %v4316_v13  ;;  %v1001_v40 = vadd.f32 %v658_v37, %v4318_v14  ;;  %v1267_v41 = vadd.f32 %v658_v37, %v4336_v23  ;;  %v711_v42 = vpop.f32.mrf.mxu1 }
 0x1d0   :  { %v732_v44 = vadd.f32 %v711_v42, %v4320_v15  ;;  %v1003_v45 = vadd.f32 %v711_v42, %v4326_v18  ;;  %v1269_v46 = vadd.f32 %v711_v42, %v4336_v23  ;;  %v660_v47 = vpop.f32.mrf.mxu0 }
 0x1d1   :  { %v4368_v48 = vadd.f32 %v4324_v17, %v730_v39  ;;  %v4371_v49 = vadd.f32 %v1001_v40, %v4324_v17  ;;  %v4374_v50 = vadd.f32 %v1267_v41, %v4324_v17  ;;  %v731_v51 = vadd.f32 %v660_v47, %v4328_v19  ;;  %v713_v18 = vpop.f32.mrf.mxu1 }
 0x1d2   :  { %v4378_v52 = vadd.f32 %v4324_v17, %v732_v44  ;;  %v4381_v53 = vadd.f32 %v1003_v45, %v4324_v17  ;;  %v4384_v55 = vadd.f32 %v1269_v46, %v4324_v17  ;;  %v1002_v56 = vadd.f32 %v660_v47, %v4330_v20 }
 0x1d3   :  { %6530 = vst [vmem:[#allocation31_spill] sm:$0xff] %v4371_v49  ;;  %6531 = vst [vmem:[#allocation32_spill] sm:$0xff] %v4374_v50  ;;  %v763_v59 = vmul.f32 %v4368_v48, %v4368_v48  ;;  %v1033_v60 = vmul.f32 %v4371_v49, %v4371_v49  ;;  %v1299_v61 = vmul.f32 %v4374_v50, %v4374_v50 }
 0x1d4   :  { %6532 = vst [vmem:[#allocation33_spill] sm:$0xff] %v4378_v52  ;;  %6533 = vst [vmem:[#allocation34_spill] sm:$0xff] %v4381_v53  ;;  %v4394_v62 = vadd.f32 %v4324_v17, %v731_v51  ;;  %v765_v63 = vmul.f32 %v4378_v52, %v4378_v52  ;;  %v1035_v0 = vmul.f32 %v4381_v53, %v4381_v53 }
 0x1d5   :  { %6534 = vst [vmem:[#allocation35_spill] sm:$0xff] %v4384_v55  ;;  %v1301_v1 = vmul.f32 %v4384_v55, %v4384_v55  ;;  %v4403_v4 = vadd.f32 %v1002_v56, %v4324_v17  ;;  %v779_v11 = vmul.f32 %v763_v59, %v4368_v48  ;;  %v1049_v37 = vmul.f32 %v1033_v60, %v4371_v49 }
 0x1d6   :  { %v1315_v39 = vmul.f32 %v1299_v61, %v4374_v50  ;;  %v4412_v40 = vadd.f32 %v4304_v58, %v484_v8  ;;  %v781_v41 = vmul.f32 %v765_v63, %v4378_v52  ;;  %v1051_v42 = vmul.f32 %v1035_v0, %v4381_v53 }
 0x1d7   :  { %v1317_v44 = vmul.f32 %v1301_v1, %v4384_v55  ;;  %v4418_v45 = vadd.f32 %v4306_v2, %v484_v8  ;;  %v795_v6 = vmul.f32 0.044715, %v779_v11  ;;  %v1065_v46 = vmul.f32 0.044715, %v1049_v37 }
 0x1d8   :  { %6536 = vst [vmem:[#allocation37_spill] sm:$0xff] %v4412_v40  ;;  %v764_v51 = vmul.f32 %v4394_v62, %v4394_v62  ;;  %v4424_v56 = vadd.f32 %v4304_v58, %v4310_v9  ;;  %v4428_v59 = vadd.f32 %v4306_v2, %v4310_v9  ;;  %v1331_v60 = vmul.f32 0.044715, %v1315_v39 }
 0x1d9   :  { %6537 = vst [vmem:[#allocation38_spill] sm:$0xff] %v4418_v45  ;;  %v1034_v61 = vmul.f32 %v4403_v4, %v4403_v4  ;;  %v4434_v8 = vadd.f32 %v4304_v58, %v4312_v10  ;;  %v4438_v63 = vadd.f32 %v4306_v2, %v4312_v10  ;;  %v797_v0 = vmul.f32 0.044715, %v781_v41 }
 0x1da   :  { %6538 = vst [vmem:[#allocation39_spill] sm:$0xff] %v4424_v56  ;;  %6539 = vst [vmem:[#allocation40_spill] sm:$0xff] %v4428_v59  ;;  %v1067_v1 = vmul.f32 0.044715, %v1051_v42  ;;  %v4442_v11 = vadd.f32 %v4300_v54, %v4314_v12  ;;  %v4446_v9 = vadd.f32 %v4302_v57, %v4314_v12  ;;  %v811_v37 = vadd.f32 %v795_v6, %v4368_v48  ;;  %v662_v42 = vpop.f32.mrf.mxu0 }
 0x1db   :  { %6540 = vst [vmem:[#allocation41_spill] sm:$0xff] %v4434_v8  ;;  %6541 = vst [vmem:[#allocation42_spill] sm:$0xff] %v4438_v63  ;;  %v1333_v39 = vmul.f32 0.044715, %v1317_v44  ;;  %v4451_v58 = vadd.f32 %v4300_v54, %v4322_v16  ;;  %v4455_v2 = vadd.f32 %v4302_v57, %v4322_v16  ;;  %v1081_v10 = vadd.f32 %v1065_v46, %v4371_v49 }
 0x1dc   :  { %6542 = vst [vmem:[#allocation43_spill] sm:$0xff] %v4442_v11  ;;  %6543 = vst [vmem:[#allocation44_spill] sm:$0xff] %v4446_v9  ;;  %v780_v41 = vmul.f32 %v764_v51, %v4394_v62  ;;  %v4461_v12 = vadd.f32 %v4300_v54, %v4334_v22  ;;  %v4465_v44 = vadd.f32 %v4302_v57, %v4334_v22  ;;  %v827_v20 = vmul.f32 0.7978846, %v811_v37 }
 0x1dd   :  { %6544 = vst [vmem:[#allocation45_spill] sm:$0xff] %v4451_v58  ;;  %6545 = vst [vmem:[#allocation46_spill] sm:$0xff] %v4455_v2  ;;  %v1347_v6 = vadd.f32 %v1331_v60, %v4374_v50  ;;  %v1050_v3 = vmul.f32 %v1034_v61, %v4403_v4  ;;  %v4471_v16 = vadd.f32 %v4300_v54, %v4346_v30  ;;  %v1097_v14 = vmul.f32 0.7978846, %v1081_v10  ;;  %v715_v10 = vpop.f32.mrf.mxu1 }
 0x1de   :  { %6546 = vst [vmem:[#allocation47_spill] sm:$0xff] %v4461_v12  ;;  %6547 = vst [vmem:[#allocation48_spill] sm:$0xff] %v4465_v44  ;;  %v813_v46 = vadd.f32 %v797_v0, %v4378_v52  ;;  %v1083_v51 = vadd.f32 %v1067_v1, %v4381_v53  ;;  %v1268_v15 = vadd.f32 %v660_v47, %v4336_v23  ;;  %v4483_v54 = vmul.f32 0.044715, %v780_v41  ;;  %v4488_v47 = vpop.permute.xlu1 %570 }
 0x1df   :  { %6548 = vst [vmem:[#allocation49_spill] sm:$0xff] %v4471_v16  ;;  %v1349_v19 = vadd.f32 %v1333_v39, %v4384_v55  ;;  %v734_v22 = vadd.f32 %v662_v42, %v4340_v25  ;;  %v1005_v60 = vadd.f32 %v662_v42, %v4342_v26  ;;  %v4481_v61 = vadd.f32 %v4302_v57, %v4346_v30 }
 0x1e0   :  { %v733_v0 = vadd.f32 %v713_v18, %v4332_v21  ;;  %v1363_v13 = vmul.f32 0.7978846, %v1347_v6  ;;  %v4486_v1 = vmul.f32 0.044715, %v1050_v3  ;;  %6550 = vst [vmem:[#allocation51_spill] sm:$0xff] %v4488_v47  ;;  %v4497_v57 = vadd.f32 %v1268_v15, %v4324_v17 }
 0x1e1   :  { %6549 = vst [vmem:[#allocation50_spill] sm:$0xff] %v4481_v61  ;;  %v4491_v37 = vadd.f32 %v4324_v17, %v734_v22  ;;  %v4494_v39 = vadd.f32 %v1005_v60, %v4324_v17  ;;  %v829_v26 = vmul.f32 0.7978846, %v813_v46  ;;  %v1099_v25 = vmul.f32 0.7978846, %v1083_v51  ;;  %v664_v60 = vpop.f32.mrf.mxu0 }
 0x1e2   :  { %6552 = vst [vmem:[#allocation53_spill] sm:$0xff] %v4497_v57  ;;  %v1004_v30 = vadd.f32 %v713_v18, %v4338_v24  ;;  %3798 = vtanh.f32 %v827_v20  ;;  %v1365_v41 = vmul.f32 0.7978846, %v1349_v19  ;;  %v4505_v22 = vadd.f32 %v4324_v17, %v733_v0 }
 0x1e3   :  { %6551 = vst [vmem:[#allocation52_spill] sm:$0xff] %v4494_v39  ;;  %v767_v3 = vmul.f32 %v4491_v37, %v4491_v37  ;;  %v1037_v6 = vmul.f32 %v4494_v39, %v4494_v39  ;;  %3800 = vtanh.f32 %v1097_v14  ;;  %v1270_v46 = vadd.f32 %v713_v18, %v4336_v23 }
 0x1e4   :  { %v1271_v15 = vadd.f32 %v662_v42, %v4488_v47  ;;  %3802 = vtanh.f32 %v1363_v13  ;;  %v736_v19 = vadd.f32 %v715_v10, %v4344_v29  ;;  %v1300_v24 = vmul.f32 %v4497_v57, %v4497_v57 }
 0x1e5   :  { %v783_v51 = vmul.f32 %v767_v3, %v4491_v37  ;;  %v1053_v20 = vmul.f32 %v1037_v6, %v4494_v39  ;;  %v4515_v14 = vadd.f32 %v1004_v30, %v4324_v17  ;;  %v1007_v18 = vadd.f32 %v715_v10, %v4348_v31 }
 0x1e6   :  { %v4518_v0 = vadd.f32 %v1271_v15, %v4324_v17  ;;  %v4522_v3 = vadd.f32 %v4324_v17, %v736_v19  ;;  %v1273_v6 = vadd.f32 %v715_v10, %v4488_v47  ;;  %v735_v30 = vadd.f32 %v664_v60, %v4350_v34 }
 0x1e7   :  { %6553 = vst [vmem:[#allocation54_spill] sm:$0xff] %v4515_v14  ;;  %v799_v42 = vmul.f32 0.044715, %v783_v51  ;;  %v1069_v13 = vmul.f32 0.044715, %v1053_v20  ;;  %v4528_v21 = vadd.f32 %v1007_v18, %v4324_v17  ;;  %v1006_v15 = vadd.f32 %v664_v60, %v4352_v35 }
 0x1e8   :  { %6554 = vst [vmem:[#allocation55_spill] sm:$0xff] %v4518_v0  ;;  %v1303_v29 = vmul.f32 %v4518_v0, %v4518_v0  ;;  %v766_v31 = vmul.f32 %v4505_v22, %v4505_v22  ;;  %v4535_v51 = vadd.f32 %v1270_v46, %v4324_v17  ;;  %v769_v20 = vmul.f32 %v4522_v3, %v4522_v3 }
 0x1e9   :  { %6555 = vst [vmem:[#allocation56_spill] sm:$0xff] %v4528_v21  ;;  %v4540_v10 = vadd.f32 %v1273_v6, %v4324_v17  ;;  %v815_v19 = vadd.f32 %v799_v42, %v4491_v37  ;;  %v1039_v34 = vmul.f32 %v4528_v21, %v4528_v21  ;;  %v4547_v35 = vadd.f32 %v4324_v17, %v735_v30 }
 0x1ea   :  { %6556 = vst [vmem:[#allocation57_spill] sm:$0xff] %v4535_v51  ;;  %v1319_v18 = vmul.f32 %v1303_v29, %v4518_v0  ;;  %v1036_v46 = vmul.f32 %v4515_v14, %v4515_v14  ;;  %v1085_v23 = vadd.f32 %v1069_v13, %v4494_v39  ;;  %v785_v33 = vmul.f32 %v769_v20, %v4522_v3  ;;  %v353_v29 = vld [vmem:[%s6322_s10] sm:$0xf] }
 0x1eb   :  { %6557 = vst [vmem:[#allocation58_spill] sm:$0xff] %v4540_v10  ;;  %v1305_v6 = vmul.f32 %v4540_v10, %v4540_v10  ;;  %v1316_v42 = vmul.f32 %v1300_v24, %v4497_v57  ;;  %v1055_v30 = vmul.f32 %v1039_v34, %v4528_v21  ;;  %v4561_v28 = vadd.f32 %v1006_v15, %v4324_v17 }
 0x1ec   :  { %v1335_v32 = vmul.f32 0.044715, %v1319_v18  ;;  %1561 = vperm.xlu0 %3791, %v353_v29   ;;  %v801_v27 = vmul.f32 0.044715, %v785_v33  ;;  %v768_v20 = vmul.f32 %v4547_v35, %v4547_v35  ;;  %v1272_v55 = vadd.f32 %v664_v60, %v4488_v47  ;;  %v717_v29 = vpop.f32.mrf.mxu1 }
 0x1ed   :  { %v1321_v13 = vmul.f32 %v1305_v6, %v4540_v10  ;;  %3804 = vtanh.f32 %v829_v26  ;;  %v1302_v50 = vmul.f32 %v4535_v51, %v4535_v51  ;;  %v831_v24 = vmul.f32 0.7978846, %v815_v19 }
 0x1ee   :  { %v1351_v18 = vadd.f32 %v1335_v32, %v4518_v0  ;;  %3806 = vtanh.f32 %v1099_v25  ;;  %v782_v34 = vmul.f32 %v766_v31, %v4505_v22  ;;  %v1052_v15 = vmul.f32 %v1036_v46, %v4515_v14 }
 0x1ef   :  { %v1101_v33 = vmul.f32 0.7978846, %v1085_v23  ;;  %v4572_v6 = vpop.eup %3798  ;;  %3808 = vtanh.f32 %v1365_v41  ;;  %v1071_v53 = vmul.f32 0.044715, %v1055_v30  ;;  %v1337_v39 = vmul.f32 0.044715, %v1321_v13  ;;  %v668_v23 = vpop.f32.mrf.mxu0 }
 0x1f0   :  { %v1038_v26 = vmul.f32 %v4561_v28, %v4561_v28  ;;  %v4576_v60 = vpop.eup %3800  ;;  %v4578_v19 = vmul.f32 0.044715, %v1316_v42  ;;  %v817_v32 = vadd.f32 %v801_v27, %v4522_v3  ;;  %v784_v25 = vmul.f32 %v768_v20, %v4547_v35 }
 0x1f1   :  { %6558 = vst [vmem:[#allocation59_spill] sm:$0xff] %v4576_v60  ;;  %v4583_v31 = vadd.f32 %v1272_v55, %v4324_v17  ;;  %v4585_v46 = vpop.eup %3802  ;;  %v4588_v41 = vmul.f32 %v1302_v50, %v4535_v51  ;;  %3810 = vtanh.f32 %v831_v24  ;;  %v1367_v30 = vmul.f32 0.7978846, %v1351_v18  ;;  %v721_v24 = vpop.f32.mrf.mxu1 }
 0x1f2   :  { %6559 = vst [vmem:[#allocation60_spill] sm:$0xff] %v4578_v19  ;;  %6561 = vst [vmem:[#allocation62_spill] sm:$0xff] %v4585_v46  ;;  %v737_v13 = vadd.f32 %v717_v29, %v4354_v36  ;;  %v4591_v0 = vmul.f32 0.044715, %v782_v34  ;;  %v4593_v42 = vmul.f32 0.044715, %v1052_v15  ;;  %3812 = vtanh.f32 %v1101_v33 }
 0x1f3   :  { %6560 = vst [vmem:[#allocation61_spill] sm:$0xff] %v4583_v31  ;;  %6562 = vst [vmem:[#allocation63_spill] sm:$0xff] %v4588_v41  ;;  %v1008_v27 = vadd.f32 %v717_v29, %v4356_v38  ;;  %v1087_v55 = vadd.f32 %v1071_v53, %v4528_v21  ;;  %v1353_v20 = vadd.f32 %v1337_v39, %v4540_v10  ;;  %v833_v18 = vmul.f32 0.7978846, %v817_v32 }
 0x1f4   :  { %6563 = vst [vmem:[#allocation64_spill] sm:$0xff] %v4593_v42  ;;  %v4599_v46 = vmul.f32 %v1038_v26, %v4561_v28  ;;  %v738_v50 = vadd.f32 %v668_v23, %v4362_v43  ;;  %v4602_v51 = vmul.f32 0.044715, %v784_v25  ;;  %v1304_v34 = vmul.f32 %v4583_v31, %v4583_v31 }
 0x1f5   :  { %v1009_v15 = vadd.f32 %v668_v23, %v4406_v5  ;;  %3814 = vtanh.f32 %v1367_v30  ;;  %v4608_v33 = vadd.f32 %v4324_v17, %v737_v13  ;;  %v1275_v39 = vadd.f32 %v668_v23, %v4308_v7 }
 0x1f6   :  { %v4611_v53 = vadd.f32 %v4324_v17, %v738_v50  ;;  %v4615_v26 = vadd.f32 %v1008_v27, %v4324_v17  ;;  %v740_v25 = vadd.f32 %v721_v24, %v4412_v40  ;;  %v1011_v38 = vadd.f32 %v721_v24, %v4418_v45  ;;  %v670_v45 = vpop.f32.mrf.mxu0 }
 0x1f7   :  { %v4618_v32 = vadd.f32 %v1009_v15, %v4324_v17  ;;  %v1103_v5 = vmul.f32 0.7978846, %v1087_v55  ;;  %v1369_v30 = vmul.f32 0.7978846, %v1353_v20  ;;  %v4625_v50 = vadd.f32 %v1275_v39, %v4324_v17 }
 0x1f8   :  { %6564 = vst [vmem:[#allocation65_spill] sm:$0xff] %v4615_v26  ;;  %v771_v13 = vmul.f32 %v4611_v53, %v4611_v53  ;;  %v1274_v23 = vadd.f32 %v717_v29, %v4488_v47  ;;  %v4631_v15 = vadd.f32 %v4324_v17, %v740_v25  ;;  %v4634_v40 = vadd.f32 %v1011_v38, %v4324_v17 }
 0x1f9   :  { %6565 = vst [vmem:[#allocation66_spill] sm:$0xff] %v4618_v32  ;;  %6566 = vst [vmem:[#allocation67_spill] sm:$0xff] %v4625_v50  ;;  %v1041_v27 = vmul.f32 %v4618_v32, %v4618_v32  ;;  %v770_v55 = vmul.f32 %v4608_v33, %v4608_v33  ;;  %v1307_v39 = vmul.f32 %v4625_v50, %v4625_v50  ;;  %3816 = vtanh.f32 %v833_v18 }
 0x1fa   :  { %6567 = vst [vmem:[#allocation68_spill] sm:$0xff] %v4634_v40  ;;  %v787_v20 = vmul.f32 %v771_v13, %v4611_v53  ;;  %v1277_v29 = vadd.f32 %v721_v24, %v4308_v7  ;;  %v4642_v43 = vpop.eup %3804  ;;  %v1040_v25 = vmul.f32 %v4615_v26, %v4615_v26  ;;  %v773_v38 = vmul.f32 %v4631_v15, %v4631_v15 }
 0x1fb   :  { %v1057_v36 = vmul.f32 %v1041_v27, %v4618_v32  ;;  %v1043_v47 = vmul.f32 %v4634_v40, %v4634_v40  ;;  %v4651_v10 = vpop.eup %3806  ;;  %v1323_v21 = vmul.f32 %v1307_v39, %v4625_v50  ;;  %v739_v49 = vadd.f32 %v670_v45, %v4424_v56 }
 0x1fc   :  { %6568 = vst [vmem:[#allocation69_spill] sm:$0xff] %v4651_v10  ;;  %v803_v13 = vmul.f32 0.044715, %v787_v20  ;;  %v4655_v24 = vadd.f32 %v1277_v29, %v4324_v17  ;;  %v4658_v41 = vpop.eup %3808  ;;  %v789_v27 = vmul.f32 %v773_v38, %v4631_v15  ;;  %v1010_v60 = vadd.f32 %v670_v45, %v4428_v59 }
 0x1fd   :  { %6570 = vst [vmem:[#allocation71_spill] sm:$0xff] %v4658_v41  ;;  %v1073_v19 = vmul.f32 0.044715, %v1057_v36  ;;  %v1059_v57 = vmul.f32 %v1043_v47, %v4634_v40  ;;  %v1339_v10 = vmul.f32 0.044715, %v1323_v21  ;;  %v4667_v39 = vadd.f32 %v4324_v17, %v739_v49 }
 0x1fe   :  { %6569 = vst [vmem:[#allocation70_spill] sm:$0xff] %v4655_v24  ;;  %v819_v52 = vadd.f32 %v803_v13, %v4611_v53  ;;  %v1309_v20 = vmul.f32 %v4655_v24, %v4655_v24  ;;  %v4669_v29 = vpop.eup %3810  ;;  %v805_v36 = vmul.f32 0.044715, %v789_v27  ;;  %v4673_v38 = vadd.f32 %v1010_v60, %v4324_v17 }
 0x1ff   :  { %v1089_v56 = vadd.f32 %v1073_v19, %v4618_v32  ;;  %v1075_v41 = vmul.f32 0.044715, %v1059_v57  ;;  %v4675_v47 = vpop.eup %3812  ;;  %v1320_v13 = vmul.f32 %v1304_v34, %v4583_v31  ;;  %v1355_v21 = vadd.f32 %v1339_v10, %v4625_v50 }
 0x200   :  { %6571 = vst [vmem:[#allocation72_spill] sm:$0xff] %v4675_v47  ;;  %v1325_v59 = vmul.f32 %v1309_v20, %v4655_v24  ;;  %v772_v49 = vmul.f32 %v4667_v39, %v4667_v39  ;;  %v786_v42 = vmul.f32 %v770_v55, %v4608_v33  ;;  %v4684_v19 = vadd.f32 %v1274_v23, %v4324_v17  ;;  %v723_v23 = vpop.f32.mrf.mxu1  ;;  %v672_v20 = vpop.f32.mrf.mxu0 }
 0x201   :  { %v835_v57 = vmul.f32 0.7978846, %v819_v52  ;;  %v1056_v60 = vmul.f32 %v1040_v25, %v4615_v26  ;;  %v1105_v27 = vmul.f32 0.7978846, %v1089_v56  ;;  %v821_v47 = vadd.f32 %v805_v36, %v4631_v15 }
 0x202   :  { %6572 = vst [vmem:[#allocation73_spill] sm:$0xff] %v4684_v19  ;;  %v1341_v34 = vmul.f32 0.044715, %v1325_v59  ;;  %v4688_v31 = vpop.eup %3814  ;;  %3818 = vtanh.f32 %v1103_v5  ;;  %v4691_v10 = vmul.f32 0.044715, %v4599_v46  ;;  %v1091_v18 = vadd.f32 %v1075_v41, %v4634_v40  ;;  %v4706_v41 = vpop.permute.xlu0 %578 }
 0x203   :  { %6573 = vst [vmem:[#allocation74_spill] sm:$0xff] %v4688_v31  ;;  %v1042_v55 = vmul.f32 %v4673_v38, %v4673_v38  ;;  %3820 = vtanh.f32 %v1369_v30  ;;  %v4696_v52 = vmul.f32 0.044715, %v1320_v13  ;;  %v1371_v25 = vmul.f32 0.7978846, %v1355_v21  ;;  %6577 = vst [vmem:[#allocation78_spill] sm:$0xff] %v4706_v41  ;;  %v725_v31 = vpop.f32.mrf.mxu1 }
 0x204   :  { %6574 = vst [vmem:[#allocation75_spill] sm:$0xff] %v4691_v10  ;;  %v788_v56 = vmul.f32 %v772_v49, %v4667_v39  ;;  %v4699_v59 = vmul.f32 0.044715, %v786_v42  ;;  %v4703_v5 = vmul.f32 %v4684_v19, %v4684_v19  ;;  %3822 = vtanh.f32 %v835_v57 }
 0x205   :  { %6575 = vst [vmem:[#allocation76_spill] sm:$0xff] %v4696_v52  ;;  %v1357_v46 = vadd.f32 %v1341_v34, %v4655_v24  ;;  %v4708_v36 = vmul.f32 0.044715, %v1056_v60  ;;  %3824 = vtanh.f32 %v1105_v27  ;;  %v837_v30 = vmul.f32 0.7978846, %v821_v47 }
 0x206   :  { %6576 = vst [vmem:[#allocation77_spill] sm:$0xff] %v4703_v5  ;;  %v1276_v13 = vadd.f32 %v670_v45, %v4308_v7  ;;  %v1107_v21 = vmul.f32 0.7978846, %v1091_v18  ;;  %v1058_v49 = vmul.f32 %v1042_v55, %v4673_v38  ;;  %v742_v42 = vadd.f32 %v672_v20, %v4442_v11 }
 0x207   :  { %6578 = vst [vmem:[#allocation79_spill] sm:$0xff] %v4708_v36  ;;  %v1013_v50 = vadd.f32 %v672_v20, %v4446_v9  ;;  %3826 = vtanh.f32 %v1371_v25  ;;  %v4714_v57 = vmul.f32 0.044715, %v788_v56  ;;  %v741_v34 = vadd.f32 %v723_v23, %v4434_v8  ;;  %v727_v36 = vpop.f32.mrf.mxu1 }
 0x208   :  { %v1279_v60 = vadd.f32 %v672_v20, %v4706_v41  ;;  %v1373_v24 = vmul.f32 0.7978846, %v1357_v46  ;;  %v1012_v47 = vadd.f32 %v723_v23, %v4438_v63  ;;  %v4720_v45 = vadd.f32 %v4324_v17, %v742_v42  ;;  %v4752_v63 = vpop.eup %3816 }
 0x209   :  { %v4723_v27 = vadd.f32 %v1013_v50, %v4324_v17  ;;  %3828 = vtanh.f32 %v837_v30  ;;  %v4726_v18 = vadd.f32 %v1276_v13, %v4324_v17  ;;  %v744_v25 = vadd.f32 %v725_v31, %v4451_v58 }
 0x20a   :  { %v4729_v55 = vadd.f32 %v1279_v60, %v4324_v17  ;;  %3830 = vtanh.f32 %v1107_v21  ;;  %v4732_v56 = vmul.f32 0.044715, %v1058_v49  ;;  %v775_v20 = vmul.f32 %v4720_v45, %v4720_v45  ;;  %v674_v21 = vpop.f32.mrf.mxu0 }
 0x20b   :  { %6579 = vst [vmem:[#allocation80_spill] sm:$0xff] %v4723_v27  ;;  %6580 = vst [vmem:[#allocation81_spill] sm:$0xff] %v4726_v18  ;;  %v1045_v46 = vmul.f32 %v4723_v27, %v4723_v27  ;;  %v4739_v50 = vadd.f32 %v4324_v17, %v741_v34  ;;  %v1278_v30 = vadd.f32 %v723_v23, %v4308_v7  ;;  %3832 = vtanh.f32 %v1373_v24 }
 0x20c   :  { %6581 = vst [vmem:[#allocation82_spill] sm:$0xff] %v4729_v55  ;;  %v1311_v13 = vmul.f32 %v4729_v55, %v4729_v55  ;;  %v4745_v42 = vadd.f32 %v4324_v17, %v744_v25  ;;  %v4748_v49 = vadd.f32 %v1012_v47, %v4324_v17  ;;  %v791_v60 = vmul.f32 %v775_v20, %v4720_v45 }
 0x20d   :  { %v1061_v58 = vmul.f32 %v1045_v46, %v4723_v27  ;;  %v1308_v23 = vmul.f32 %v4726_v18, %v4726_v18  ;;  %v1015_v8 = vadd.f32 %v725_v31, %v4455_v2  ;;  %v1281_v47 = vadd.f32 %v725_v31, %v4706_v41 }
 0x20e   :  { %v1327_v34 = vmul.f32 %v1311_v13, %v4729_v55  ;;  %v777_v25 = vmul.f32 %v4745_v42, %v4745_v42  ;;  %v807_v24 = vmul.f32 0.044715, %v791_v60  ;;  %v743_v20 = vadd.f32 %v674_v21, %v4461_v12 }
 0x20f   :  { %v1077_v9 = vmul.f32 0.044715, %v1061_v58  ;;  %v4762_v11 = vpop.eup %3818  ;;  %v774_v46 = vmul.f32 %v4739_v50, %v4739_v50  ;;  %v4768_v13 = vadd.f32 %v1015_v8, %v4324_v17  ;;  %v4774_v58 = vadd.f32 %v1281_v47, %v4324_v17 }
 0x210   :  { %6582 = vst [vmem:[#allocation83_spill] sm:$0xff] %v4762_v11  ;;  %v1343_v7 = vmul.f32 0.044715, %v1327_v34  ;;  %v793_v52 = vmul.f32 %v777_v25, %v4745_v42  ;;  %v4770_v5 = vpop.eup %3820  ;;  %v823_v60 = vadd.f32 %v807_v24, %v4720_v45  ;;  %v4777_v31 = vadd.f32 %v4324_v17, %v743_v20 }
 0x211   :  { %6583 = vst [vmem:[#allocation84_spill] sm:$0xff] %v4770_v5  ;;  %v1014_v12 = vadd.f32 %v674_v21, %v4465_v44  ;;  %v4780_v2 = vpop.eup %3822  ;;  %v1044_v34 = vmul.f32 %v4748_v49, %v4748_v49  ;;  %v4785_v8 = vadd.f32 %v1278_v30, %v4324_v17  ;;  %v1047_v24 = vmul.f32 %v4768_v13, %v4768_v13 }
 0x212   :  { %v809_v25 = vmul.f32 0.044715, %v793_v52  ;;  %v4789_v5 = vpop.eup %3824  ;;  %v839_v47 = vmul.f32 0.7978846, %v823_v60  ;;  %v1093_v20 = vadd.f32 %v1077_v9, %v4723_v27  ;;  %v1313_v44 = vmul.f32 %v4774_v58, %v4774_v58 }
 0x213   :  { %v776_v11 = vmul.f32 %v4777_v31, %v4777_v31  ;;  %v790_v19 = vmul.f32 %v774_v46, %v4739_v50  ;;  %v1359_v30 = vadd.f32 %v1343_v7, %v4729_v55  ;;  %v1063_v40 = vmul.f32 %v1047_v24, %v4768_v13 }
 0x214   :  { %v825_v52 = vadd.f32 %v809_v25, %v4745_v42  ;;  %v4800_v32 = vpop.eup %3826  ;;  %3834 = vtanh.f32 %v839_v47  ;;  %v1329_v60 = vmul.f32 %v1313_v44, %v4774_v58  ;;  %v4805_v27 = vadd.f32 %v1014_v12, %v4324_v17 }
 0x215   :  { %6584 = vst [vmem:[#allocation85_spill] sm:$0xff] %v4800_v32  ;;  %v792_v9 = vmul.f32 %v776_v11, %v4777_v31  ;;  %v4808_v26 = vmul.f32 %v1308_v23, %v4726_v18  ;;  %v1079_v7 = vmul.f32 0.044715, %v1063_v40  ;;  %v1280_v25 = vadd.f32 %v674_v21, %v4706_v41 }
 0x216   :  { %v841_v46 = vmul.f32 0.7978846, %v825_v52  ;;  %v3829_v55 = vpop.eup %3828  ;;  %v1310_v24 = vmul.f32 %v4785_v8, %v4785_v8  ;;  %v1109_v47 = vmul.f32 0.7978846, %v1093_v20  ;;  %v1345_v32 = vmul.f32 0.044715, %v1329_v60 }
 0x217   :  { %v808_v44 = vmul.f32 0.044715, %v792_v9  ;;  %v4813_v14 = vpop.eup %3830  ;;  %v806_v11 = vmul.f32 0.044715, %v790_v19  ;;  %v1095_v12 = vadd.f32 %v1079_v7, %v4768_v13  ;;  %v745_v23 = vadd.f32 %v727_v36, %v4471_v16 }
 0x218   :  { %3836 = vtanh.f32 %v841_v46  ;;  %v1375_v18 = vmul.f32 0.7978846, %v1359_v30  ;;  %v1361_v40 = vadd.f32 %v1345_v32, %v4774_v58  ;;  %v1046_v21 = vmul.f32 %v4805_v27, %v4805_v27  ;;  %v4821_v10 = vpop.eup %3832 }
 0x219   :  { %v1016_v52 = vadd.f32 %v727_v36, %v4481_v61  ;;  %v4824_v20 = vadd.f32 %v1280_v25, %v4324_v17  ;;  %v4827_v19 = vadd.f32 %v4324_v17, %v745_v23  ;;  %v820_v60 = vadd.f32 %v4714_v57, %v4667_v39 }
 0x21a   :  { %v824_v30 = vadd.f32 %v808_v44, %v4777_v31  ;;  %v1060_v32 = vmul.f32 %v1044_v34, %v4748_v49  ;;  %3838 = vtanh.f32 %v1109_v47  ;;  %v1282_v46 = vadd.f32 %v727_v36, %v4706_v41 }
 0x21b   :  { %v4834_v9 = vadd.f32 %v1016_v52, %v4324_v17  ;;  %v1111_v7 = vmul.f32 0.7978846, %v1095_v12  ;;  %v778_v25 = vmul.f32 %v4827_v19, %v4827_v19  ;;  %v836_v61 = vmul.f32 0.7978846, %v820_v60 }
 0x21c   :  { %v840_v23 = vmul.f32 0.7978846, %v824_v30  ;;  %v1326_v16 = vmul.f32 %v1310_v24, %v4785_v8  ;;  %3840 = vtanh.f32 %v1375_v18  ;;  %v1377_v57 = vmul.f32 0.7978846, %v1361_v40 }
 0x21d   :  { %v1062_v44 = vmul.f32 %v1046_v21, %v4805_v27  ;;  %v1312_v34 = vmul.f32 %v4824_v20, %v4824_v20  ;;  %v794_v47 = vmul.f32 %v778_v25, %v4827_v19  ;;  %3842 = vtanh.f32 %v836_v61 }
 0x21e   :  { %v822_v36 = vadd.f32 %v806_v11, %v4739_v50  ;;  %v1076_v12 = vmul.f32 0.044715, %v1060_v32  ;;  %v1048_v52 = vmul.f32 %v4834_v9, %v4834_v9  ;;  %v4848_v60 = vadd.f32 %v1282_v46, %v4324_v17 }
 0x21f   :  { %3844 = vtanh.f32 %v840_v23  ;;  %v810_v18 = vmul.f32 0.044715, %v794_v47  ;;  %v812_v40 = vadd.f32 %v4483_v54, %v4394_v62  ;;  %v1078_v21 = vmul.f32 0.044715, %v1062_v44 }
 0x220   :  { %3846 = vtanh.f32 %v1111_v7  ;;  %v838_v24 = vmul.f32 0.7978846, %v822_v36  ;;  %v867_v61 = vadd.f32 1.0, %v4780_v2  ;;  %v816_v11 = vadd.f32 %v4602_v51, %v4547_v35 }
 0x221   :  { %3848 = vtanh.f32 %v1377_v57  ;;  %v3835_v30 = vpop.eup %3834  ;;  %v1328_v32 = vmul.f32 %v1312_v34, %v4824_v20  ;;  %v826_v17 = vadd.f32 %v810_v18, %v4827_v19  ;;  %v828_v46 = vmul.f32 0.7978846, %v812_v40 }
 0x222   :  { %3850 = vtanh.f32 %v838_v24  ;;  %v1064_v7 = vmul.f32 %v1048_v52, %v4834_v9  ;;  %v1314_v25 = vmul.f32 %v4848_v60, %v4848_v60  ;;  %v832_v54 = vmul.f32 0.7978846, %v816_v11 }
 0x223   :  { %v814_v23 = vadd.f32 %v4591_v0, %v4505_v22  ;;  %v842_v2 = vmul.f32 0.7978846, %v826_v17  ;;  %v871_v57 = vadd.f32 1.0, %v3835_v30  ;;  %3852 = vtanh.f32 %v828_v46 }
 0x224   :  { %v818_v51 = vadd.f32 %v4699_v59, %v4608_v33  ;;  %v883_v34 = vmul.f32 0.5, %v867_v61  ;;  %v869_v47 = vadd.f32 1.0, %v3829_v55  ;;  %3854 = vtanh.f32 %v832_v54 }
 0x225   :  { %v3837_v44 = vpop.eup %3836  ;;  %v830_v36 = vmul.f32 0.7978846, %v814_v23  ;;  %3856 = vtanh.f32 %v842_v2  ;;  %v863_v24 = vadd.f32 1.0, %v4669_v29  ;;  %v4866_v40 = vmul.f32 0.044715, %v4808_v26 }
 0x226   :  { %v873_v52 = vadd.f32 1.0, %v3837_v44  ;;  %v834_v18 = vmul.f32 0.7978846, %v818_v51  ;;  %v1080_v0 = vmul.f32 0.044715, %v1064_v7  ;;  %v859_v11 = vadd.f32 1.0, %v4572_v6 }
 0x227   :  { %3858 = vtanh.f32 %v830_v36  ;;  %v3839_v30 = vpop.eup %3838  ;;  %v4869_v17 = vmul.f32 0.044715, %v1326_v16  ;;  %v4871_v59 = vmul.f32 0.044715, %v1328_v32  ;;  %v887_v55 = vmul.f32 0.5, %v871_v57 }
 0x228   :  { %3860 = vtanh.f32 %v834_v18  ;;  %v4874_v61 = vmul.f32 %v1314_v25, %v4848_v60  ;;  %v4877_v46 = vmul.f32 %v883_v34, %v4611_v53  ;;  %v885_v29 = vmul.f32 0.5, %v869_v47 }
 0x229   :  { %v1090_v26 = vadd.f32 %v4732_v56, %v4673_v38  ;;  %v4881_v7 = vpop.eup %3840  ;;  %v889_v6 = vmul.f32 0.5, %v873_v52  ;;  %v879_v54 = vmul.f32 0.5, %v863_v24  ;;  %v1094_v16 = vadd.f32 %v1078_v21, %v4805_v27 }
 0x22a   :  { %v1092_v32 = vadd.f32 %v1076_v12, %v4748_v49  ;;  %v3843_v23 = vpop.eup %3842  ;;  %v875_v2 = vmul.f32 0.5, %v859_v11  ;;  %v865_v25 = vadd.f32 1.0, %v4752_v63  ;;  %v1096_v53 = vadd.f32 %v1080_v0, %v4834_v9 }
 0x22b   :  { %v1106_v57 = vmul.f32 0.7978846, %v1090_v26  ;;  %v868_v44 = vadd.f32 1.0, %v3843_v23  ;;  %v903_v34 = vmul.f32 %v887_v55, %v4720_v45  ;;  %v861_v56 = vadd.f32 1.0, %v4642_v43 }
 0x22c   :  { %v3845_v51 = vpop.eup %3844  ;;  %v1110_v47 = vmul.f32 0.7978846, %v1094_v16  ;;  %v1108_v21 = vmul.f32 0.7978846, %v1092_v32  ;;  %v1112_v18 = vmul.f32 0.7978846, %v1096_v53  ;;  %v4892_v63 = vmul.f32 %v889_v6, %v4745_v42 }
 0x22d   :  { %v3847_v36 = vpop.eup %3846  ;;  %v872_v52 = vadd.f32 1.0, %v3845_v51  ;;  %3862 = vtanh.f32 %v1106_v57  ;;  %v884_v24 = vmul.f32 0.5, %v868_v44  ;;  %v4895_v0 = vmul.f32 %v879_v54, %v4491_v37 }
 0x22e   :  { %v4889_v12 = vpop.eup %3848  ;;  %3864 = vtanh.f32 %v1110_v47  ;;  %v4898_v43 = vmul.f32 %v885_v29, %v4631_v15  ;;  %v881_v55 = vmul.f32 0.5, %v865_v25  ;;  %v911_v16 = vpack.c.bf16 %v903_v34, %v4877_v46 }
 0x22f   :  { %v3851_v11 = vpop.eup %3850  ;;  %v888_v45 = vmul.f32 0.5, %v872_v52  ;;  %3866 = vtanh.f32 %v1108_v21  ;;  %v891_v32 = vmul.f32 %v875_v2, %v4368_v48  ;;  %v900_v42 = vmul.f32 %v884_v24, %v4667_v39 }
 0x230   :  { %v870_v26 = vadd.f32 1.0, %v3851_v11  ;;  %3868 = vtanh.f32 %v1112_v18  ;;  %v3853_v23 = vpop.eup %3852  ;;  %v877_v6 = vmul.f32 0.5, %v861_v56  ;;  %v1141_v54 = vadd.f32 1.0, %v3839_v30 }
 0x231   :  { %v904_v37 = vmul.f32 %v888_v45, %v4777_v31  ;;  %v3855_v57 = vpop.eup %3854  ;;  %v913_v15 = vpack.c.bf16 %v4892_v63, %v4898_v43  ;;  %v860_v29 = vadd.f32 1.0, %v3853_v23  ;;  %v907_v25 = vpack.c.bf16 %v4895_v0, %v891_v32  ;;  %v6586_v23 = vld [vmem:[#allocation54_spill] sm:$0xff] }
 0x232   :  { %v886_v53 = vmul.f32 0.5, %v870_v26  ;;  %v3857_v51 = vpop.eup %3856  ;;  %v864_v44 = vadd.f32 1.0, %v3855_v57  ;;  %v4908_v48 = vmul.f32 %v881_v55, %v4522_v3  ;;  %v1082_v39 = vadd.f32 %v4486_v1, %v4403_v4  ;;  %v6585_v1 = vld [vmem:[#allocation75_spill] sm:$0xff] }
 0x233   :  { %v912_v46 = vpack.c.bf16 %v904_v37, %v900_v42  ;;  %v874_v2 = vadd.f32 1.0, %v3857_v51  ;;  %v876_v30 = vmul.f32 0.5, %v860_v29  ;;  %v1137_v34 = vadd.f32 1.0, %v4789_v5 }
 0x234   :  { %v3859_v31 = vpop.eup %3858  ;;  %v1139_v56 = vadd.f32 1.0, %v4813_v14  ;;  %v880_v52 = vmul.f32 0.5, %v864_v44  ;;  %v1157_v18 = vmul.f32 0.5, %v1141_v54  ;;  %v1143_v24 = vadd.f32 1.0, %v3847_v36  ;;  %v6587_v36 = vld [vmem:[#allocation64_spill] sm:$0xff]  ;;  %v6589_v54 = vld [vmem:[#allocation79_spill] sm:$0xff] }
 0x235   :  { %v3861_v47 = vpop.eup %3860  ;;  %931 = vmatprep.subr.bf16.mxu0 %v912_v46  ;;  %v862_v21 = vadd.f32 1.0, %v3859_v31  ;;  %v890_v63 = vmul.f32 0.5, %v874_v2  ;;  %v902_v3 = vmul.f32 %v886_v53, %v4739_v50  ;;  %v1086_v11 = vadd.f32 %v6585_v1, %v4561_v28 }
 0x236   :  { %932 = vmatpush1.bf16.msra.mxu0 %v911_v16  ;;  %v866_v0 = vadd.f32 1.0, %v3861_v47  ;;  %v892_v45 = vmul.f32 %v876_v30, %v4394_v62  ;;  %v896_v5 = vmul.f32 %v880_v52, %v4547_v35  ;;  %v1098_v14 = vmul.f32 0.7978846, %v1082_v39  ;;  %v6588_v16 = vld [vmem:[#allocation65_spill] sm:$0xff]  ;;  %v4930_v52 = vld [vmem:[%s6320_s8] sm:$0x3] }
 0x237   :  { %v878_v43 = vmul.f32 0.5, %v862_v21  ;;  %v906_v55 = vmul.f32 %v890_v63, %v4827_v19  ;;  %v1102_v32 = vmul.f32 0.7978846, %v1086_v11  ;;  %v1084_v42 = vadd.f32 %v6587_v36, %v6586_v23 }
 0x238   :  { %v882_v26 = vmul.f32 0.5, %v866_v0  ;;  %v908_v37 = vpack.c.bf16 %v896_v5, %v892_v45  ;;  %3870 = vtanh.f32 %v1098_v14  ;;  %v1088_v57 = vadd.f32 %v6589_v54, %v6588_v16  ;;  %v6591_v0 = vld [vmem:[#allocation80_spill] sm:$0xff]  ;;  %v6592_v45 = vld [vmem:[#allocation66_spill] sm:$0xff]  ;;  %v6593_v14 = vld [vmem:[#allocation59_spill] sm:$0xff] }
 0x239   :  { %v894_v50 = vmul.f32 %v878_v43, %v4505_v22  ;;  %v914_v62 = vpack.c.bf16 %v906_v55, %v902_v3  ;;  %3872 = vtanh.f32 %v1102_v32  ;;  %v1100_v29 = vmul.f32 0.7978846, %v1084_v42  ;;  %v6590_v22 = vld [vmem:[#allocation33_spill] sm:$0xff]  ;;  %v6596_v32 = vld [vmem:[#allocation72_spill] sm:$0xff] }
 0x23a   :  { %v3863_v53 = vpop.eup %3862  ;;  %v898_v35 = vmul.f32 %v882_v26, %v4608_v33  ;;  %933 = vmatprep.subr.bf16.mxu0 %v908_v37  ;;  %v1153_v46 = vmul.f32 0.5, %v1137_v34  ;;  %v1159_v44 = vmul.f32 0.5, %v1143_v24  ;;  %v1104_v39 = vmul.f32 0.7978846, %v1088_v57  ;;  %v6597_v42 = vld [vmem:[#allocation81_spill] sm:$0xff] }
 0x23b   :  { %v3865_v51 = vpop.eup %3864  ;;  %v1138_v19 = vadd.f32 1.0, %v3863_v53  ;;  %972 = vmatprep.subr.bf16.mxu1 %v914_v62  ;;  %934 = vmatpush1.bf16.msra.mxu0 %v907_v25  ;;  %v893_v30 = vmul.f32 %v877_v6, %v6590_v22  ;;  %3874 = vtanh.f32 %v1100_v29  ;;  %v1155_v34 = vmul.f32 0.5, %v1139_v56  ;;  %v6598_v29 = vld [vmem:[#allocation73_spill] sm:$0xff] }
 0x23c   :  { %v3867_v31 = vpop.eup %3866  ;;  %v910_v2 = vpack.c.bf16 %v898_v35, %v894_v50  ;;  %v1142_v47 = vadd.f32 1.0, %v3865_v51  ;;  %973 = vmatpush1.bf16.msra.mxu1 %v913_v15  ;;  %3876 = vtanh.f32 %v1104_v39  ;;  %v1346_v24 = vmul.f32 0.044715, %v4874_v61  ;;  %v6599_v51 = vld [vmem:[#allocation77_spill] sm:$0xff]  ;;  %v6600_v39 = vld [vmem:[#allocation83_spill] sm:$0xff] }
 0x23d   :  { %v3869_v33 = vpop.eup %3868  ;;  %v1154_v21 = vmul.f32 0.5, %v1138_v19  ;;  %v1140_v63 = vadd.f32 1.0, %v3867_v31  ;;  %v1173_v6 = vmul.f32 %v1157_v18, %v6591_v0  ;;  %v909_v1 = vpack.c.bf16 %v4908_v48, %v893_v30  ;;  %v6595_v18 = vld [vmem:[#allocation68_spill] sm:$0xff]  ;;  %v6601_v30 = vld [vmem:[#allocation69_spill] sm:$0xff] }
 0x23e   :  { %974 = vmatprep.subr.bf16.mxu1 %v910_v2  ;;  %v1158_v3 = vmul.f32 0.5, %v1142_v47  ;;  %v1144_v25 = vadd.f32 1.0, %v3869_v33  ;;  %3728 = vmatmul.mubr.msk.bf16.vlgmr.msra.gmra.mxu0 %vm915_vm4, %v4930_v52  ;;  %v1169_v5 = vmul.f32 %v1153_v46, %v6592_v45  ;;  %v1175_v15 = vmul.f32 %v1159_v44, %v4768_v13  ;;  %v6602_v33 = vld [vmem:[#allocation53_spill] sm:$0xff]  ;;  %v6606_v45 = vld [vmem:[#allocation52_spill] sm:$0xff] }
 0x23f   :  { %v1156_v11 = vmul.f32 0.5, %v1140_v63  ;;  %v1170_v56 = vmul.f32 %v1154_v21, %v4673_v38  ;;  %v1129_v55 = vadd.f32 1.0, %v6593_v14  ;;  %v6594_v26 = vmov 0   ;;  %v6603_v21 = vld [vmem:[#allocation60_spill] sm:$0xff] }
 0x240   :  { %v1174_v43 = vmul.f32 %v1158_v3, %v4805_v27  ;;  %v1160_v61 = vmul.f32 0.5, %v1144_v25  ;;  %1217 = vmatprep.mubr.bf16.mxu0 %v6594_v26  ;;  %975 = vmatpush1.bf16.msra.mxu1 %v909_v1  ;;  %v1171_v48 = vmul.f32 %v1155_v34, %v6595_v18  ;;  %v1133_v36 = vadd.f32 1.0, %v6596_v32  ;;  %v6604_v34 = vld [vmem:[#allocation63_spill] sm:$0xff] }
 0x241   :  { %v1356_v37 = vadd.f32 %v4866_v40, %v6597_v42  ;;  %v1360_v13 = vadd.f32 %v4871_v59, %v4824_v20  ;;  %v1172_v38 = vmul.f32 %v1156_v11, %v4748_v49  ;;  %v1181_v54 = vpack.c.bf16 %v1173_v6, %v1169_v5  ;;  %v6605_v1 = vld [vmem:[#allocation31_spill] sm:$0xff] }
 0x242   :  { %v1182_v50 = vpack.c.bf16 %v1174_v43, %v1170_v56  ;;  %v1176_v27 = vmul.f32 %v1160_v61, %v4834_v9  ;;  %v1358_v62 = vadd.f32 %v4869_v17, %v4785_v8  ;;  %v1362_v35 = vadd.f32 %v1346_v24, %v4848_v60  ;;  %v6608_v56 = vld [vmem:[#allocation76_spill] sm:$0xff] }
 0x243   :  { %v1372_v57 = vmul.f32 0.7978846, %v1356_v37  ;;  %v1376_v53 = vmul.f32 0.7978846, %v1360_v13  ;;  %v1322_v19 = vmul.f32 %v6599_v51, %v6598_v29  ;;  %3729 = vmatmul.mubr.msk.bf16.vlgmr.msra.gmra.mxu1 %vm915_vm4, %v4930_v52  ;;  %v1183_v59 = vpack.c.bf16 %v1175_v15, %v1171_v48  ;;  %v6607_v15 = vld [vmem:[#allocation61_spill] sm:$0xff]  ;;  %v6610_v51 = vld [vmem:[#allocation56_spill] sm:$0xff] }
 0x244   :  { %1197 = vmatprep.subr.bf16.mxu0 %v1182_v50  ;;  %v1184_v40 = vpack.c.bf16 %v1176_v27, %v1172_v38  ;;  %v1145_v49 = vmul.f32 0.5, %v1129_v55  ;;  %v1149_v9 = vmul.f32 0.5, %v1133_v36  ;;  %v1374_v46 = vmul.f32 0.7978846, %v1358_v62  ;;  %1258 = vmatprep.mubr.bf16.mxu1 %v6594_v26  ;;  %v6609_v27 = vld [vmem:[#allocation57_spill] sm:$0xff] }
 0x245   :  { %1198 = vmatpush1.bf16.msra.mxu0 %v1181_v54  ;;  %3878 = vtanh.f32 %v1372_v57  ;;  %v1378_v44 = vmul.f32 0.7978846, %v1362_v35  ;;  %v3871_v17 = vpop.eup %3870  ;;  %v1135_v31 = vadd.f32 1.0, %v6600_v39  ;;  %v1131_v47 = vadd.f32 1.0, %v6601_v30 }
 0x246   :  { %1238 = vmatprep.subr.bf16.mxu1 %v1184_v40  ;;  %3880 = vtanh.f32 %v1376_v53  ;;  %v3873_v2 = vpop.eup %3872  ;;  %v1130_v22 = vadd.f32 1.0, %v3871_v17  ;;  %v1348_v63 = vadd.f32 %v6603_v21, %v6602_v33  ;;  %v1334_v24 = vmul.f32 0.044715, %v6604_v34 }
 0x247   :  { %1239 = vmatpush1.bf16.msra.mxu1 %v1183_v59  ;;  %3882 = vtanh.f32 %v1374_v46  ;;  %v1338_v3 = vmul.f32 0.044715, %v1322_v19  ;;  %v1134_v25 = vadd.f32 1.0, %v3873_v2  ;;  %v1161_v11 = vmul.f32 %v1145_v49, %v6605_v1 }
 0x248   :  { %3884 = vtanh.f32 %v1378_v44  ;;  %v3875_v0 = vpop.eup %3874  ;;  %v1146_v6 = vmul.f32 0.5, %v1130_v22  ;;  %v1165_v5 = vmul.f32 %v1149_v9, %v6606_v45  ;;  %v1352_v43 = vadd.f32 %v6608_v56, %v6607_v15  ;;  %v6611_v9 = vld [vmem:[#allocation34_spill] sm:$0xff]  ;;  %v6612_v44 = vld [vmem:[#allocation85_spill] sm:$0xff] }
 0x249   :  { %v3877_v61 = vpop.eup %3876  ;;  %v1150_v14 = vmul.f32 0.5, %v1134_v25  ;;  %v1132_v55 = vadd.f32 1.0, %v3875_v0  ;;  %v1151_v18 = vmul.f32 0.5, %v1135_v31  ;;  %v1364_v48 = vmul.f32 0.7978846, %v1348_v63  ;;  %v6613_v25 = vld [vmem:[#allocation74_spill] sm:$0xff] }
 0x24a   :  { %v1162_v32 = vmul.f32 %v1146_v6, %v4403_v4  ;;  %v1136_v36 = vadd.f32 1.0, %v3877_v61  ;;  %v1147_v37 = vmul.f32 0.5, %v1131_v47  ;;  %v1368_v13 = vmul.f32 0.7978846, %v1352_v43 }
 0x24b   :  { %v1166_v50 = vmul.f32 %v1150_v14, %v4561_v28  ;;  %v1148_v38 = vmul.f32 0.5, %v1132_v55  ;;  %3886 = vtanh.f32 %v1364_v48  ;;  %v1350_v54 = vadd.f32 %v1334_v24, %v6609_v27  ;;  %v6615_v14 = vld [vmem:[#allocation62_spill] sm:$0xff]  ;;  %v6616_v48 = vld [vmem:[#allocation67_spill] sm:$0xff] }
 0x24c   :  { %v1152_v57 = vmul.f32 0.5, %v1136_v36  ;;  %3888 = vtanh.f32 %v1368_v13  ;;  %v1354_v53 = vadd.f32 %v1338_v3, %v6598_v29  ;;  %v1177_v35 = vpack.c.bf16 %v1165_v5, %v1161_v11  ;;  %v6617_v13 = vld [vmem:[#allocation84_spill] sm:$0xff] }
 0x24d   :  { %v1178_v62 = vpack.c.bf16 %v1166_v50, %v1162_v32  ;;  %v1167_v19 = vmul.f32 %v1151_v18, %v6610_v51  ;;  %v1366_v40 = vmul.f32 0.7978846, %v1350_v54  ;;  %v1164_v4 = vmul.f32 %v1148_v38, %v6586_v23 }
 0x24e   :  { %v1168_v59 = vmul.f32 %v1152_v57, %v6588_v16  ;;  %v1407_v49 = vadd.f32 1.0, %v4881_v7  ;;  %v1370_v28 = vmul.f32 0.7978846, %v1354_v53  ;;  %v1163_v46 = vmul.f32 %v1147_v37, %v6611_v9 }
 0x24f   :  { %1199 = vmatprep.subr.bf16.mxu0 %v1178_v62  ;;  %v1403_v17 = vadd.f32 1.0, %v6612_v44  ;;  %3890 = vtanh.f32 %v1366_v40  ;;  %v1409_v31 = vadd.f32 1.0, %v4889_v12  ;;  %v1405_v7 = vadd.f32 1.0, %v4821_v10  ;;  %v6614_v10 = vld [vmem:[#allocation82_spill] sm:$0xff]  ;;  %v6620_v44 = vld [vmem:[#allocation55_spill] sm:$0xff] }
 0x250   :  { %v1180_v39 = vpack.c.bf16 %v1168_v59, %v1164_v4  ;;  %1200 = vmatpush1.bf16.msra.mxu0 %v1177_v35  ;;  %3892 = vtanh.f32 %v1370_v28  ;;  %v1179_v22 = vpack.c.bf16 %v1167_v19, %v1163_v46  ;;  %v1423_v16 = vmul.f32 0.5, %v1407_v49  ;;  %v6618_v62 = vld [vmem:[#allocation70_spill] sm:$0xff]  ;;  %v6619_v59 = vld [vmem:[#allocation71_spill] sm:$0xff] }
 0x251   :  { %v1419_v63 = vmul.f32 0.5, %v1403_v17  ;;  %v1425_v12 = vmul.f32 0.5, %v1409_v31  ;;  %v1399_v0 = vadd.f32 1.0, %v6613_v25  ;;  %v1421_v5 = vmul.f32 0.5, %v1405_v7 }
 0x252   :  { %v3879_v2 = vpop.eup %3878  ;;  %1240 = vmatprep.subr.bf16.mxu1 %v1180_v39  ;;  %v1439_v45 = vmul.f32 %v1423_v16, %v6614_v10  ;;  %v1395_v55 = vadd.f32 1.0, %v6615_v14  ;;  %v1401_v50 = vadd.f32 1.0, %v6617_v13 }
 0x253   :  { %v3881_v30 = vpop.eup %3880  ;;  %v1404_v23 = vadd.f32 1.0, %v3879_v2  ;;  %1241 = vmatpush1.bf16.msra.mxu1 %v1179_v22  ;;  %3730 = vmatmul.mubr.msk.bf16.vlgmr.msra.gmra.mxu0 %vm915_vm4, %v4930_v52  ;;  %v1435_v32 = vmul.f32 %v1419_v63, %v6616_v48  ;;  %v1441_v36 = vmul.f32 %v1425_v12, %v4774_v58  ;;  %v1415_v37 = vmul.f32 0.5, %v1399_v0  ;;  %v6622_v63 = vld [vmem:[#allocation58_spill] sm:$0xff]  ;;  %v6623_v12 = vld [vmem:[#allocation35_spill] sm:$0xff] }
 0x254   :  { %v3883_v47 = vpop.eup %3882  ;;  %v1408_v21 = vadd.f32 1.0, %v3881_v30  ;;  %1483 = vmatprep.mubr.bf16.mxu0 %v6594_v26  ;;  %v1437_v35 = vmul.f32 %v1421_v5, %v6618_v62  ;;  %v1411_v4 = vmul.f32 0.5, %v1395_v55  ;;  %v1397_v58 = vadd.f32 1.0, %v6619_v59  ;;  %v6621_v30 = vld [vmem:[#allocation32_spill] sm:$0xff] }
 0x255   :  { %v3885_v34 = vpop.eup %3884  ;;  %v1420_v24 = vmul.f32 0.5, %v1404_v23  ;;  %v1406_v3 = vadd.f32 1.0, %v3883_v47  ;;  %v1447_v53 = vpack.c.bf16 %v1439_v45, %v1435_v32  ;;  %v1417_v17 = vmul.f32 0.5, %v1401_v50 }
 0x256   :  { %v1424_v6 = vmul.f32 0.5, %v1408_v21  ;;  %v1410_v1 = vadd.f32 1.0, %v3885_v34  ;;  %3731 = vmatmul.mubr.msk.bf16.vlgmr.msra.gmra.mxu1 %vm915_vm4, %v4930_v52  ;;  %v1449_v28 = vpack.c.bf16 %v1441_v36, %v1437_v35  ;;  %v1427_v23 = vmul.f32 %v1411_v4, %v6621_v30 }
 0x257   :  { %v1422_v11 = vmul.f32 0.5, %v1406_v3  ;;  %v1436_v56 = vmul.f32 %v1420_v24, %v6597_v42  ;;  %1524 = vmatprep.mubr.bf16.mxu1 %v6594_v26  ;;  %v1413_v16 = vmul.f32 0.5, %v1397_v58  ;;  %v1433_v34 = vmul.f32 %v1417_v17, %v6622_v63 }
 0x258   :  { %v1440_v43 = vmul.f32 %v1424_v6, %v4824_v20  ;;  %v1426_v61 = vmul.f32 0.5, %v1410_v1  ;;  %v3887_v18 = vpop.eup %3886  ;;  %v1537_v32 = vstv %s3718_s24  ;;  %v1550_v50 = vstv %s3719_s25  ;;  %s3753_s24 = sld [smem:[#allocation2 + $0x100]] }
 0x259   :  { %v3889_v38 = vpop.eup %3888  ;;  %v1438_v57 = vmul.f32 %v1422_v11, %v4785_v8  ;;  %v1396_v20 = vadd.f32 1.0, %v3887_v18  ;;  %s3754_s25 = sld [smem:[#allocation2 + $0x101]] }
 0x25a   :  { %v1448_v54 = vpack.c.bf16 %v1440_v43, %v1436_v56  ;;  %v1442_v42 = vmul.f32 %v1426_v61, %v4848_v60  ;;  %v1400_v51 = vadd.f32 1.0, %v3889_v38  ;;  %v1431_v60 = vmul.f32 %v1415_v37, %v6620_v44 }
 0x25b   :  { %v1412_v40 = vmul.f32 0.5, %v1396_v20  ;;  %v1568_v44 = vstv %s585_s26  ;;  %s6287_s26 = sld [smem:[#allocation2 + $0x103]] }
 0x25c   :  { %1463 = vmatprep.subr.bf16.mxu0 %v1448_v54  ;;  %v1450_v19 = vpack.c.bf16 %v1442_v42, %v1438_v57  ;;  %v3891_v49 = vpop.eup %3890  ;;  %v1416_v9 = vmul.f32 0.5, %v1400_v51  ;;  %v1443_v21 = vpack.c.bf16 %v1431_v60, %v1427_v23 }
 0x25d   :  { %1464 = vmatpush1.bf16.msra.mxu0 %v1447_v53  ;;  %v3893_v46 = vpop.eup %3892  ;;  %v1398_v8 = vadd.f32 1.0, %v3891_v49  ;;  %v1428_v39 = vmul.f32 %v1412_v40, %v6602_v33  ;;  %v1429_v33 = vmul.f32 %v1413_v16, %v6623_v12  ;;  %v1582_v12 = vstv %s3715_s28 }
 0x25e   :  { %1504 = vmatprep.subr.bf16.mxu1 %v1450_v19  ;;  %v1432_v31 = vmul.f32 %v1416_v9, %v6607_v15  ;;  %v1402_v2 = vadd.f32 1.0, %v3893_v46 }
 0x25f   :  { %1505 = vmatpush1.bf16.msra.mxu1 %v1449_v28  ;;  %v1414_v22 = vmul.f32 0.5, %v1398_v8  ;;  %v1445_v15 = vpack.c.bf16 %v1433_v34, %v1429_v33  ;;  %v6625_v33 = vld [vmem:[#allocation8_spill] sm:$0xff] }
 0x260   :  { %v1444_v7 = vpack.c.bf16 %v1432_v31, %v1428_v39  ;;  %v1418_v47 = vmul.f32 0.5, %v1402_v2 }
 0x261   :  { %v1430_v24 = vmul.f32 %v1414_v22, %v6609_v27 }
 0x262   :  { %1465 = vmatprep.subr.bf16.mxu0 %v1444_v7  ;;  %v1434_v3 = vmul.f32 %v1418_v47, %v6598_v29 }
 0x263   :  { %1466 = vmatpush1.bf16.msra.mxu0 %v1443_v21 }
 0x264   :  { %v1446_v25 = vpack.c.bf16 %v1434_v3, %v1430_v24  ;;  %v1577_v24 = vstv %s3714_s27  ;;  %s3755_s27 = sld [smem:[#allocation2 + $0x102]] }
 0x266   :  { %1506 = vmatprep.subr.bf16.mxu1 %v1446_v25  ;;  %3732 = vmatmul.mubr.msk.bf16.vlgmr.msra.gmra.mxu0 %vm915_vm4, %v4930_v52 }
 0x267   :  { %1507 = vmatpush1.bf16.msra.mxu1 %v1445_v15  ;;  %1651 = vmatprep.mubr.bf16.mxu0 %v6594_v26  ;;  %v5012_v28 = vpop.permute.xlu0 %1561  ;;  %v6626_v15 = vld [vmem:[#allocation9_spill] sm:$0xff] }
 0x268   :  { %6624 = vst [vmem:[#allocation75_spill] sm:$0xff] %v5012_v28 }
 0x26a   :  { %3733 = vmatmul.mubr.msk.bf16.vlgmr.msra.gmra.mxu1 %vm915_vm4, %v4930_v52 }
 0x26b   :  { %1704 = vmatprep.mubr.bf16.mxu1 %v6594_v26 }
 0x2fe   :  { %v953_v27 = vpop.f32.mrf.mxu0 }
 0x300   :  { %v955_v0 = vpop.f32.mrf.mxu0 }
 0x302   :  { %v957_v29 = vpop.f32.mrf.mxu0 }
 0x303   :  { %v994_v6 = vpop.f32.mrf.mxu1 }
 0x304   :  { %v958_v1 = vpop.f32.mrf.mxu0 }
 0x305   :  { %v996_v11 = vpop.f32.mrf.mxu1 }
 0x307   :  { %v998_v10 = vpop.f32.mrf.mxu1 }
 0x309   :  { %v999_v45 = vpop.f32.mrf.mxu1 }
 0x30a   :  { %v6627_v45 = vld [vmem:[#allocation10_spill] sm:$0xff] }
 0x313   :  { %v1219_v5 = vpop.f32.mrf.mxu0 }
 0x314   :  { %v1533_v52 = vsub.f32 %v953_v27, %v1219_v5 }
 0x315   :  { %v1221_v56 = vpop.f32.mrf.mxu0 }
 0x316   :  { %v1260_v43 = vpop.f32.mrf.mxu1  ;;  %v1534_v36 = vsub.f32 %v955_v0, %v1221_v56  ;;  %v1538_v38 = vmul.f32 %v1537_v32, %v1533_v52  ;;  %v1587_v0 = vstv %s3716_s9 }
 0x317   :  { %v1223_v61 = vpop.f32.mrf.mxu0  ;;  %v1535_v37 = vsub.f32 %v994_v6, %v1260_v43 }
 0x318   :  { %v1262_v14 = vpop.f32.mrf.mxu1  ;;  %v1539_v62 = vmul.f32 %v1537_v32, %v1534_v36 }
 0x319   :  { %v1224_v55 = vpop.f32.mrf.mxu0  ;;  %v1536_v57 = vsub.f32 %v996_v11, %v1262_v14  ;;  %v1540_v19 = vmul.f32 %v1537_v32, %v1535_v37 }
 0x31a   :  { %v1264_v18 = vpop.f32.mrf.mxu1  ;;  %v6628_v55 = vld [vmem:[#allocation11_spill] sm:$0xff] }
 0x31b   :  { %v1541_v46 = vmul.f32 %v1537_v32, %v1536_v57 }
 0x31c   :  { %v1265_v48 = vpop.f32.mrf.mxu1 }
 0x326   :  { %v1485_v13 = vpop.f32.mrf.mxu0 }
 0x327   :  { %v1546_v54 = vsub.f32 %v1219_v5, %v1485_v13  ;;  %v1542_v20 = vadd.f32 %v1538_v38, %v1485_v13 }
 0x328   :  { %v1487_v42 = vpop.f32.mrf.mxu0 }
 0x329   :  { %v1551_v53 = vmul.f32 %v1550_v50, %v1546_v54  ;;  %v1547_v35 = vsub.f32 %v1221_v56, %v1487_v42  ;;  %v1543_v58 = vadd.f32 %v1539_v62, %v1487_v42 }
 0x32a   :  { %v1526_v51 = vpop.f32.mrf.mxu1  ;;  %v1489_v40 = vpop.f32.mrf.mxu0 }
 0x32b   :  { %v1555_v4 = vadd.f32 %v1551_v53, %v1542_v20  ;;  %v1548_v59 = vsub.f32 %v1260_v43, %v1526_v51  ;;  %v1552_v49 = vmul.f32 %v1550_v50, %v1547_v35  ;;  %v1544_v60 = vadd.f32 %v1540_v19, %v1526_v51  ;;  %v4086_v19 = vld [vmem:[%s6318_s6] sm:$0xff]   ;;  %v4087_v40 = vld [vmem:[%s6318_s6 + $0x8] sm:$0xff]  }
 0x32c   :  { %v1528_v9 = vpop.f32.mrf.mxu1  ;;  %v1490_v8 = vpop.f32.mrf.mxu0 }
 0x32d   :  { %v1553_v17 = vmul.f32 %v1550_v50, %v1548_v59  ;;  %v1556_v39 = vadd.f32 %v1552_v49, %v1543_v58  ;;  %v1549_v31 = vsub.f32 %v1262_v14, %v1528_v9  ;;  %v1564_v22 = vadd.f32 %v5012_v28, %v1555_v4  ;;  %v6633_v58 = vld [vmem:[#allocation13_spill] sm:$0xff]  ;;  %v6635_v8 = vld [vmem:[#allocation20_spill] sm:$0xff] }
 0x32e   :  { %v1530_v2 = vpop.f32.mrf.mxu1  ;;  %v1545_v23 = vadd.f32 %v1541_v46, %v1528_v9  ;;  %v5056_v59 = vstv %s3738_s13  ;;  %v6634_v9 = vld [vmem:[#allocation14_spill] sm:$0xff] }
 0x32f   :  { %v1557_v30 = vadd.f32 %v1553_v17, %v1544_v60  ;;  %v1554_v16 = vmul.f32 %v1550_v50, %v1549_v31  ;;  %v1565_v7 = vadd.f32 %v5012_v28, %v1556_v39  ;;  %v1569_v21 = vmul.f32 %v1568_v44, %v1564_v22  ;;  %v6638_v2 = vld [vmem:[#allocation17_spill] sm:$0xff] }
 0x330   :  { %v1531_v47 = vpop.f32.mrf.mxu1  ;;  %v1588_v43 = vmul.f32 %v1587_v0, %v1564_v22 }
 0x331   :  { %v1558_v63 = vadd.f32 %v1554_v16, %v1545_v23  ;;  %v1570_v34 = vmul.f32 %v1568_v44, %v1565_v7  ;;  %v1566_v3 = vadd.f32 %v5012_v28, %v1557_v30  ;;  %v1573_v25 = vsub.f32 %v6625_v33, %v1569_v21  ;;  %v6639_v23 = vld [vmem:[#allocation18_spill] sm:$0xff] }
 0x332   :  { %v1589_v14 = vmul.f32 %v1587_v0, %v1565_v7 }
 0x333   :  { %v1574_v27 = vsub.f32 %v6626_v15, %v1570_v34  ;;  %v1567_v29 = vadd.f32 %v5012_v28, %v1558_v63  ;;  %v1571_v6 = vmul.f32 %v1568_v44, %v1566_v3  ;;  %v1578_v1 = vmul.f32 %v1577_v24, %v1573_v25  ;;  %v6640_v63 = vld [vmem:[#allocation15_spill] sm:$0xff] }
 0x334   :  { %v1590_v13 = vmul.f32 %v1587_v0, %v1566_v3 }
 0x335   :  { %v1579_v11 = vmul.f32 %v1577_v24, %v1574_v27  ;;  %v1572_v10 = vmul.f32 %v1568_v44, %v1567_v29  ;;  %v1575_v5 = vsub.f32 %v6627_v45, %v1571_v6  ;;  %v1583_v56 = vmul.f32 %v1582_v12, %v1578_v1 }
 0x336   :  { %v1591_v57 = vmul.f32 %v1587_v0, %v1567_v29 }
 0x337   :  { %v1584_v61 = vmul.f32 %v1582_v12, %v1579_v11  ;;  %v1576_v18 = vsub.f32 %v6628_v55, %v1572_v10  ;;  %v1580_v48 = vmul.f32 %v1577_v24, %v1575_v5  ;;  %v5022_v52 = vadd.f32 %v1588_v43, %v1583_v56 }
 0x339   :  { %6629 = vst [vmem:[#allocation54_spill] sm:$0xff] %v5022_v52  ;;  %v5024_v32 = vadd.f32 %v1589_v14, %v1584_v61  ;;  %v1581_v36 = vmul.f32 %v1577_v24, %v1576_v18  ;;  %v1585_v37 = vmul.f32 %v1582_v12, %v1580_v48  ;;  %v1603_v50 = vpack.c.bf16 %v5022_v52, %v5022_v52  ;;  %v6641_v24 = vld [vmem:[#allocation16_spill] sm:$0xff] }
 0x33b   :  { %6630 = vst [vmem:[#allocation64_spill] sm:$0xff] %v5024_v32  ;;  %v1604_v38 = vpack.c.bf16 %v5024_v32, %v5024_v32  ;;  %v1586_v54 = vmul.f32 %v1582_v12, %v1581_v36  ;;  %v5030_v42 = vadd.f32 %v1590_v13, %v1585_v37  ;;  %v1608_v53 = vsel %vm114_vm1, %v1603_v50, 0  ;;  %v6680_v32 = vld [vmem:[#allocation39_spill] sm:$0xff] }
 0x33d   :  { %6631 = vst [vmem:[#allocation65_spill] sm:$0xff] %v5030_v42  ;;  %3741 = vmatprep.subr.msk.bf16.mxu0 %vm114_vm1, %v1604_v38  ;;  %v5033_v20 = vadd.f32 %v1591_v57, %v1586_v54  ;;  %v1605_v62 = vpack.c.bf16 %v5030_v42, %v5030_v42 }
 0x33e   :  { %1634 = vmatpush1.bf16.msra.mxu0 %v1608_v53  ;;  %v6644_v53 = vld [vmem:[#allocation19_spill] sm:$0xff] }
 0x33f   :  { %6632 = vst [vmem:[#allocation79_spill] sm:$0xff] %v5033_v20  ;;  %v1606_v35 = vpack.c.bf16 %v5033_v20, %v5033_v20  ;;  %v1614_v51 = vsel %vm114_vm1, %v1605_v62, 0 }
 0x341   :  { %3744 = vmatprep.subr.msk.bf16.mxu1 %vm114_vm1, %v1606_v35  ;;  %3742 = vmatmul.mubr.msk.bf16.vlgmr.msra.gmra.mxu0 %vm368_vm3, %v4086_v19 }
 0x342   :  { %1687 = vmatpush1.bf16.msra.mxu1 %v1614_v51  ;;  %1661 = vmatprep.mubr.bf16.mxu0 %v6594_v26  ;;  %v6645_v51 = vld [vmem:[#allocation21_spill] sm:$0xff] }
 0x345   :  { %3745 = vmatmul.mubr.msk.bf16.vlgmr.msra.gmra.mxu1 %vm368_vm3, %v4086_v19 }
 0x346   :  { %1714 = vmatprep.mubr.bf16.mxu1 %v6594_v26 }
 0x349   :  { %3743 = vmatmul.mubr.msk.bf16.gmra.mxu0 %vm368_vm3, %v4087_v40 }
 0x34a   :  { %1942 = vmatprep.mubr.bf16.mxu0 %v6594_v26 }
 0x34d   :  { %3746 = vmatmul.mubr.msk.bf16.gmra.mxu1 %vm368_vm3, %v4087_v40 }
 0x34e   :  { %1983 = vmatprep.mubr.bf16.mxu1 %v6594_v26 }
 0x401   :  { %v1653_v4 = vpop.f32.mrf.mxu0 }
 0x402   :  { %v1725_v49 = vadd.f32 %v1653_v4, %v6633_v58  ;;  %v1992_v46 = vadd.f32 %v1653_v4, %v6634_v9  ;;  %v2258_v44 = vadd.f32 %v1653_v4, %v6635_v8 }
 0x403   :  { %v1655_v60 = vpop.f32.mrf.mxu0 }
 0x404   :  { %v5062_v17 = vadd.f32 %v5056_v59, %v1725_v49  ;;  %v5065_v39 = vadd.f32 %v1992_v46, %v5056_v59  ;;  %v5068_v31 = vadd.f32 %v2258_v44, %v5056_v59  ;;  %v1726_v22 = vadd.f32 %v1655_v60, %v6638_v2 }
 0x405   :  { %v1706_v30 = vpop.f32.mrf.mxu1  ;;  %v1993_v16 = vadd.f32 %v1655_v60, %v6639_v23  ;;  %v2259_v13 = vadd.f32 %v1655_v60, %v6635_v8  ;;  %v1657_v40 = vpop.f32.mrf.mxu0 }
 0x406   :  { %6636 = vst [vmem:[#allocation33_spill] sm:$0xff] %v5065_v39  ;;  %6637 = vst [vmem:[#allocation80_spill] sm:$0xff] %v5068_v31  ;;  %v1758_v7 = vmul.f32 %v5062_v17, %v5062_v17  ;;  %v2024_v47 = vmul.f32 %v5065_v39, %v5065_v39  ;;  %v2290_v21 = vmul.f32 %v5068_v31, %v5068_v31 }
 0x407   :  { %v1727_v34 = vadd.f32 %v1706_v30, %v6640_v63  ;;  %v1994_v3 = vadd.f32 %v1706_v30, %v6641_v24  ;;  %v2260_v12 = vadd.f32 %v1706_v30, %v6635_v8  ;;  %v5082_v33 = vadd.f32 %v5056_v59, %v1726_v22  ;;  %v1708_v18 = vpop.f32.mrf.mxu1  ;;  %v6665_v63 = vld [vmem:[#allocation28_spill] sm:$0xff] }
 0x408   :  { %v5085_v25 = vadd.f32 %v1993_v16, %v5056_v59  ;;  %v1774_v15 = vmul.f32 %v1758_v7, %v5062_v17  ;;  %v2040_v27 = vmul.f32 %v2024_v47, %v5065_v39  ;;  %v2306_v0 = vmul.f32 %v2290_v21, %v5068_v31  ;;  %v6647_v21 = vld [vmem:[#allocation22_spill] sm:$0xff] }
 0x409   :  { %v5091_v29 = vadd.f32 %v5056_v59, %v1727_v34  ;;  %v5094_v6 = vadd.f32 %v1994_v3, %v5056_v59  ;;  %v5097_v1 = vadd.f32 %v2260_v12, %v5056_v59  ;;  %v1759_v5 = vmul.f32 %v5082_v33, %v5082_v33  ;;  %v6649_v12 = vld [vmem:[#allocation23_spill] sm:$0xff] }
 0x40a   :  { %v1790_v11 = vmul.f32 0.044715, %v1774_v15  ;;  %v2056_v10 = vmul.f32 0.044715, %v2040_v27  ;;  %v2025_v61 = vmul.f32 %v5085_v25, %v5085_v25  ;;  %v2322_v14 = vmul.f32 0.044715, %v2306_v0 }
 0x40b   :  { %6642 = vst [vmem:[#allocation66_spill] sm:$0xff] %v5094_v6  ;;  %6643 = vst [vmem:[#allocation59_spill] sm:$0xff] %v5097_v1  ;;  %v1760_v45 = vmul.f32 %v5091_v29, %v5091_v29  ;;  %v2026_v56 = vmul.f32 %v5094_v6, %v5094_v6  ;;  %v2292_v43 = vmul.f32 %v5097_v1, %v5097_v1  ;;  %v6650_v27 = vld [vmem:[#allocation51_spill] sm:$0xff] }
 0x40c   :  { %v1806_v55 = vadd.f32 %v1790_v11, %v5062_v17  ;;  %v2072_v48 = vadd.f32 %v2056_v10, %v5065_v39  ;;  %v1775_v37 = vmul.f32 %v1759_v5, %v5082_v33  ;;  %v2041_v54 = vmul.f32 %v2025_v61, %v5085_v25  ;;  %v1710_v11 = vpop.f32.mrf.mxu1 }
 0x40d   :  { %v1776_v36 = vmul.f32 %v1760_v45, %v5091_v29  ;;  %v2042_v50 = vmul.f32 %v2026_v56, %v5094_v6  ;;  %v2308_v38 = vmul.f32 %v2292_v43, %v5097_v1  ;;  %v2338_v57 = vadd.f32 %v2322_v14, %v5068_v31 }
 0x40e   :  { %v1728_v62 = vadd.f32 %v1708_v18, %v6644_v53  ;;  %v1822_v35 = vmul.f32 0.7978846, %v1806_v55  ;;  %v1995_v19 = vadd.f32 %v1708_v18, %v6645_v51  ;;  %v2088_v4 = vmul.f32 0.7978846, %v2072_v48  ;;  %v5151_v55 = vpop.f32.mrf.mxu0 }
 0x40f   :  { %v1792_v49 = vmul.f32 0.044715, %v1776_v36  ;;  %v5120_v46 = vmul.f32 0.044715, %v1775_v37  ;;  %v5123_v44 = vadd.f32 %v2259_v13, %v5056_v59  ;;  %v2058_v60 = vmul.f32 0.044715, %v2042_v50 }
 0x410   :  { %v2324_v22 = vmul.f32 0.044715, %v2308_v38  ;;  %v5125_v30 = vmul.f32 0.044715, %v2041_v54  ;;  %v2354_v16 = vmul.f32 0.7978846, %v2338_v57  ;;  %v5128_v7 = vadd.f32 %v5056_v59, %v1728_v62 }
 0x411   :  { %6646 = vst [vmem:[#allocation68_spill] sm:$0xff] %v5123_v44  ;;  %v2261_v47 = vadd.f32 %v1708_v18, %v6635_v8  ;;  %v1729_v34 = vadd.f32 %v1657_v40, %v6647_v21  ;;  %3894 = vtanh.f32 %v1822_v35  ;;  %v5133_v3 = vadd.f32 %v1995_v19, %v5056_v59  ;;  %v6654_v37 = vld [vmem:[#allocation24_spill] sm:$0xff]  ;;  %v6655_v57 = vld [vmem:[#allocation25_spill] sm:$0xff] }
 0x412   :  { %v1996_v15 = vadd.f32 %v1657_v40, %v6649_v12  ;;  %v2262_v0 = vadd.f32 %v1657_v40, %v6650_v27  ;;  %3896 = vtanh.f32 %v2088_v4  ;;  %v1808_v10 = vadd.f32 %v1792_v49, %v5091_v29  ;;  %v6656_v4 = vld [vmem:[#allocation26_spill] sm:$0xff] }
 0x413   :  { %6648 = vst [vmem:[#allocation72_spill] sm:$0xff] %v5133_v3  ;;  %v2291_v45 = vmul.f32 %v5123_v44, %v5123_v44  ;;  %v5141_v5 = vadd.f32 %v5056_v59, %v1729_v34  ;;  %v2074_v56 = vadd.f32 %v2058_v60, %v5094_v6  ;;  %v2340_v43 = vadd.f32 %v2324_v22, %v5097_v1  ;;  %v6658_v34 = vld [vmem:[#allocation27_spill] sm:$0xff] }
 0x414   :  { %v5146_v61 = vadd.f32 %v1996_v15, %v5056_v59  ;;  %v5149_v14 = vadd.f32 %v2262_v0, %v5056_v59  ;;  %v1761_v18 = vmul.f32 %v5128_v7, %v5128_v7  ;;  %v5156_v48 = vadd.f32 %v2261_v47, %v5056_v59 }
 0x415   :  { %v1762_v36 = vmul.f32 %v5141_v5, %v5141_v5  ;;  %v1731_v13 = vadd.f32 %v1710_v11, %v6654_v37  ;;  %v2027_v50 = vmul.f32 %v5133_v3, %v5133_v3  ;;  %v1998_v62 = vadd.f32 %v1710_v11, %v6655_v57 }
 0x416   :  { %6651 = vst [vmem:[#allocation81_spill] sm:$0xff] %v5146_v61  ;;  %6652 = vst [vmem:[#allocation73_spill] sm:$0xff] %v5149_v14  ;;  %v2028_v38 = vmul.f32 %v5146_v61, %v5146_v61  ;;  %v2294_v54 = vmul.f32 %v5149_v14, %v5149_v14  ;;  %v2264_v40 = vadd.f32 %v1710_v11, %v6650_v27  ;;  %v2090_v37 = vmul.f32 0.7978846, %v2074_v56 }
 0x417   :  { %6653 = vst [vmem:[#allocation77_spill] sm:$0xff] %v5156_v48  ;;  %v1778_v35 = vmul.f32 %v1762_v36, %v5141_v5  ;;  %v5170_v19 = vadd.f32 %v5056_v59, %v1731_v13  ;;  %v1730_v49 = vadd.f32 %v5151_v55, %v6656_v4  ;;  %v5178_v47 = vadd.f32 %v1998_v62, %v5056_v59 }
 0x418   :  { %v2044_v60 = vmul.f32 %v2028_v38, %v5146_v61  ;;  %v2310_v22 = vmul.f32 %v2294_v54, %v5149_v14  ;;  %v1997_v15 = vadd.f32 %v5151_v55, %v6658_v34  ;;  %v5185_v13 = vadd.f32 %v2264_v40, %v5056_v59 }
 0x419   :  { %6657 = vst [vmem:[#allocation83_spill] sm:$0xff] %v5178_v47  ;;  %v1794_v0 = vmul.f32 0.044715, %v1778_v35  ;;  %v1764_v36 = vmul.f32 %v5170_v19, %v5170_v19  ;;  %v5188_v11 = vadd.f32 %v5056_v59, %v1730_v49  ;;  %v2293_v38 = vmul.f32 %v5156_v48, %v5156_v48 }
 0x41a   :  { %6659 = vst [vmem:[#allocation69_spill] sm:$0xff] %v5185_v13  ;;  %v2060_v54 = vmul.f32 0.044715, %v2044_v60  ;;  %v2030_v62 = vmul.f32 %v5178_v47, %v5178_v47  ;;  %v5195_v4 = vadd.f32 %v1997_v15, %v5056_v59  ;;  %v1824_v35 = vmul.f32 0.7978846, %v1808_v10 }
 0x41b   :  { %v1810_v34 = vadd.f32 %v1794_v0, %v5141_v5  ;;  %v2326_v57 = vmul.f32 0.044715, %v2310_v22  ;;  %v1780_v40 = vmul.f32 %v1764_v36, %v5170_v19  ;;  %v2296_v12 = vmul.f32 %v5185_v13, %v5185_v13 }
 0x41c   :  { %6660 = vst [vmem:[#allocation53_spill] sm:$0xff] %v5195_v4  ;;  %v2076_v49 = vadd.f32 %v2060_v54, %v5146_v61  ;;  %v1763_v60 = vmul.f32 %v5188_v11, %v5188_v11  ;;  %v2356_v21 = vmul.f32 0.7978846, %v2340_v43  ;;  %v2307_v51 = vmul.f32 %v2291_v45, %v5123_v44  ;;  %v1712_v45 = vpop.f32.mrf.mxu1 }
 0x41d   :  { %v1777_v15 = vmul.f32 %v1761_v18, %v5128_v7  ;;  %v2046_v10 = vmul.f32 %v2030_v62, %v5178_v47  ;;  %3898 = vtanh.f32 %v2354_v16  ;;  %v2043_v22 = vmul.f32 %v2027_v50, %v5133_v3  ;;  %v6704_v3 = vld [vmem:[#allocation49_spill] sm:$0xff] }
 0x41e   :  { %v2309_v56 = vmul.f32 %v2293_v38, %v5156_v48  ;;  %v2029_v0 = vmul.f32 %v5195_v4, %v5195_v4  ;;  %v5211_v36 = vpop.eup %3894  ;;  %3900 = vtanh.f32 %v1824_v35  ;;  %v1826_v54 = vmul.f32 0.7978846, %v1810_v34  ;;  %v1663_v38 = vpop.f32.mrf.mxu0 }
 0x41f   :  { %v2342_v43 = vadd.f32 %v2326_v57, %v5149_v14  ;;  %v1796_v53 = vmul.f32 0.044715, %v1780_v40  ;;  %v5214_v23 = vpop.eup %3896  ;;  %3902 = vtanh.f32 %v2090_v37  ;;  %v2092_v18 = vmul.f32 0.7978846, %v2076_v49 }
 0x420   :  { %6661 = vst [vmem:[#allocation60_spill] sm:$0xff] %v5214_v23  ;;  %v2312_v16 = vmul.f32 %v2296_v12, %v5185_v13  ;;  %v1779_v50 = vmul.f32 %v1763_v60, %v5188_v11  ;;  %3904 = vtanh.f32 %v2356_v21  ;;  %v5218_v62 = vmul.f32 0.044715, %v2307_v51  ;;  %v6666_v60 = vld [vmem:[#allocation30_spill] sm:$0xff] }
 0x421   :  { %v5220_v24 = vmul.f32 0.044715, %v1777_v15  ;;  %v2062_v35 = vmul.f32 0.044715, %v2046_v10  ;;  %v5222_v34 = vmul.f32 0.044715, %v2043_v22  ;;  %v2045_v40 = vmul.f32 %v2029_v0, %v5195_v4  ;;  %v1716_v10 = vpop.f32.mrf.mxu1 }
 0x422   :  { %6662 = vst [vmem:[#allocation63_spill] sm:$0xff] %v5218_v62  ;;  %v5224_v57 = vmul.f32 0.044715, %v2309_v56  ;;  %v1732_v37 = vadd.f32 %v1712_v45, %v6665_v63  ;;  %3906 = vtanh.f32 %v1826_v54  ;;  %v2358_v49 = vmul.f32 0.7978846, %v2342_v43  ;;  %v6667_v56 = vld [vmem:[#allocation29_spill] sm:$0xff] }
 0x423   :  { %6663 = vst [vmem:[#allocation31_spill] sm:$0xff] %v5222_v34  ;;  %v1812_v12 = vadd.f32 %v1796_v53, %v5170_v19  ;;  %v1733_v2 = vadd.f32 %v1663_v38, %v6666_v60  ;;  %3908 = vtanh.f32 %v2092_v18  ;;  %v2328_v51 = vmul.f32 0.044715, %v2312_v16  ;;  %v6668_v54 = vld [vmem:[#allocation36_spill] sm:$0xff] }
 0x424   :  { %6664 = vst [vmem:[#allocation52_spill] sm:$0xff] %v5224_v57  ;;  %v5230_v21 = vmul.f32 0.044715, %v1779_v50  ;;  %v2263_v15 = vadd.f32 %v5151_v55, %v6650_v27  ;;  %v2078_v22 = vadd.f32 %v2062_v35, %v5178_v47  ;;  %v1999_v0 = vadd.f32 %v1712_v45, %v6667_v56  ;;  %v6670_v50 = vld [vmem:[#allocation12_spill] sm:$0xff] }
 0x425   :  { %v5237_v63 = vadd.f32 %v5056_v59, %v1733_v2  ;;  %v2000_v43 = vadd.f32 %v1663_v38, %v6668_v54  ;;  %v5240_v53 = vmul.f32 0.044715, %v2045_v40  ;;  %v5243_v18 = vadd.f32 %v5056_v59, %v1732_v37  ;;  %v6672_v2 = vld [vmem:[#allocation37_spill] sm:$0xff] }
 0x426   :  { %v2265_v16 = vadd.f32 %v1712_v45, %v6650_v27  ;;  %v2266_v60 = vadd.f32 %v1663_v38, %v6670_v50  ;;  %3910 = vtanh.f32 %v2358_v49  ;;  %v1735_v56 = vadd.f32 %v1716_v10, %v6672_v2 }
 0x427   :  { %6669 = vst [vmem:[#allocation61_spill] sm:$0xff] %v5240_v53  ;;  %v1766_v55 = vmul.f32 %v5237_v63, %v5237_v63  ;;  %v5250_v35 = vadd.f32 %v2000_v43, %v5056_v59  ;;  %v1828_v8 = vmul.f32 0.7978846, %v1812_v12  ;;  %v2344_v40 = vadd.f32 %v2328_v51, %v5185_v13  ;;  %v1665_v12 = vpop.f32.mrf.mxu0 }
 0x428   :  { %v5255_v54 = vadd.f32 %v2263_v15, %v5056_v59  ;;  %v5258_v37 = vadd.f32 %v2266_v60, %v5056_v59  ;;  %v5261_v45 = vadd.f32 %v1999_v0, %v5056_v59  ;;  %v5267_v43 = vadd.f32 %v5056_v59, %v1735_v56  ;;  %v6677_v0 = vld [vmem:[#allocation38_spill] sm:$0xff] }
 0x429   :  { %6671 = vst [vmem:[#allocation76_spill] sm:$0xff] %v5250_v35  ;;  %v1782_v38 = vmul.f32 %v1766_v55, %v5237_v63  ;;  %v2032_v49 = vmul.f32 %v5250_v35, %v5250_v35  ;;  %v1765_v51 = vmul.f32 %v5243_v18, %v5243_v18  ;;  %v5272_v15 = vadd.f32 %v2265_v16, %v5056_v59  ;;  %v1667_v62 = vpop.f32.mrf.mxu0 }
 0x42a   :  { %6673 = vst [vmem:[#allocation57_spill] sm:$0xff] %v5255_v54  ;;  %6674 = vst [vmem:[#allocation56_spill] sm:$0xff] %v5258_v37  ;;  %v2298_v60 = vmul.f32 %v5258_v37, %v5258_v37  ;;  %v2002_v2 = vadd.f32 %v1716_v10, %v6677_v0  ;;  %v5277_v27 = vpop.eup %3898  ;;  %v1768_v56 = vmul.f32 %v5267_v43, %v5267_v43  ;;  %v6681_v0 = vld [vmem:[#allocation40_spill] sm:$0xff]  ;;  %3912 = vtanh.f32 %v1828_v8 }
 0x42b   :  { %6675 = vst [vmem:[#allocation34_spill] sm:$0xff] %v5261_v45  ;;  %6676 = vst [vmem:[#allocation85_spill] sm:$0xff] %v5272_v15  ;;  %v1798_v55 = vmul.f32 0.044715, %v1782_v38  ;;  %v2048_v9 = vmul.f32 %v2032_v49, %v5250_v35  ;;  %v2268_v58 = vadd.f32 %v1716_v10, %v6670_v50  ;;  %v5283_v20 = vpop.eup %3900  ;;  %v1734_v52 = vadd.f32 %v1665_v12, %v6680_v32 }
 0x42c   :  { %6678 = vst [vmem:[#allocation74_spill] sm:$0xff] %v5277_v27  ;;  %v2314_v16 = vmul.f32 %v2298_v60, %v5258_v37  ;;  %v5287_v42 = vadd.f32 %v2002_v2, %v5056_v59  ;;  %v2001_v28 = vadd.f32 %v1665_v12, %v6681_v0  ;;  %v5291_v1 = vpop.eup %3902  ;;  %v1784_v13 = vmul.f32 %v1768_v56, %v5267_v43 }
 0x42d   :  { %6682 = vst [vmem:[#allocation62_spill] sm:$0xff] %v5291_v1  ;;  %v1814_v38 = vadd.f32 %v1798_v55, %v5237_v63  ;;  %v2064_v49 = vmul.f32 0.044715, %v2048_v9  ;;  %v5296_v10 = vadd.f32 %v2268_v58, %v5056_v59  ;;  %v5298_v31 = vpop.eup %3904  ;;  %v5303_v32 = vadd.f32 %v5056_v59, %v1734_v52  ;;  %v1718_v1 = vpop.f32.mrf.mxu1 }
 0x42e   :  { %6679 = vst [vmem:[#allocation82_spill] sm:$0xff] %v5287_v42  ;;  %6684 = vst [vmem:[#allocation84_spill] sm:$0xff] %v5298_v31  ;;  %v2330_v60 = vmul.f32 0.044715, %v2314_v16  ;;  %v2034_v2 = vmul.f32 %v5287_v42, %v5287_v42  ;;  %v5306_v0 = vadd.f32 %v2001_v28, %v5056_v59  ;;  %v2031_v9 = vmul.f32 %v5261_v45, %v5261_v45 }
 0x42f   :  { %6683 = vst [vmem:[#allocation67_spill] sm:$0xff] %v5296_v10  ;;  %v2080_v55 = vadd.f32 %v2064_v49, %v5250_v35  ;;  %v1800_v56 = vmul.f32 0.044715, %v1784_v13  ;;  %v2300_v58 = vmul.f32 %v5296_v10, %v5296_v10  ;;  %v5313_v14 = vpop.eup %3906  ;;  %v2094_v16 = vmul.f32 0.7978846, %v2078_v22 }
 0x430   :  { %v2295_v31 = vmul.f32 %v5255_v54, %v5255_v54  ;;  %v2346_v52 = vadd.f32 %v2330_v60, %v5258_v37  ;;  %v2050_v28 = vmul.f32 %v2034_v2, %v5287_v42  ;;  %v5319_v27 = vpop.eup %3908  ;;  %v2297_v6 = vmul.f32 %v5272_v15, %v5272_v15 }
 0x431   :  { %6685 = vst [vmem:[#allocation70_spill] sm:$0xff] %v5319_v27  ;;  %v2316_v13 = vmul.f32 %v2300_v58, %v5296_v10  ;;  %v1767_v49 = vmul.f32 %v5303_v32, %v5303_v32  ;;  %v2033_v22 = vmul.f32 %v5306_v0, %v5306_v0  ;;  %v1781_v47 = vmul.f32 %v1765_v51, %v5243_v18 }
 0x432   :  { %v1830_v39 = vmul.f32 0.7978846, %v1814_v38  ;;  %v2066_v60 = vmul.f32 0.044715, %v2050_v28  ;;  %v5329_v37 = vmul.f32 0.7978846, %v2344_v40  ;;  %v2047_v2 = vmul.f32 %v2031_v9, %v5261_v45 }
 0x433   :  { %v2096_v57 = vmul.f32 0.7978846, %v2080_v55  ;;  %v1816_v48 = vadd.f32 %v1800_v56, %v5267_v43  ;;  %v5333_v58 = vpop.eup %3910  ;;  %3914 = vtanh.f32 %v2094_v16  ;;  %v5336_v44 = vmul.f32 %v2295_v31, %v5255_v54  ;;  %v6690_v16 = vld [vmem:[#allocation43_spill] sm:$0xff] }
 0x434   :  { %6686 = vst [vmem:[#allocation71_spill] sm:$0xff] %v5329_v37  ;;  %6687 = vst [vmem:[#allocation55_spill] sm:$0xff] %v5333_v58  ;;  %v2362_v61 = vmul.f32 0.7978846, %v2346_v52  ;;  %v2332_v8 = vmul.f32 0.044715, %v2316_v13  ;;  %v5339_v51 = vmul.f32 %v2297_v6, %v5272_v15  ;;  %v1783_v40 = vmul.f32 %v1767_v49, %v5303_v32 }
 0x435   :  { %6688 = vst [vmem:[#allocation32_spill] sm:$0xff] %v5336_v44  ;;  %v2049_v38 = vmul.f32 %v2033_v22, %v5306_v0  ;;  %v2267_v9 = vadd.f32 %v1665_v12, %v6670_v50  ;;  %v5344_v55 = vmul.f32 0.044715, %v1781_v47  ;;  %3916 = vtanh.f32 %v1830_v39  ;;  %v6692_v13 = vld [vmem:[#allocation44_spill] sm:$0xff]  ;;  %v6693_v58 = vld [vmem:[#allocation41_spill] sm:$0xff]  ;;  %v1720_v47 = vpop.f32.mrf.mxu1  ;;  %v6699_v54 = vld [vmem:[#allocation47_spill] sm:$0xff] }
 0x436   :  { %6689 = vst [vmem:[#allocation58_spill] sm:$0xff] %v5339_v51  ;;  %v2082_v56 = vadd.f32 %v2066_v60, %v5287_v42  ;;  %v1737_v31 = vadd.f32 %v1667_v62, %v6690_v16  ;;  %v5348_v28 = vmul.f32 0.044715, %v2047_v2  ;;  %3918 = vtanh.f32 %v2096_v57  ;;  %v6697_v16 = vld [vmem:[#allocation45_spill] sm:$0xff] }
 0x437   :  { %v1832_v52 = vmul.f32 0.7978846, %v1816_v48  ;;  %v2004_v6 = vadd.f32 %v1667_v62, %v6692_v13  ;;  %3920 = vtanh.f32 %v2362_v61  ;;  %v2348_v49 = vadd.f32 %v2332_v8, %v5296_v10  ;;  %v6696_v61 = vld [vmem:[#allocation42_spill] sm:$0xff]  ;;  %v1722_v42 = vpop.f32.mrf.mxu1 }
 0x438   :  { %6691 = vst [vmem:[#allocation35_spill] sm:$0xff] %v5348_v28  ;;  %v1736_v22 = vadd.f32 %v1718_v1, %v6693_v58  ;;  %v5354_v12 = vadd.f32 %v5056_v59, %v1737_v31  ;;  %v5356_v39 = vmul.f32 0.044715, %v1783_v40  ;;  %v5358_v60 = vmul.f32 0.044715, %v2049_v38 }
 0x439   :  { %v5361_v2 = vadd.f32 %v2267_v9, %v5056_v59  ;;  %v5364_v48 = vadd.f32 %v2004_v6, %v5056_v59  ;;  %v2098_v57 = vmul.f32 0.7978846, %v2082_v56  ;;  %v2003_v13 = vadd.f32 %v1718_v1, %v6696_v61 }
 0x43a   :  { %v1770_v8 = vmul.f32 %v5354_v12, %v5354_v12  ;;  %v2270_v31 = vadd.f32 %v1667_v62, %v4706_v41  ;;  %3922 = vtanh.f32 %v1832_v52  ;;  %v2269_v40 = vadd.f32 %v1718_v1, %v6670_v50  ;;  %v6698_v50 = vld [vmem:[#allocation46_spill] sm:$0xff] }
 0x43b   :  { %6694 = vst [vmem:[#allocation8_spill] sm:$0xff] %v5361_v2  ;;  %6695 = vst [vmem:[#allocation9_spill] sm:$0xff] %v5364_v48  ;;  %v2036_v38 = vmul.f32 %v5364_v48, %v5364_v48  ;;  %v1739_v9 = vadd.f32 %v1720_v47, %v6697_v16  ;;  %v2364_v58 = vmul.f32 0.7978846, %v2348_v49  ;;  %v5375_v6 = vadd.f32 %v5056_v59, %v1736_v22  ;;  %v1669_v16 = vpop.f32.mrf.mxu0 }
 0x43c   :  { %v1786_v56 = vmul.f32 %v1770_v8, %v5354_v12  ;;  %v5379_v61 = vadd.f32 %v2270_v31, %v5056_v59  ;;  %v2299_v62 = vmul.f32 %v5361_v2, %v5361_v2  ;;  %v2006_v10 = vadd.f32 %v1720_v47, %v6698_v50  ;;  %v5393_v31 = vpop.eup %3912 }
 0x43d   :  { %v2052_v52 = vmul.f32 %v2036_v38, %v5364_v48  ;;  %v5385_v1 = vadd.f32 %v5056_v59, %v1739_v9  ;;  %3924 = vtanh.f32 %v2098_v57  ;;  %v5389_v49 = vadd.f32 %v2003_v13, %v5056_v59 }
 0x43e   :  { %v1802_v22 = vmul.f32 0.044715, %v1786_v56  ;;  %v2302_v8 = vmul.f32 %v5379_v61, %v5379_v61  ;;  %v5396_v15 = vadd.f32 %v2269_v40, %v5056_v59  ;;  %v5401_v9 = vadd.f32 %v2006_v10, %v5056_v59 }
 0x43f   :  { %v1772_v38 = vmul.f32 %v5385_v1, %v5385_v1  ;;  %v2272_v57 = vadd.f32 %v1720_v47, %v4706_v41  ;;  %v1769_v13 = vmul.f32 %v5375_v6, %v5375_v6  ;;  %v1738_v51 = vadd.f32 %v1669_v16, %v6699_v54 }
 0x440   :  { %v1818_v56 = vadd.f32 %v1802_v22, %v5354_v12  ;;  %v2318_v50 = vmul.f32 %v2302_v8, %v5379_v61  ;;  %v5409_v37 = vpop.eup %3914  ;;  %v2068_v40 = vmul.f32 0.044715, %v2052_v52  ;;  %v2038_v10 = vmul.f32 %v5401_v9, %v5401_v9 }
 0x441   :  { %6700 = vst [vmem:[#allocation10_spill] sm:$0xff] %v5409_v37  ;;  %v1788_v44 = vmul.f32 %v1772_v38, %v5385_v1  ;;  %v5415_v26 = vadd.f32 %v2272_v57, %v5056_v59  ;;  %v2315_v47 = vmul.f32 %v2299_v62, %v5361_v2  ;;  %v2035_v22 = vmul.f32 %v5389_v49, %v5389_v49  ;;  %v6702_v2 = vld [vmem:[#allocation48_spill] sm:$0xff] }
 0x442   :  { %v1834_v23 = vmul.f32 0.7978846, %v1818_v56  ;;  %v5421_v8 = vadd.f32 %v5056_v59, %v1738_v51  ;;  %v5423_v54 = vpop.eup %3916  ;;  %v2334_v52 = vmul.f32 0.044715, %v2318_v50  ;;  %v2054_v38 = vmul.f32 %v2038_v10, %v5401_v9 }
 0x443   :  { %6701 = vst [vmem:[#allocation11_spill] sm:$0xff] %v5415_v26  ;;  %v1804_v37 = vmul.f32 0.044715, %v1788_v44  ;;  %v2304_v27 = vmul.f32 %v5415_v26, %v5415_v26  ;;  %v5428_v57 = vpop.eup %3918  ;;  %v1785_v62 = vmul.f32 %v1769_v13, %v5375_v6  ;;  %v2005_v51 = vadd.f32 %v1669_v16, %v6702_v2 }
 0x444   :  { %3926 = vtanh.f32 %v1834_v23  ;;  %v1771_v56 = vmul.f32 %v5421_v8, %v5421_v8  ;;  %v5434_v35 = vpop.eup %3920  ;;  %v2084_v44 = vadd.f32 %v2068_v40, %v5364_v48  ;;  %v2070_v10 = vmul.f32 0.044715, %v2054_v38 }
 0x445   :  { %6703 = vst [vmem:[#allocation86_spill] sm:$0xff] %v5434_v35  ;;  %v1820_v50 = vadd.f32 %v1804_v37, %v5385_v1  ;;  %v2320_v28 = vmul.f32 %v2304_v27, %v5415_v26  ;;  %3928 = vtanh.f32 %v2364_v58  ;;  %v2301_v13 = vmul.f32 %v5396_v15, %v5396_v15 }
 0x446   :  { %v1787_v23 = vmul.f32 %v1771_v56, %v5421_v8  ;;  %v2271_v45 = vadd.f32 %v1669_v16, %v4706_v41  ;;  %v5443_v34 = vmul.f32 0.044715, %v2315_v47  ;;  %v2350_v2 = vadd.f32 %v2334_v52, %v5379_v61  ;;  %v6705_v52 = vld [vmem:[#allocation50_spill] sm:$0xff] }
 0x447   :  { %v1836_v35 = vmul.f32 0.7978846, %v1820_v50  ;;  %v1740_v40 = vadd.f32 %v1722_v42, %v6704_v3  ;;  %v3923_v48 = vpop.eup %3922  ;;  %v1801_v37 = vmul.f32 0.044715, %v1785_v62  ;;  %v2051_v38 = vmul.f32 %v2035_v22, %v5389_v49 }
 0x448   :  { %v2336_v27 = vmul.f32 0.044715, %v2320_v28  ;;  %v1803_v58 = vmul.f32 0.044715, %v1787_v23  ;;  %v2100_v53 = vmul.f32 0.7978846, %v2084_v44  ;;  %v2086_v4 = vadd.f32 %v2070_v10, %v5401_v9 }
 0x449   :  { %v5450_v56 = vadd.f32 %v2005_v51, %v5056_v59  ;;  %v5453_v16 = vadd.f32 %v5056_v59, %v1740_v40  ;;  %3930 = vtanh.f32 %v1836_v35  ;;  %v5456_v47 = vadd.f32 %v2271_v45, %v5056_v59 }
 0x44a   :  { %v2007_v50 = vadd.f32 %v1722_v42, %v6705_v52  ;;  %v1815_v22 = vadd.f32 %v5356_v39, %v5303_v32  ;;  %v5461_v28 = vpop.eup %3924  ;;  %v2317_v62 = vmul.f32 %v2301_v13, %v5396_v15  ;;  %v2366_v44 = vmul.f32 0.7978846, %v2350_v2 }
 0x44b   :  { %v1773_v51 = vmul.f32 %v5453_v16, %v5453_v16  ;;  %v1819_v10 = vadd.f32 %v1803_v58, %v5421_v8  ;;  %v2352_v35 = vadd.f32 %v2336_v27, %v5415_v26  ;;  %v2273_v23 = vadd.f32 %v1722_v42, %v4706_v41 }
 0x44c   :  { %v5469_v45 = vadd.f32 %v2007_v50, %v5056_v59  ;;  %v1831_v40 = vmul.f32 0.7978846, %v1815_v22  ;;  %3932 = vtanh.f32 %v2100_v53  ;;  %v1817_v13 = vadd.f32 %v1801_v37, %v5375_v6 }
 0x44d   :  { %v1789_v39 = vmul.f32 %v1773_v51, %v5453_v16  ;;  %v1835_v52 = vmul.f32 0.7978846, %v1819_v10  ;;  %v2102_v2 = vmul.f32 0.7978846, %v2086_v4  ;;  %v2037_v3 = vmul.f32 %v5450_v56, %v5450_v56 }
 0x44e   :  { %v2303_v58 = vmul.f32 %v5456_v47, %v5456_v47  ;;  %3934 = vtanh.f32 %v1831_v40  ;;  %v2039_v50 = vmul.f32 %v5469_v45, %v5469_v45  ;;  %v1833_v42 = vmul.f32 0.7978846, %v1817_v13 }
 0x44f   :  { %v1805_v27 = vmul.f32 0.044715, %v1789_v39  ;;  %3936 = vtanh.f32 %v1835_v52  ;;  %v2368_v53 = vmul.f32 0.7978846, %v2352_v35  ;;  %v5481_v22 = vadd.f32 %v2273_v23, %v5056_v59 }
 0x450   :  { %3938 = vtanh.f32 %v2366_v44  ;;  %v1807_v4 = vadd.f32 %v5120_v46, %v5082_v33  ;;  %v1862_v10 = vadd.f32 1.0, %v5423_v54  ;;  %v1811_v40 = vadd.f32 %v5230_v21, %v5188_v11 }
 0x451   :  { %v3927_v37 = vpop.eup %3926  ;;  %v1821_v51 = vadd.f32 %v1805_v27, %v5453_v16  ;;  %3940 = vtanh.f32 %v1833_v42  ;;  %v2053_v52 = vmul.f32 %v2037_v3, %v5450_v56  ;;  %v2319_v44 = vmul.f32 %v2303_v58, %v5456_v47 }
 0x452   :  { %3942 = vtanh.f32 %v2102_v2  ;;  %v1866_v35 = vadd.f32 1.0, %v3927_v37  ;;  %v5491_v59 = vpop.eup %3928  ;;  %v2055_v23 = vmul.f32 %v2039_v50, %v5469_v45  ;;  %v1823_v39 = vmul.f32 0.7978846, %v1807_v4 }
 0x453   :  { %v1837_v46 = vmul.f32 0.7978846, %v1821_v51  ;;  %v1827_v13 = vmul.f32 0.7978846, %v1811_v40  ;;  %3944 = vtanh.f32 %v2368_v53  ;;  %v2305_v54 = vmul.f32 %v5481_v22, %v5481_v22 }
 0x454   :  { %v1809_v21 = vadd.f32 %v5220_v24, %v5128_v7  ;;  %v1813_v3 = vadd.f32 %v5344_v55, %v5243_v18  ;;  %v2067_v2 = vmul.f32 0.044715, %v2051_v38  ;;  %v1878_v58 = vmul.f32 0.5, %v1862_v10 }
 0x455   :  { %3946 = vtanh.f32 %v1837_v46  ;;  %v1864_v27 = vadd.f32 1.0, %v3923_v48  ;;  %v2069_v42 = vmul.f32 0.044715, %v2053_v52  ;;  %v5500_v51 = vmul.f32 0.044715, %v2317_v62 }
 0x456   :  { %3948 = vtanh.f32 %v1823_v39  ;;  %v1825_v50 = vmul.f32 0.7978846, %v1809_v21  ;;  %v1829_v37 = vmul.f32 0.7978846, %v1813_v3  ;;  %v3931_v4 = vpop.eup %3930  ;;  %v2071_v53 = vmul.f32 0.044715, %v2055_v23 }
 0x457   :  { %v1882_v40 = vmul.f32 0.5, %v1866_v35  ;;  %3950 = vtanh.f32 %v1827_v13  ;;  %v5502_v41 = vmul.f32 0.044715, %v2319_v44  ;;  %v2321_v24 = vmul.f32 %v2305_v54, %v5481_v22 }
 0x458   :  { %3952 = vtanh.f32 %v1825_v50  ;;  %v1854_v55 = vadd.f32 1.0, %v5211_v36  ;;  %v5507_v38 = vmul.f32 %v1878_v58, %v5237_v63  ;;  %v1880_v48 = vmul.f32 0.5, %v1864_v27 }
 0x459   :  { %3954 = vtanh.f32 %v1829_v37  ;;  %v1858_v10 = vadd.f32 1.0, %v5313_v14  ;;  %v3933_v52 = vpop.eup %3932  ;;  %v1868_v62 = vadd.f32 1.0, %v3931_v4  ;;  %v1856_v23 = vadd.f32 1.0, %v5283_v20 }
 0x45a   :  { %v2081_v44 = vadd.f32 %v5358_v60, %v5306_v0  ;;  %v2085_v35 = vadd.f32 %v2069_v42, %v5450_v56  ;;  %v1898_v39 = vmul.f32 %v1882_v40, %v5354_v12  ;;  %v1860_v36 = vadd.f32 1.0, %v5393_v31 }
 0x45b   :  { %v3935_v46 = vpop.eup %3934  ;;  %v2083_v63 = vadd.f32 %v2067_v2, %v5389_v49  ;;  %v2087_v13 = vadd.f32 %v2071_v53, %v5469_v45  ;;  %v1870_v21 = vmul.f32 0.5, %v1854_v55  ;;  %v1874_v60 = vmul.f32 0.5, %v1858_v10 }
 0x45c   :  { %v3937_v54 = vpop.eup %3936  ;;  %v1863_v14 = vadd.f32 1.0, %v3935_v46  ;;  %v2097_v3 = vmul.f32 0.7978846, %v2081_v44  ;;  %v2101_v58 = vmul.f32 0.7978846, %v2085_v35  ;;  %v1884_v12 = vmul.f32 0.5, %v1868_v62 }
 0x45d   :  { %v5518_v20 = vpop.eup %3938  ;;  %v1867_v27 = vadd.f32 1.0, %v3937_v54  ;;  %v2099_v50 = vmul.f32 0.7978846, %v2083_v63  ;;  %v2103_v42 = vmul.f32 0.7978846, %v2087_v13  ;;  %v1872_v40 = vmul.f32 0.5, %v1856_v23 }
 0x45e   :  { %v3941_v37 = vpop.eup %3940  ;;  %v1879_v4 = vmul.f32 0.5, %v1863_v14  ;;  %3956 = vtanh.f32 %v2097_v3  ;;  %v1876_v53 = vmul.f32 0.5, %v1860_v36  ;;  %v5520_v46 = vmul.f32 0.044715, %v2321_v24 }
 0x45f   :  { %v3943_v31 = vpop.eup %3942  ;;  %v1883_v2 = vmul.f32 0.5, %v1867_v27  ;;  %v1865_v26 = vadd.f32 1.0, %v3941_v37  ;;  %3958 = vtanh.f32 %v2101_v58  ;;  %v1906_v55 = vpack.c.bf16 %v1898_v39, %v5507_v38 }
 0x460   :  { %v1896_v44 = vmul.f32 %v1880_v48, %v5267_v43  ;;  %3960 = vtanh.f32 %v2099_v50  ;;  %v5524_v10 = vpop.eup %3944  ;;  %v1895_v35 = vmul.f32 %v1879_v4, %v5303_v32  ;;  %v5529_v23 = vmul.f32 %v1870_v21, %v5062_v17  ;;  %v6707_v21 = vld [vmem:[#allocation61_spill] sm:$0xff] }
 0x461   :  { %v1899_v62 = vmul.f32 %v1883_v2, %v5421_v8  ;;  %3962 = vtanh.f32 %v2103_v42  ;;  %v1881_v36 = vmul.f32 0.5, %v1865_v26  ;;  %v1890_v24 = vmul.f32 %v1874_v60, %v5141_v5  ;;  %v6706_v5 = vld [vmem:[#allocation53_spill] sm:$0xff] }
 0x462   :  { %v3947_v63 = vpop.eup %3946  ;;  %v5533_v13 = vmul.f32 %v1872_v40, %v5091_v29  ;;  %v2073_v43 = vadd.f32 %v5125_v30, %v5085_v25  ;;  %v1900_v32 = vmul.f32 %v1884_v12, %v5385_v1  ;;  %v5539_v8 = vmul.f32 %v1876_v53, %v5170_v19 }
 0x463   :  { %v3949_v38 = vpop.eup %3948  ;;  %v1907_v48 = vpack.c.bf16 %v1899_v62, %v1895_v35  ;;  %v1869_v39 = vadd.f32 1.0, %v3947_v63  ;;  %v2128_v26 = vadd.f32 1.0, %v5428_v57  ;;  %v2132_v14 = vadd.f32 1.0, %v3933_v52  ;;  %v6708_v62 = vld [vmem:[#allocation72_spill] sm:$0xff] }
 0x464   :  { %v3951_v17 = vpop.eup %3950  ;;  %v1855_v54 = vadd.f32 1.0, %v3949_v38  ;;  %v2077_v29 = vadd.f32 %v6707_v21, %v6706_v5  ;;  %v2130_v27 = vadd.f32 1.0, %v5461_v28  ;;  %v2089_v60 = vmul.f32 0.7978846, %v2073_v43  ;;  %v6710_v38 = vld [vmem:[#allocation34_spill] sm:$0xff] }
 0x465   :  { %v3953_v3 = vpop.eup %3952  ;;  %1922 = vmatprep.subr.bf16.mxu0 %v1907_v48  ;;  %v1885_v58 = vmul.f32 0.5, %v1869_v39  ;;  %v1859_v30 = vadd.f32 1.0, %v3951_v17  ;;  %v1897_v1 = vmul.f32 %v1881_v36, %v5375_v6  ;;  %v2134_v2 = vadd.f32 1.0, %v3943_v31  ;;  %v6709_v6 = vld [vmem:[#allocation31_spill] sm:$0xff] }
 0x466   :  { %v3955_v50 = vpop.eup %3954  ;;  %1923 = vmatpush1.bf16.msra.mxu0 %v1906_v55  ;;  %v1871_v19 = vmul.f32 0.5, %v1855_v54  ;;  %v1857_v42 = vadd.f32 1.0, %v3953_v3  ;;  %v2093_v37 = vmul.f32 0.7978846, %v2077_v29  ;;  %3964 = vtanh.f32 %v2089_v60 }
 0x467   :  { %v1901_v57 = vmul.f32 %v1885_v58, %v5453_v16  ;;  %v1875_v52 = vmul.f32 0.5, %v1859_v30  ;;  %v1861_v4 = vadd.f32 1.0, %v3955_v50  ;;  %v2075_v55 = vadd.f32 %v6709_v6, %v6708_v62  ;;  %v6711_v16 = vld [vmem:[#allocation35_spill] sm:$0xff]  ;;  %v6717_v6 = vld [vmem:[#allocation60_spill] sm:$0xff] }
 0x468   :  { %v1887_v12 = vmul.f32 %v1871_v19, %v5082_v33  ;;  %v1873_v40 = vmul.f32 0.5, %v1857_v42  ;;  %3966 = vtanh.f32 %v2093_v37  ;;  %v1908_v63 = vpack.c.bf16 %v1900_v32, %v1896_v44  ;;  %v6714_v37 = vld [vmem:[#allocation82_spill] sm:$0xff] }
 0x469   :  { %v1909_v53 = vpack.c.bf16 %v1901_v57, %v1897_v1  ;;  %v1891_v28 = vmul.f32 %v1875_v52, %v5188_v11  ;;  %v1877_v35 = vmul.f32 0.5, %v1861_v4  ;;  %v2144_v36 = vmul.f32 0.5, %v2128_v26  ;;  %v6713_v1 = vld [vmem:[#allocation9_spill] sm:$0xff]  ;;  %v6715_v52 = vld [vmem:[#allocation70_spill] sm:$0xff] }
 0x46a   :  { %v2148_v43 = vmul.f32 0.5, %v2132_v14  ;;  %v2079_v48 = vadd.f32 %v6711_v16, %v6710_v38  ;;  %v1889_v33 = vmul.f32 %v1873_v40, %v5128_v7  ;;  %v2091_v54 = vmul.f32 0.7978846, %v2075_v55 }
 0x46b   :  { %v3957_v39 = vpop.eup %3956  ;;  %1963 = vmatprep.subr.bf16.mxu1 %v1909_v53  ;;  %v1903_v17 = vpack.c.bf16 %v1891_v28, %v1887_v12  ;;  %v1893_v31 = vmul.f32 %v1877_v35, %v5243_v18  ;;  %v1902_v11 = vpack.c.bf16 %v1890_v24, %v5529_v23  ;;  %v2146_v3 = vmul.f32 0.5, %v2130_v27  ;;  %v6712_v24 = vld [vmem:[#allocation76_spill] sm:$0xff] }
 0x46c   :  { %v3959_v21 = vpop.eup %3958  ;;  %1964 = vmatpush1.bf16.msra.mxu1 %v1908_v63  ;;  %v2129_v29 = vadd.f32 1.0, %v3957_v39  ;;  %v2095_v44 = vmul.f32 0.7978846, %v2079_v48  ;;  %v2150_v58 = vmul.f32 0.5, %v2134_v2  ;;  %3968 = vtanh.f32 %v2091_v54  ;;  %v6716_v12 = vld [vmem:[#allocation8_spill] sm:$0xff] }
 0x46d   :  { %v3961_v32 = vpop.eup %3960  ;;  %1924 = vmatprep.subr.bf16.mxu0 %v1903_v17  ;;  %v1905_v26 = vpack.c.bf16 %v1893_v31, %v1889_v33  ;;  %v2133_v14 = vadd.f32 1.0, %v3959_v21  ;;  %v1904_v7 = vpack.c.bf16 %v5539_v8, %v5533_v13  ;;  %v2160_v27 = vmul.f32 %v2144_v36, %v6712_v24  ;;  %v5569_v53 = vld [vmem:[%s6320_s8] sm:$0x3] }
 0x46e   :  { %v3963_v30 = vpop.eup %3962  ;;  %1925 = vmatpush1.bf16.msra.mxu0 %v1902_v11  ;;  %v2145_v18 = vmul.f32 0.5, %v2129_v29  ;;  %v2131_v60 = vadd.f32 1.0, %v3961_v32  ;;  %3970 = vtanh.f32 %v2095_v44  ;;  %v2164_v19 = vmul.f32 %v2148_v43, %v6713_v1  ;;  %v6719_v54 = vld [vmem:[#allocation32_spill] sm:$0xff] }
 0x46f   :  { %1965 = vmatprep.subr.bf16.mxu1 %v1905_v26  ;;  %v2149_v50 = vmul.f32 0.5, %v2133_v14  ;;  %v2135_v23 = vadd.f32 1.0, %v3963_v30  ;;  %v2162_v57 = vmul.f32 %v2146_v3, %v6714_v37  ;;  %v2124_v4 = vadd.f32 1.0, %v6715_v52  ;;  %v6720_v3 = vld [vmem:[#allocation10_spill] sm:$0xff]  ;;  %v6729_v52 = vld [vmem:[#allocation52_spill] sm:$0xff] }
 0x470   :  { %1966 = vmatpush1.bf16.msra.mxu1 %v1904_v7  ;;  %v2147_v42 = vmul.f32 0.5, %v2131_v60  ;;  %v2347_v40 = vadd.f32 %v5443_v34, %v6716_v12  ;;  %v2161_v13 = vmul.f32 %v2145_v18, %v5306_v0  ;;  %v2166_v28 = vmul.f32 %v2150_v58, %v5401_v9  ;;  %v6721_v26 = vld [vmem:[#allocation62_spill] sm:$0xff]  ;;  %v6722_v58 = vld [vmem:[#allocation71_spill] sm:$0xff]  ;;  %v6724_v18 = vld [vmem:[#allocation81_spill] sm:$0xff] }
 0x471   :  { %v2165_v8 = vmul.f32 %v2149_v50, %v5450_v56  ;;  %v2151_v2 = vmul.f32 0.5, %v2135_v23  ;;  %3747 = vmatmul.mubr.msk.bf16.vlgmr.msra.gmra.mxu0 %vm915_vm4, %v5569_v53  ;;  %v2120_v55 = vadd.f32 1.0, %v6717_v6  ;;  %v2351_v34 = vadd.f32 %v5502_v41, %v5456_v47  ;;  %v6723_v30 = vld [vmem:[#allocation58_spill] sm:$0xff]  ;;  %v6725_v50 = vld [vmem:[#allocation68_spill] sm:$0xff]  ;;  %v6726_v23 = vld [vmem:[#allocation63_spill] sm:$0xff] }
 0x472   :  { %v2163_v35 = vmul.f32 %v2147_v42, %v5389_v49  ;;  %v2363_v0 = vmul.f32 0.7978846, %v2347_v40  ;;  %v6718_v56 = vmov 0   ;;  %v2349_v43 = vadd.f32 %v5500_v51, %v5396_v15  ;;  %v6727_v42 = vld [vmem:[#allocation57_spill] sm:$0xff] }
 0x473   :  { %2208 = vmatprep.mubr.bf16.mxu0 %v6718_v56  ;;  %v2173_v63 = vpack.c.bf16 %v2165_v8, %v2161_v13  ;;  %v2167_v36 = vmul.f32 %v2151_v2, %v5469_v45  ;;  %3748 = vmatmul.mubr.msk.bf16.vlgmr.msra.gmra.mxu1 %vm915_vm4, %v5569_v53  ;;  %v2353_v49 = vadd.f32 %v5520_v46, %v5481_v22  ;;  %v3965_v9 = vpop.eup %3964  ;;  %v2140_v48 = vmul.f32 0.5, %v2124_v4  ;;  %v6730_v8 = vld [vmem:[#allocation33_spill] sm:$0xff] }
 0x474   :  { %v2172_v16 = vpack.c.bf16 %v2164_v19, %v2160_v27  ;;  %v2367_v39 = vmul.f32 0.7978846, %v2351_v34  ;;  %3972 = vtanh.f32 %v2363_v0  ;;  %2249 = vmatprep.mubr.bf16.mxu1 %v6718_v56  ;;  %v2121_v45 = vadd.f32 1.0, %v3965_v9  ;;  %v6732_v9 = vld [vmem:[#allocation83_spill] sm:$0xff] }
 0x475   :  { %v3967_v41 = vpop.eup %3966  ;;  %2188 = vmatprep.subr.bf16.mxu0 %v2173_v63  ;;  %v2175_v17 = vpack.c.bf16 %v2167_v36, %v2163_v35  ;;  %v2365_v33 = vmul.f32 0.7978846, %v2349_v43  ;;  %v2369_v31 = vmul.f32 0.7978846, %v2353_v49  ;;  %v2327_v21 = vmul.f32 0.044715, %v6719_v54 }
 0x476   :  { %2189 = vmatpush1.bf16.msra.mxu0 %v2172_v16  ;;  %v2174_v51 = vpack.c.bf16 %v2166_v28, %v2162_v57  ;;  %v2125_v11 = vadd.f32 1.0, %v3967_v41  ;;  %3974 = vtanh.f32 %v2367_v39  ;;  %v2137_v46 = vmul.f32 0.5, %v2121_v45  ;;  %v6728_v57 = vld [vmem:[#allocation77_spill] sm:$0xff]  ;;  %v6734_v54 = vld [vmem:[#allocation86_spill] sm:$0xff] }
 0x477   :  { %2229 = vmatprep.subr.bf16.mxu1 %v2175_v17  ;;  %v2136_v29 = vmul.f32 0.5, %v2120_v55  ;;  %v2126_v44 = vadd.f32 1.0, %v6720_v3  ;;  %3976 = vtanh.f32 %v2365_v33  ;;  %v2122_v14 = vadd.f32 1.0, %v6721_v26  ;;  %v6733_v33 = vld [vmem:[#allocation66_spill] sm:$0xff] }
 0x478   :  { %2230 = vmatpush1.bf16.msra.mxu1 %v2174_v51  ;;  %v2141_v32 = vmul.f32 0.5, %v2125_v11  ;;  %3978 = vtanh.f32 %v2369_v31  ;;  %v2329_v7 = vmul.f32 0.044715, %v6723_v30  ;;  %v2156_v60 = vmul.f32 %v2140_v48, %v6724_v18 }
 0x479   :  { %3980 = vtanh.f32 %v6722_v58  ;;  %v2339_v24 = vadd.f32 %v6726_v23, %v6725_v50  ;;  %v3969_v27 = vpop.eup %3968  ;;  %v2153_v1 = vmul.f32 %v2137_v46, %v5085_v25  ;;  %v2343_v37 = vadd.f32 %v2327_v21, %v6727_v42  ;;  %v6731_v25 = vld [vmem:[#allocation85_spill] sm:$0xff] }
 0x47a   :  { %v2157_v19 = vmul.f32 %v2141_v32, %v6706_v5  ;;  %v2341_v4 = vadd.f32 %v6729_v52, %v6728_v57  ;;  %v2123_v13 = vadd.f32 1.0, %v3969_v27  ;;  %v2152_v2 = vmul.f32 %v2136_v29, %v6730_v8  ;;  %v6735_v27 = vld [vmem:[#allocation55_spill] sm:$0xff]  ;;  %v6736_v52 = vld [vmem:[#allocation56_spill] sm:$0xff]  ;;  %v6738_v8 = vld [vmem:[#allocation74_spill] sm:$0xff] }
 0x47b   :  { %v3971_v40 = vpop.eup %3970  ;;  %v2142_v28 = vmul.f32 0.5, %v2126_v44  ;;  %v2355_v35 = vmul.f32 0.7978846, %v2339_v24  ;;  %v2138_v34 = vmul.f32 0.5, %v2122_v14  ;;  %v2359_v0 = vmul.f32 0.7978846, %v2343_v37 }
 0x47c   :  { %v2169_v6 = vpack.c.bf16 %v2157_v19, %v2153_v1  ;;  %v2127_v55 = vadd.f32 1.0, %v3971_v40  ;;  %v2139_v63 = vmul.f32 0.5, %v2123_v13  ;;  %v2168_v36 = vpack.c.bf16 %v2156_v60, %v2152_v2  ;;  %v6737_v40 = vld [vmem:[#allocation11_spill] sm:$0xff] }
 0x47d   :  { %3982 = vtanh.f32 %v2355_v35  ;;  %v2345_v5 = vadd.f32 %v2329_v7, %v6731_v25  ;;  %v2357_v49 = vmul.f32 0.7978846, %v2341_v4  ;;  %v2158_v16 = vmul.f32 %v2142_v28, %v6732_v9 }
 0x47e   :  { %2190 = vmatprep.subr.bf16.mxu0 %v2169_v6  ;;  %v2143_v43 = vmul.f32 0.5, %v2127_v55  ;;  %3984 = vtanh.f32 %v2359_v0  ;;  %v2398_v48 = vadd.f32 1.0, %v5518_v20  ;;  %v2155_v41 = vmul.f32 %v2139_v63, %v6708_v62 }
 0x47f   :  { %2191 = vmatpush1.bf16.msra.mxu0 %v2168_v36  ;;  %v2361_v39 = vmul.f32 0.7978846, %v2345_v5  ;;  %3986 = vtanh.f32 %v2357_v49  ;;  %v2154_v31 = vmul.f32 %v2138_v34, %v6733_v33  ;;  %v2394_v21 = vadd.f32 1.0, %v6734_v54  ;;  %v6739_v34 = vld [vmem:[#allocation67_spill] sm:$0xff]  ;;  %v6740_v49 = vld [vmem:[#allocation84_spill] sm:$0xff] }
 0x480   :  { %v2159_v17 = vmul.f32 %v2143_v43, %v6710_v38  ;;  %v2400_v51 = vadd.f32 1.0, %v5524_v10  ;;  %v2414_v3 = vmul.f32 0.5, %v2398_v48  ;;  %v2396_v62 = vadd.f32 1.0, %v5491_v59 }
 0x481   :  { %v3973_v45 = vpop.eup %3972  ;;  %3988 = vtanh.f32 %v2361_v39  ;;  %v2170_v29 = vpack.c.bf16 %v2158_v16, %v2154_v31  ;;  %v2410_v14 = vmul.f32 0.5, %v2394_v21  ;;  %v2390_v59 = vadd.f32 1.0, %v6735_v27  ;;  %v6741_v31 = vld [vmem:[#allocation73_spill] sm:$0xff] }
 0x482   :  { %v2171_v11 = vpack.c.bf16 %v2159_v17, %v2155_v41  ;;  %v2395_v46 = vadd.f32 1.0, %v3973_v45  ;;  %3749 = vmatmul.mubr.msk.bf16.vlgmr.msra.gmra.mxu0 %vm915_vm4, %v5569_v53  ;;  %v2416_v58 = vmul.f32 0.5, %v2400_v51  ;;  %v2430_v23 = vmul.f32 %v2414_v3, %v5379_v61 }
 0x483   :  { %v3975_v20 = vpop.eup %3974  ;;  %2474 = vmatprep.mubr.bf16.mxu0 %v6718_v56  ;;  %v2412_v24 = vmul.f32 0.5, %v2396_v62  ;;  %v2426_v4 = vmul.f32 %v2410_v14, %v6736_v52  ;;  %v2386_v2 = vadd.f32 1.0, %v6738_v8  ;;  %v2406_v36 = vmul.f32 0.5, %v2390_v59  ;;  %v6744_v14 = vld [vmem:[#allocation59_spill] sm:$0xff] }
 0x484   :  { %v3977_v38 = vpop.eup %3976  ;;  %2231 = vmatprep.subr.bf16.mxu1 %v2171_v11  ;;  %v2399_v44 = vadd.f32 1.0, %v3975_v20  ;;  %v2411_v32 = vmul.f32 0.5, %v2395_v46  ;;  %v2432_v13 = vmul.f32 %v2416_v58, %v6737_v40  ;;  %v2388_v9 = vadd.f32 1.0, %v6740_v49 }
 0x485   :  { %v3979_v26 = vpop.eup %3978  ;;  %2232 = vmatpush1.bf16.msra.mxu1 %v2170_v29  ;;  %v2397_v10 = vadd.f32 1.0, %v3977_v38  ;;  %v2438_v55 = vpack.c.bf16 %v2430_v23, %v2426_v4  ;;  %v2428_v0 = vmul.f32 %v2412_v24, %v6739_v34  ;;  %v2402_v41 = vmul.f32 0.5, %v2386_v2  ;;  %v6742_v29 = vld [vmem:[#allocation80_spill] sm:$0xff]  ;;  %v6743_v38 = vld [vmem:[#allocation69_spill] sm:$0xff] }
 0x486   :  { %v3981_v30 = vpop.eup %3980  ;;  %v2415_v7 = vmul.f32 0.5, %v2399_v44  ;;  %v2401_v18 = vadd.f32 1.0, %v3979_v26  ;;  %v2427_v1 = vmul.f32 %v2411_v32, %v6716_v12  ;;  %v2422_v54 = vmul.f32 %v2406_v36, %v6741_v31  ;;  %v6745_v31 = vld [vmem:[#allocation75_spill] sm:$0xff] }
 0x487   :  { %v2413_v60 = vmul.f32 0.5, %v2397_v10  ;;  %v2392_v6 = vadd.f32 1.0, %v3981_v30  ;;  %v2440_v48 = vpack.c.bf16 %v2432_v13, %v2428_v0  ;;  %v2404_v46 = vmul.f32 0.5, %v2388_v9 }
 0x488   :  { %v2431_v19 = vmul.f32 %v2415_v7, %v5456_v47  ;;  %v2417_v37 = vmul.f32 0.5, %v2401_v18  ;;  %3750 = vmatmul.mubr.msk.bf16.vlgmr.msra.gmra.mxu1 %vm915_vm4, %v5569_v53  ;;  %v2418_v3 = vmul.f32 %v2402_v41, %v6742_v29  ;;  %v2528_v13 = vstv %s3739_s16 }
 0x489   :  { %2515 = vmatprep.mubr.bf16.mxu1 %v6718_v56  ;;  %v2429_v35 = vmul.f32 %v2413_v60, %v5396_v15  ;;  %v2408_v45 = vmul.f32 0.5, %v2392_v6  ;;  %v2420_v58 = vmul.f32 %v2404_v46, %v6744_v14 }
 0x48a   :  { %v3983_v61 = vpop.eup %3982  ;;  %v2439_v28 = vpack.c.bf16 %v2431_v19, %v2427_v1  ;;  %v2433_v12 = vmul.f32 %v2417_v37, %v5481_v22  ;;  %v2434_v10 = vpack.c.bf16 %v2422_v54, %v2418_v3 }
 0x48b   :  { %v3985_v47 = vpop.eup %3984  ;;  %v2387_v63 = vadd.f32 1.0, %v3983_v61  ;;  %v2424_v44 = vmul.f32 %v2408_v45, %v6743_v38 }
 0x48c   :  { %2454 = vmatprep.subr.bf16.mxu0 %v2439_v28  ;;  %v2441_v5 = vpack.c.bf16 %v2433_v12, %v2429_v35  ;;  %v2391_v43 = vadd.f32 1.0, %v3985_v47  ;;  %v3987_v16 = vpop.eup %3986  ;;  %v2541_v28 = vstv %s3740_s3 }
 0x48d   :  { %2455 = vmatpush1.bf16.msra.mxu0 %v2438_v55  ;;  %v2403_v39 = vmul.f32 0.5, %v2387_v63  ;;  %v2389_v17 = vadd.f32 1.0, %v3987_v16  ;;  %v2554_v16 = vstv %s3734_s4 }
 0x48e   :  { %v3989_v15 = vpop.eup %3988  ;;  %2495 = vmatprep.subr.bf16.mxu1 %v2441_v5  ;;  %v2407_v22 = vmul.f32 0.5, %v2391_v43 }
 0x48f   :  { %2496 = vmatpush1.bf16.msra.mxu1 %v2440_v48  ;;  %v2393_v33 = vadd.f32 1.0, %v3989_v15  ;;  %v2419_v21 = vmul.f32 %v2403_v39, %v6725_v50  ;;  %v2405_v11 = vmul.f32 0.5, %v2389_v17  ;;  %v2436_v50 = vpack.c.bf16 %v2424_v44, %v2420_v58 }
 0x490   :  { %v2423_v51 = vmul.f32 %v2407_v22, %v6727_v42  ;;  %v2563_v44 = vstv %s5641_s17  ;;  %v2573_v58 = vstv %s5643_s18 }
 0x491   :  { %v2409_v20 = vmul.f32 0.5, %v2393_v33  ;;  %v2421_v32 = vmul.f32 %v2405_v11, %v6728_v57 }
 0x492   :  { %v2435_v62 = vpack.c.bf16 %v2423_v51, %v2419_v21 }
 0x493   :  { %v2425_v26 = vmul.f32 %v2409_v20, %v6731_v25 }
 0x494   :  { %2456 = vmatprep.subr.bf16.mxu0 %v2435_v62 }
 0x495   :  { %v2437_v30 = vpack.c.bf16 %v2425_v26, %v2421_v32  ;;  %2457 = vmatpush1.bf16.msra.mxu0 %v2434_v10  ;;  %v6746_v26 = vld [vmem:[#allocation54_spill] sm:$0xff] }
 0x497   :  { %2497 = vmatprep.subr.bf16.mxu1 %v2437_v30 }
 0x498   :  { %2498 = vmatpush1.bf16.msra.mxu1 %v2436_v50  ;;  %3751 = vmatmul.mubr.msk.bf16.vlgmr.msra.gmra.mxu0 %vm915_vm4, %v5569_v53 }
 0x499   :  { %2637 = vmatprep.mubr.bf16.mxu0 %v6718_v56 }
 0x49b   :  { %3752 = vmatmul.mubr.msk.bf16.vlgmr.msra.gmra.mxu1 %vm915_vm4, %v5569_v53 }
 0x49c   :  { %2690 = vmatprep.mubr.bf16.mxu1 %v6718_v56 }
 0x531   :  { %v1944_v42 = vpop.f32.mrf.mxu0 }
 0x533   :  { %v1985_v57 = vpop.f32.mrf.mxu1  ;;  %v1946_v25 = vpop.f32.mrf.mxu0 }
 0x535   :  { %v1987_v7 = vpop.f32.mrf.mxu1  ;;  %v1948_v18 = vpop.f32.mrf.mxu0 }
 0x536   :  { %v6748_v18 = vld [vmem:[#allocation65_spill] sm:$0xff] }
 0x537   :  { %v1989_v60 = vpop.f32.mrf.mxu1  ;;  %v1949_v23 = vpop.f32.mrf.mxu0 }
 0x539   :  { %v1990_v24 = vpop.f32.mrf.mxu1 }
 0x542   :  { %v2210_v27 = vpop.f32.mrf.mxu0 }
 0x543   :  { %v2524_v53 = vsub.f32 %v1944_v42, %v2210_v27  ;;  %v2568_v42 = vstv %s3736_s19 }
 0x544   :  { %v2212_v59 = vpop.f32.mrf.mxu0 }
 0x545   :  { %v2525_v8 = vsub.f32 %v1946_v25, %v2212_v59  ;;  %v2529_v35 = vmul.f32 %v2528_v13, %v2524_v53 }
 0x546   :  { %v2214_v1 = vpop.f32.mrf.mxu0 }
 0x547   :  { %v2530_v63 = vmul.f32 %v2528_v13, %v2525_v8  ;;  %v6749_v1 = vld [vmem:[#allocation79_spill] sm:$0xff] }
 0x548   :  { %v2251_v19 = vpop.f32.mrf.mxu1  ;;  %v2215_v37 = vpop.f32.mrf.mxu0 }
 0x549   :  { %v2526_v2 = vsub.f32 %v1985_v57, %v2251_v19  ;;  %v6747_v57 = vld [vmem:[#allocation64_spill] sm:$0xff] }
 0x54a   :  { %v2253_v52 = vpop.f32.mrf.mxu1 }
 0x54b   :  { %v2527_v6 = vsub.f32 %v1987_v7, %v2253_v52  ;;  %v2531_v5 = vmul.f32 %v2528_v13, %v2526_v2 }
 0x54c   :  { %v2255_v4 = vpop.f32.mrf.mxu1 }
 0x54d   :  { %v2532_v17 = vmul.f32 %v2528_v13, %v2527_v6 }
 0x54e   :  { %v2256_v40 = vpop.f32.mrf.mxu1 }
 0x558   :  { %v2476_v61 = vpop.f32.mrf.mxu0 }
 0x559   :  { %v2537_v12 = vsub.f32 %v2210_v27, %v2476_v61  ;;  %v2533_v55 = vadd.f32 %v2529_v35, %v2476_v61 }
 0x55a   :  { %v2478_v47 = vpop.f32.mrf.mxu0 }
 0x55b   :  { %v2542_v34 = vmul.f32 %v2541_v28, %v2537_v12  ;;  %v2517_v0 = vpop.f32.mrf.mxu1  ;;  %v2538_v36 = vsub.f32 %v2212_v59, %v2478_v47  ;;  %v2534_v48 = vadd.f32 %v2530_v63, %v2478_v47 }
 0x55c   :  { %v2539_v43 = vsub.f32 %v2251_v19, %v2517_v0  ;;  %v2480_v49 = vpop.f32.mrf.mxu0  ;;  %v2535_v15 = vadd.f32 %v2531_v5, %v2517_v0  ;;  %v4090_v5 = vld [vmem:[%s6318_s6 + $0x8] sm:$0xff]  }
 0x55d   :  { %v2546_v9 = vadd.f32 %v2542_v34, %v2533_v55  ;;  %v2543_v39 = vmul.f32 %v2541_v28, %v2538_v36  ;;  %v2519_v41 = vpop.f32.mrf.mxu1  ;;  %v4089_v36 = vld [vmem:[%s6318_s6] sm:$0xff]   ;;  %v5689_v49 = vstv %s3757_s21 }
 0x55e   :  { %v2544_v22 = vmul.f32 %v2541_v28, %v2539_v43  ;;  %v2540_v45 = vsub.f32 %v2253_v52, %v2519_v41  ;;  %v2481_v33 = vpop.f32.mrf.mxu0  ;;  %v2536_v46 = vadd.f32 %v2532_v17, %v2519_v41  ;;  %v6756_v41 = vld [vmem:[#allocation20_spill] sm:$0xff] }
 0x55f   :  { %v2550_v54 = vadd.f32 %v2546_v9, %v6745_v31  ;;  %v2547_v21 = vadd.f32 %v2543_v39, %v2534_v48  ;;  %v2521_v51 = vpop.f32.mrf.mxu1  ;;  %v6754_v9 = vld [vmem:[#allocation13_spill] sm:$0xff]  ;;  %v6755_v48 = vld [vmem:[#allocation14_spill] sm:$0xff] }
 0x560   :  { %v2548_v11 = vadd.f32 %v2544_v22, %v2535_v15  ;;  %v2545_v20 = vmul.f32 %v2541_v28, %v2540_v45 }
 0x561   :  { %v2555_v29 = vmul.f32 %v2554_v16, %v2550_v54  ;;  %v2551_v3 = vadd.f32 %v2547_v21, %v6745_v31  ;;  %v2522_v62 = vpop.f32.mrf.mxu1  ;;  %v2574_v24 = vmul.f32 %v2573_v58, %v2550_v54  ;;  %v6759_v21 = vld [vmem:[#allocation17_spill] sm:$0xff] }
 0x562   :  { %v2552_v38 = vadd.f32 %v2548_v11, %v6745_v31  ;;  %v2549_v32 = vadd.f32 %v2545_v20, %v2536_v46  ;;  %v6760_v11 = vld [vmem:[#allocation15_spill] sm:$0xff]  ;;  %v6761_v20 = vld [vmem:[#allocation16_spill] sm:$0xff] }
 0x563   :  { %v2559_v10 = vsub.f32 %v6746_v26, %v2555_v29  ;;  %v2556_v14 = vmul.f32 %v2554_v16, %v2551_v3  ;;  %v2575_v52 = vmul.f32 %v2573_v58, %v2551_v3 }
 0x564   :  { %v2557_v30 = vmul.f32 %v2554_v16, %v2552_v38  ;;  %v2553_v50 = vadd.f32 %v2549_v32, %v6745_v31  ;;  %v2576_v53 = vmul.f32 %v2573_v58, %v2552_v38  ;;  %v6800_v31 = vld [vmem:[#allocation39_spill] sm:$0xff] }
 0x565   :  { %v2560_v25 = vsub.f32 %v6747_v57, %v2556_v14  ;;  %v2564_v7 = vmul.f32 %v2563_v44, %v2559_v10  ;;  %v6764_v14 = vld [vmem:[#allocation18_spill] sm:$0xff] }
 0x566   :  { %v2561_v60 = vsub.f32 %v6748_v18, %v2557_v30  ;;  %v2558_v23 = vmul.f32 %v2554_v16, %v2553_v50  ;;  %v2577_v28 = vmul.f32 %v2573_v58, %v2553_v50 }
 0x567   :  { %v2565_v27 = vmul.f32 %v2563_v44, %v2560_v25  ;;  %v2569_v59 = vmul.f32 %v2568_v42, %v2564_v7 }
 0x568   :  { %v2562_v19 = vsub.f32 %v6749_v1, %v2558_v23  ;;  %v2566_v37 = vmul.f32 %v2563_v44, %v2561_v60 }
 0x569   :  { %v2570_v4 = vmul.f32 %v2568_v42, %v2565_v27  ;;  %v5655_v40 = vadd.f32 %v2574_v24, %v2569_v59 }
 0x56a   :  { %v2567_v13 = vmul.f32 %v2563_v44, %v2562_v19  ;;  %v2571_v8 = vmul.f32 %v2568_v42, %v2566_v37 }
 0x56b   :  { %6750 = vst [vmem:[#allocation53_spill] sm:$0xff] %v5655_v40  ;;  %v5657_v2 = vadd.f32 %v2575_v52, %v2570_v4  ;;  %v2589_v61 = vpack.c.bf16 %v5655_v40, %v5655_v40 }
 0x56c   :  { %v2572_v35 = vmul.f32 %v2568_v42, %v2567_v13  ;;  %v5661_v12 = vadd.f32 %v2576_v53, %v2571_v8 }
 0x56d   :  { %6751 = vst [vmem:[#allocation61_spill] sm:$0xff] %v5657_v2  ;;  %v2590_v6 = vpack.c.bf16 %v5657_v2, %v5657_v2  ;;  %v2594_v34 = vsel %vm114_vm1, %v2589_v61, 0 }
 0x56e   :  { %6752 = vst [vmem:[#allocation72_spill] sm:$0xff] %v5661_v12  ;;  %v5665_v47 = vadd.f32 %v2577_v28, %v2572_v35  ;;  %v2591_v55 = vpack.c.bf16 %v5661_v12, %v5661_v12 }
 0x56f   :  { %3760 = vmatprep.subr.msk.bf16.mxu0 %vm114_vm1, %v2590_v6 }
 0x570   :  { %6753 = vst [vmem:[#allocation31_spill] sm:$0xff] %v5665_v47  ;;  %v2592_v0 = vpack.c.bf16 %v5665_v47, %v5665_v47  ;;  %2620 = vmatpush1.bf16.msra.mxu0 %v2594_v34  ;;  %v2600_v63 = vsel %vm114_vm1, %v2591_v55, 0  ;;  %v6765_v34 = vld [vmem:[#allocation19_spill] sm:$0xff] }
 0x572   :  { %3763 = vmatprep.subr.msk.bf16.mxu1 %vm114_vm1, %v2592_v0 }
 0x573   :  { %2673 = vmatpush1.bf16.msra.mxu1 %v2600_v63  ;;  %3761 = vmatmul.mubr.msk.bf16.vlgmr.msra.gmra.mxu0 %vm368_vm3, %v4089_v36 }
 0x574   :  { %2647 = vmatprep.mubr.bf16.mxu0 %v6718_v56 }
 0x576   :  { %3764 = vmatmul.mubr.msk.bf16.vlgmr.msra.gmra.mxu1 %vm368_vm3, %v4089_v36 }
 0x577   :  { %2700 = vmatprep.mubr.bf16.mxu1 %v6718_v56 }
 0x57b   :  { %3762 = vmatmul.mubr.msk.bf16.gmra.mxu0 %vm368_vm3, %v4090_v5 }
 0x57c   :  { %2928 = vmatprep.mubr.bf16.mxu0 %v6718_v56 }
 0x57e   :  { %3765 = vmatmul.mubr.msk.bf16.gmra.mxu1 %vm368_vm3, %v4090_v5 }
 0x57f   :  { %2969 = vmatprep.mubr.bf16.mxu1 %v6718_v56 }
 0x633   :  { %v2639_v43 = vpop.f32.mrf.mxu0 }
 0x634   :  { %v2711_v16 = vadd.f32 %v2639_v43, %v6754_v9  ;;  %v2978_v39 = vadd.f32 %v2639_v43, %v6755_v48  ;;  %v3244_v15 = vadd.f32 %v2639_v43, %v6756_v41 }
 0x635   :  { %v2641_v22 = vpop.f32.mrf.mxu0 }
 0x636   :  { %v5695_v17 = vadd.f32 %v5689_v49, %v2711_v16  ;;  %v5698_v45 = vadd.f32 %v2978_v39, %v5689_v49  ;;  %v5701_v33 = vadd.f32 %v3244_v15, %v5689_v49  ;;  %v2692_v54 = vpop.f32.mrf.mxu1  ;;  %v2712_v51 = vadd.f32 %v2641_v22, %v6759_v21  ;;  %v6767_v39 = vld [vmem:[#allocation21_spill] sm:$0xff]  ;;  %v6769_v21 = vld [vmem:[#allocation23_spill] sm:$0xff] }
 0x637   :  { %v2713_v46 = vadd.f32 %v2692_v54, %v6760_v11  ;;  %v2980_v29 = vadd.f32 %v2692_v54, %v6761_v20  ;;  %v3246_v3 = vadd.f32 %v2692_v54, %v6756_v41  ;;  %v2979_v58 = vadd.f32 %v2641_v22, %v6764_v14  ;;  %v2643_v63 = vpop.f32.mrf.mxu0 }
 0x638   :  { %6757 = vst [vmem:[#allocation34_spill] sm:$0xff] %v5698_v45  ;;  %6758 = vst [vmem:[#allocation35_spill] sm:$0xff] %v5701_v33  ;;  %v2744_v62 = vmul.f32 %v5695_v17, %v5695_v17  ;;  %v3010_v38 = vmul.f32 %v5698_v45, %v5698_v45  ;;  %v3276_v44 = vmul.f32 %v5701_v33, %v5701_v33  ;;  %v2694_v53 = vpop.f32.mrf.mxu1 }
 0x639   :  { %v5714_v32 = vadd.f32 %v5689_v49, %v2713_v46  ;;  %v5717_v26 = vadd.f32 %v2980_v29, %v5689_v49  ;;  %v5720_v10 = vadd.f32 %v3246_v3, %v5689_v49  ;;  %v5727_v57 = vadd.f32 %v5689_v49, %v2712_v51 }
 0x63a   :  { %v2760_v30 = vmul.f32 %v2744_v62, %v5695_v17  ;;  %v3026_v50 = vmul.f32 %v3010_v38, %v5698_v45  ;;  %v3292_v42 = vmul.f32 %v3276_v44, %v5701_v33  ;;  %v5738_v59 = vadd.f32 %v2979_v58, %v5689_v49  ;;  %v2696_v29 = vpop.f32.mrf.mxu1 }
 0x63b   :  { %6762 = vst [vmem:[#allocation76_spill] sm:$0xff] %v5717_v26  ;;  %6763 = vst [vmem:[#allocation9_spill] sm:$0xff] %v5720_v10  ;;  %v2746_v25 = vmul.f32 %v5714_v32, %v5714_v32  ;;  %v3012_v7 = vmul.f32 %v5717_v26, %v5717_v26  ;;  %v3278_v18 = vmul.f32 %v5720_v10, %v5720_v10 }
 0x63c   :  { %v2776_v60 = vmul.f32 0.044715, %v2760_v30  ;;  %v3042_v23 = vmul.f32 0.044715, %v3026_v50  ;;  %v3308_v19 = vmul.f32 0.044715, %v3292_v42  ;;  %v2745_v37 = vmul.f32 %v5727_v57, %v5727_v57 }
 0x63d   :  { %v2762_v24 = vmul.f32 %v2746_v25, %v5714_v32  ;;  %v3028_v27 = vmul.f32 %v3012_v7, %v5717_v26  ;;  %v3294_v4 = vmul.f32 %v3278_v18, %v5720_v10  ;;  %v3245_v61 = vadd.f32 %v2641_v22, %v6756_v41  ;;  %v6768_v22 = vld [vmem:[#allocation22_spill] sm:$0xff]  ;;  %v6771_v30 = vld [vmem:[#allocation51_spill] sm:$0xff]  ;;  %v6773_v18 = vld [vmem:[#allocation24_spill] sm:$0xff] }
 0x63e   :  { %v2792_v1 = vadd.f32 %v2776_v60, %v5695_v17  ;;  %v3058_v52 = vadd.f32 %v3042_v23, %v5698_v45  ;;  %v3011_v28 = vmul.f32 %v5738_v59, %v5738_v59  ;;  %v3324_v6 = vadd.f32 %v3308_v19, %v5701_v33  ;;  %v2645_v23 = vpop.f32.mrf.mxu0 }
 0x63f   :  { %v2778_v13 = vmul.f32 0.044715, %v2762_v24  ;;  %v3044_v8 = vmul.f32 0.044715, %v3028_v27  ;;  %v2761_v55 = vmul.f32 %v2745_v37, %v5727_v57  ;;  %v2714_v0 = vadd.f32 %v2694_v53, %v6765_v34 }
 0x640   :  { %v2808_v35 = vmul.f32 0.7978846, %v2792_v1  ;;  %v3074_v36 = vmul.f32 0.7978846, %v3058_v52  ;;  %v3310_v5 = vmul.f32 0.044715, %v3294_v4  ;;  %v5754_v16 = vadd.f32 %v3245_v61, %v5689_v49 }
 0x641   :  { %v2794_v43 = vadd.f32 %v2778_v13, %v5714_v32  ;;  %v3060_v9 = vadd.f32 %v3044_v8, %v5717_v26  ;;  %v5757_v48 = vmul.f32 %v3011_v28, %v5738_v59  ;;  %v2981_v15 = vadd.f32 %v2694_v53, %v6767_v39  ;;  %v6775_v1 = vld [vmem:[#allocation25_spill] sm:$0xff] }
 0x642   :  { %6766 = vst [vmem:[#allocation82_spill] sm:$0xff] %v5754_v16  ;;  %v2715_v54 = vadd.f32 %v2643_v63, %v6768_v22  ;;  %v2982_v51 = vadd.f32 %v2643_v63, %v6769_v21  ;;  %3990 = vtanh.f32 %v2808_v35  ;;  %v3340_v11 = vmul.f32 0.7978846, %v3324_v6  ;;  %v6778_v6 = vld [vmem:[#allocation26_spill] sm:$0xff]  ;;  %v6780_v22 = vld [vmem:[#allocation27_spill] sm:$0xff] }
 0x643   :  { %v5762_v46 = vmul.f32 0.044715, %v2761_v55  ;;  %v5765_v20 = vadd.f32 %v5689_v49, %v2714_v0  ;;  %3992 = vtanh.f32 %v3074_v36  ;;  %v3326_v3 = vadd.f32 %v3310_v5, %v5720_v10 }
 0x644   :  { %v5769_v62 = vadd.f32 %v5689_v49, %v2715_v54  ;;  %v5772_v38 = vadd.f32 %v2982_v51, %v5689_v49  ;;  %v2810_v44 = vmul.f32 0.7978846, %v2794_v43  ;;  %v3076_v14 = vmul.f32 0.7978846, %v3060_v9 }
 0x645   :  { %v3277_v58 = vmul.f32 %v5754_v16, %v5754_v16  ;;  %v3248_v50 = vadd.f32 %v2643_v63, %v6771_v30  ;;  %v5778_v42 = vadd.f32 %v2981_v15, %v5689_v49  ;;  %v2717_v60 = vadd.f32 %v2696_v29, %v6773_v18 }
 0x646   :  { %6770 = vst [vmem:[#allocation70_spill] sm:$0xff] %v5772_v38  ;;  %v2748_v25 = vmul.f32 %v5769_v62, %v5769_v62  ;;  %v3014_v7 = vmul.f32 %v5772_v38, %v5772_v38  ;;  %v2747_v24 = vmul.f32 %v5765_v20, %v5765_v20  ;;  %v2984_v19 = vadd.f32 %v2696_v29, %v6775_v1 }
 0x647   :  { %6772 = vst [vmem:[#allocation8_spill] sm:$0xff] %v5778_v42  ;;  %v5788_v27 = vadd.f32 %v3248_v50, %v5689_v49  ;;  %v3250_v37 = vadd.f32 %v2696_v29, %v6771_v30  ;;  %v3247_v52 = vadd.f32 %v2694_v53, %v6756_v41  ;;  %v5796_v8 = vadd.f32 %v5689_v49, %v2717_v60 }
 0x648   :  { %v2764_v4 = vmul.f32 %v2748_v25, %v5769_v62  ;;  %v3030_v13 = vmul.f32 %v3014_v7, %v5772_v38  ;;  %v5801_v28 = vadd.f32 %v2984_v19, %v5689_v49  ;;  %v2716_v55 = vadd.f32 %v2645_v23, %v6778_v6 }
 0x649   :  { %6774 = vst [vmem:[#allocation60_spill] sm:$0xff] %v5788_v27  ;;  %v3280_v61 = vmul.f32 %v5788_v27, %v5788_v27  ;;  %v5804_v35 = vadd.f32 %v3250_v37, %v5689_v49  ;;  %v3013_v41 = vmul.f32 %v5778_v42, %v5778_v42  ;;  %v2750_v0 = vmul.f32 %v5796_v8, %v5796_v8 }
 0x64a   :  { %6776 = vst [vmem:[#allocation32_spill] sm:$0xff] %v5801_v28  ;;  %v2780_v53 = vmul.f32 0.044715, %v2764_v4  ;;  %v3046_v34 = vmul.f32 0.044715, %v3030_v13  ;;  %v3016_v36 = vmul.f32 %v5801_v28, %v5801_v28  ;;  %v5817_v43 = vadd.f32 %v5689_v49, %v2716_v55 }
 0x64b   :  { %6777 = vst [vmem:[#allocation10_spill] sm:$0xff] %v5804_v35  ;;  %v3296_v63 = vmul.f32 %v3280_v61, %v5788_v27  ;;  %v3282_v5 = vmul.f32 %v5804_v35, %v5804_v35  ;;  %v5820_v9 = vadd.f32 %v3247_v52, %v5689_v49  ;;  %v2766_v15 = vmul.f32 %v2750_v0, %v5796_v8  ;;  %v2698_v61 = vpop.f32.mrf.mxu1 }
 0x64c   :  { %v2796_v39 = vadd.f32 %v2780_v53, %v5769_v62  ;;  %v2983_v54 = vadd.f32 %v2645_v23, %v6780_v22  ;;  %v3342_v21 = vmul.f32 0.7978846, %v3326_v3  ;;  %v3062_v51 = vadd.f32 %v3046_v34, %v5772_v38  ;;  %v2649_v53 = vpop.f32.mrf.mxu0 }
 0x64d   :  { %6779 = vst [vmem:[#allocation62_spill] sm:$0xff] %v5820_v9  ;;  %v3312_v29 = vmul.f32 0.044715, %v3296_v63  ;;  %v3032_v50 = vmul.f32 %v3016_v36, %v5801_v28  ;;  %3994 = vtanh.f32 %v3340_v11  ;;  %v2782_v25 = vmul.f32 0.044715, %v2766_v15  ;;  %v6785_v15 = vld [vmem:[#allocation28_spill] sm:$0xff] }
 0x64e   :  { %v3298_v7 = vmul.f32 %v3282_v5, %v5804_v35  ;;  %v2749_v18 = vmul.f32 %v5817_v43, %v5817_v43  ;;  %3996 = vtanh.f32 %v2810_v44  ;;  %v3293_v60 = vmul.f32 %v3277_v58, %v5754_v16 }
 0x64f   :  { %v2763_v1 = vmul.f32 %v2747_v24, %v5765_v20  ;;  %v5833_v19 = vadd.f32 %v2983_v54, %v5689_v49  ;;  %v5835_v3 = vpop.eup %3990  ;;  %v3029_v37 = vmul.f32 %v3013_v41, %v5778_v42  ;;  %v3279_v11 = vmul.f32 %v5820_v9, %v5820_v9  ;;  %v6786_v54 = vld [vmem:[#allocation30_spill] sm:$0xff] }
 0x650   :  { %v2812_v52 = vmul.f32 0.7978846, %v2796_v39  ;;  %v3328_v4 = vadd.f32 %v3312_v29, %v5788_v27  ;;  %v5841_v13 = vpop.eup %3992  ;;  %3998 = vtanh.f32 %v3076_v14  ;;  %v5844_v44 = vmul.f32 0.044715, %v5757_v48 }
 0x651   :  { %6781 = vst [vmem:[#allocation71_spill] sm:$0xff] %v5841_v13  ;;  %v3078_v58 = vmul.f32 0.7978846, %v3062_v51  ;;  %v3048_v24 = vmul.f32 0.044715, %v3032_v50  ;;  %4000 = vtanh.f32 %v3342_v21  ;;  %v2798_v6 = vadd.f32 %v2782_v25, %v5796_v8  ;;  %v2702_v51 = vpop.f32.mrf.mxu1  ;;  %v6787_v25 = vld [vmem:[#allocation36_spill] sm:$0xff] }
 0x652   :  { %v3314_v55 = vmul.f32 0.044715, %v3298_v7  ;;  %v2765_v41 = vmul.f32 %v2749_v18, %v5817_v43  ;;  %v5848_v34 = vmul.f32 0.044715, %v3293_v60  ;;  %v5850_v0 = vmul.f32 0.044715, %v2763_v1 }
 0x653   :  { %v3015_v14 = vmul.f32 %v5833_v19, %v5833_v19  ;;  %v3249_v48 = vadd.f32 %v2645_v23, %v6771_v30  ;;  %v5855_v63 = vmul.f32 0.044715, %v3029_v37  ;;  %v5858_v36 = vmul.f32 %v3279_v11, %v5820_v9  ;;  %v6789_v37 = vld [vmem:[#allocation12_spill] sm:$0xff] }
 0x654   :  { %6782 = vst [vmem:[#allocation58_spill] sm:$0xff] %v5848_v34  ;;  %4002 = vtanh.f32 %v2812_v52  ;;  %v3344_v5 = vmul.f32 0.7978846, %v3328_v4  ;;  %v3064_v39 = vadd.f32 %v3048_v24, %v5801_v28  ;;  %v2718_v22 = vadd.f32 %v2698_v61, %v6785_v15  ;;  %v6790_v52 = vld [vmem:[#allocation29_spill] sm:$0xff] }
 0x655   :  { %6783 = vst [vmem:[#allocation81_spill] sm:$0xff] %v5855_v63  ;;  %6784 = vst [vmem:[#allocation68_spill] sm:$0xff] %v5858_v36  ;;  %4004 = vtanh.f32 %v3078_v58  ;;  %v2719_v21 = vadd.f32 %v2649_v53, %v6786_v54  ;;  %v5863_v29 = vmul.f32 0.7978846, %v2798_v6  ;;  %v3330_v50 = vadd.f32 %v3314_v55, %v5804_v35  ;;  %v6792_v24 = vld [vmem:[#allocation37_spill] sm:$0xff]  ;;  %v6795_v54 = vld [vmem:[#allocation38_spill] sm:$0xff] }
 0x656   :  { %v5866_v23 = vmul.f32 0.044715, %v2765_v41  ;;  %v2986_v7 = vadd.f32 %v2649_v53, %v6787_v25  ;;  %v3031_v18 = vmul.f32 %v3015_v14, %v5833_v19  ;;  %v5871_v60 = vadd.f32 %v3249_v48, %v5689_v49 }
 0x657   :  { %v5874_v1 = vadd.f32 %v5689_v49, %v2719_v21  ;;  %v3252_v11 = vadd.f32 %v2649_v53, %v6789_v37  ;;  %4006 = vtanh.f32 %v3344_v5  ;;  %v2985_v4 = vadd.f32 %v2698_v61, %v6790_v52 }
 0x658   :  { %6788 = vst [vmem:[#allocation63_spill] sm:$0xff] %v5871_v60  ;;  %v5879_v58 = vadd.f32 %v2986_v7, %v5689_v49  ;;  %v2721_v6 = vadd.f32 %v2702_v51, %v6792_v24  ;;  %v3080_v55 = vmul.f32 0.7978846, %v3064_v39  ;;  %v5883_v41 = vadd.f32 %v5689_v49, %v2718_v22 }
 0x659   :  { %v2752_v14 = vmul.f32 %v5874_v1, %v5874_v1  ;;  %v5888_v48 = vadd.f32 %v3252_v11, %v5689_v49  ;;  %v5890_v15 = vmul.f32 0.7978846, %v3330_v50  ;;  %v2988_v21 = vadd.f32 %v2702_v51, %v6795_v54  ;;  %v2651_v11 = vpop.f32.mrf.mxu0 }
 0x65a   :  { %6791 = vst [vmem:[#allocation57_spill] sm:$0xff] %v5879_v58  ;;  %v3018_v53 = vmul.f32 %v5879_v58, %v5879_v58  ;;  %v5895_v5 = vadd.f32 %v5689_v49, %v2721_v6  ;;  %v5898_v39 = vpop.eup %3994  ;;  %v3281_v22 = vmul.f32 %v5871_v60, %v5871_v60  ;;  %v3251_v25 = vadd.f32 %v2698_v61, %v6771_v30 }
 0x65b   :  { %6793 = vst [vmem:[#allocation77_spill] sm:$0xff] %v5888_v48  ;;  %6794 = vst [vmem:[#allocation52_spill] sm:$0xff] %v5890_v15  ;;  %v2768_v7 = vmul.f32 %v2752_v14, %v5874_v1  ;;  %v3284_v50 = vmul.f32 %v5888_v48, %v5888_v48  ;;  %v5906_v52 = vpop.eup %3996  ;;  %v5909_v24 = vadd.f32 %v2985_v4, %v5689_v49  ;;  %4008 = vtanh.f32 %v5863_v29 }
 0x65c   :  { %6796 = vst [vmem:[#allocation33_spill] sm:$0xff] %v5898_v39  ;;  %v3034_v6 = vmul.f32 %v3018_v53, %v5879_v58  ;;  %v2754_v54 = vmul.f32 %v5895_v5, %v5895_v5  ;;  %v5915_v47 = vadd.f32 %v2988_v21, %v5689_v49  ;;  %v2751_v30 = vmul.f32 %v5883_v41, %v5883_v41 }
 0x65d   :  { %6797 = vst [vmem:[#allocation85_spill] sm:$0xff] %v5909_v24  ;;  %v2784_v61 = vmul.f32 0.044715, %v2768_v7  ;;  %v3300_v14 = vmul.f32 %v3284_v50, %v5888_v48  ;;  %v3254_v12 = vadd.f32 %v2702_v51, %v6789_v37  ;;  %v5921_v2 = vpop.eup %3998  ;;  %v2720_v10 = vadd.f32 %v2651_v11, %v6800_v31  ;;  %v6803_v50 = vld [vmem:[#allocation40_spill] sm:$0xff] }
 0x65e   :  { %6798 = vst [vmem:[#allocation83_spill] sm:$0xff] %v5915_v47  ;;  %6799 = vst [vmem:[#allocation66_spill] sm:$0xff] %v5921_v2  ;;  %v3050_v4 = vmul.f32 0.044715, %v3034_v6  ;;  %v2770_v40 = vmul.f32 %v2754_v54, %v5895_v5  ;;  %v3020_v53 = vmul.f32 %v5915_v47, %v5915_v47  ;;  %v5927_v21 = vpop.eup %4000  ;;  %v2987_v51 = vadd.f32 %v2651_v11, %v6803_v50 }
 0x65f   :  { %6801 = vst [vmem:[#allocation86_spill] sm:$0xff] %v5927_v21  ;;  %v2800_v35 = vadd.f32 %v2784_v61, %v5874_v1  ;;  %v3316_v33 = vmul.f32 0.044715, %v3300_v14  ;;  %v5931_v7 = vadd.f32 %v3254_v12, %v5689_v49  ;;  %v5937_v39 = vadd.f32 %v5689_v49, %v2720_v10 }
 0x660   :  { %v3066_v27 = vadd.f32 %v3050_v4, %v5879_v58  ;;  %v2786_v6 = vmul.f32 0.044715, %v2770_v40  ;;  %v3036_v54 = vmul.f32 %v3020_v53, %v5915_v47  ;;  %v3017_v31 = vmul.f32 %v5909_v24, %v5909_v24 }
 0x661   :  { %6802 = vst [vmem:[#allocation55_spill] sm:$0xff] %v5931_v7  ;;  %v5939_v26 = vpop.eup %4002  ;;  %v3332_v61 = vadd.f32 %v3316_v33, %v5888_v48  ;;  %v3286_v12 = vmul.f32 %v5931_v7, %v5931_v7  ;;  %v5947_v14 = vadd.f32 %v2987_v51, %v5689_v49  ;;  %v3297_v40 = vmul.f32 %v3281_v22, %v5871_v60 }
 0x662   :  { %v5949_v4 = vpop.eup %4004  ;;  %v2767_v10 = vmul.f32 %v2751_v30, %v5883_v41  ;;  %v5954_v53 = vadd.f32 %v3251_v25, %v5689_v49  ;;  %v3052_v50 = vmul.f32 0.044715, %v3036_v54  ;;  %v2816_v21 = vmul.f32 0.7978846, %v2800_v35  ;;  %v2704_v54 = vpop.f32.mrf.mxu1 }
 0x663   :  { %6804 = vst [vmem:[#allocation56_spill] sm:$0xff] %v5949_v4  ;;  %v2802_v28 = vadd.f32 %v2786_v6, %v5895_v5  ;;  %v3302_v33 = vmul.f32 %v3286_v12, %v5931_v7  ;;  %v2753_v48 = vmul.f32 %v5937_v39, %v5937_v39  ;;  %v5961_v51 = vmul.f32 0.044715, %v3031_v18  ;;  %v2653_v12 = vpop.f32.mrf.mxu0 }
 0x664   :  { %6805 = vst [vmem:[#allocation11_spill] sm:$0xff] %v5954_v53  ;;  %v3082_v9 = vmul.f32 0.7978846, %v3066_v27  ;;  %v3019_v22 = vmul.f32 %v5947_v14, %v5947_v14  ;;  %v5965_v30 = vpop.eup %4006  ;;  %4010 = vtanh.f32 %v3080_v55  ;;  %v3033_v35 = vmul.f32 %v3017_v31, %v5909_v24 }
 0x665   :  { %6806 = vst [vmem:[#allocation74_spill] sm:$0xff] %v5961_v51  ;;  %6807 = vst [vmem:[#allocation67_spill] sm:$0xff] %v5965_v30  ;;  %v3348_v25 = vmul.f32 0.7978846, %v3332_v61  ;;  %v3068_v6 = vadd.f32 %v3052_v50, %v5915_v47  ;;  %v5969_v60 = vmul.f32 0.044715, %v3297_v40  ;;  %v5973_v29 = vmul.f32 %v5954_v53, %v5954_v53 }
 0x666   :  { %v3318_v27 = vmul.f32 0.044715, %v3302_v33  ;;  %v3253_v18 = vadd.f32 %v2651_v11, %v6789_v37  ;;  %v5976_v15 = vmul.f32 0.044715, %v2767_v10  ;;  %4012 = vtanh.f32 %v2816_v21  ;;  %v6810_v50 = vld [vmem:[#allocation41_spill] sm:$0xff]  ;;  %v6811_v40 = vld [vmem:[#allocation43_spill] sm:$0xff]  ;;  %v2706_v10 = vpop.f32.mrf.mxu1 }
 0x667   :  { %6808 = vst [vmem:[#allocation84_spill] sm:$0xff] %v5969_v60  ;;  %6809 = vst [vmem:[#allocation73_spill] sm:$0xff] %v5973_v29  ;;  %v2818_v55 = vmul.f32 0.7978846, %v2802_v28  ;;  %v2769_v31 = vmul.f32 %v2753_v48, %v5937_v39  ;;  %4014 = vtanh.f32 %v3082_v9  ;;  %v3035_v61 = vmul.f32 %v3019_v22, %v5947_v14  ;;  %v6813_v33 = vld [vmem:[#allocation44_spill] sm:$0xff]  ;;  %v6815_v9 = vld [vmem:[#allocation78_spill] sm:$0xff] }
 0x668   :  { %v2722_v30 = vadd.f32 %v2704_v54, %v6810_v50  ;;  %v2723_v60 = vadd.f32 %v2653_v12, %v6811_v40  ;;  %v5982_v45 = vmul.f32 0.044715, %v3033_v35  ;;  %4016 = vtanh.f32 %v3348_v25  ;;  %v6816_v35 = vld [vmem:[#allocation42_spill] sm:$0xff]  ;;  %v6030_v2 = vpop.eup %4008  ;;  %v2708_v4 = vpop.f32.mrf.mxu1 }
 0x669   :  { %v3084_v34 = vmul.f32 0.7978846, %v3068_v6  ;;  %v2990_v16 = vadd.f32 %v2653_v12, %v6813_v33  ;;  %v3334_v11 = vadd.f32 %v3318_v27, %v5931_v7  ;;  %v5987_v21 = vadd.f32 %v3253_v18, %v5689_v49 }
 0x66a   :  { %6812 = vst [vmem:[#allocation80_spill] sm:$0xff] %v5982_v45  ;;  %v5990_v28 = vadd.f32 %v5689_v49, %v2723_v60  ;;  %v3256_v48 = vadd.f32 %v2653_v12, %v6815_v9  ;;  %4018 = vtanh.f32 %v2818_v55  ;;  %v5993_v22 = vmul.f32 0.044715, %v2769_v31  ;;  %v6819_v31 = vld [vmem:[#allocation45_spill] sm:$0xff] }
 0x66b   :  { %6814 = vst [vmem:[#allocation69_spill] sm:$0xff] %v5987_v21  ;;  %v2989_v50 = vadd.f32 %v2704_v54, %v6816_v35  ;;  %v5997_v25 = vadd.f32 %v2990_v16, %v5689_v49  ;;  %v5999_v6 = vmul.f32 0.044715, %v3035_v61  ;;  %v6002_v27 = vadd.f32 %v5689_v49, %v2722_v30  ;;  %v2655_v35 = vpop.f32.mrf.mxu0 }
 0x66c   :  { %v2756_v60 = vmul.f32 %v5990_v28, %v5990_v28  ;;  %v6007_v18 = vadd.f32 %v3256_v48, %v5689_v49  ;;  %4020 = vtanh.f32 %v3084_v34  ;;  %v3255_v12 = vadd.f32 %v2704_v54, %v6789_v37  ;;  %v6820_v54 = vld [vmem:[#allocation46_spill] sm:$0xff] }
 0x66d   :  { %6817 = vst [vmem:[#allocation59_spill] sm:$0xff] %v5997_v25  ;;  %v3022_v55 = vmul.f32 %v5997_v25, %v5997_v25  ;;  %v2725_v16 = vadd.f32 %v2706_v10, %v6819_v31  ;;  %v3350_v40 = vmul.f32 0.7978846, %v3334_v11  ;;  %v3285_v61 = vmul.f32 %v5987_v21, %v5987_v21 }
 0x66e   :  { %6818 = vst [vmem:[#allocation54_spill] sm:$0xff] %v6007_v18  ;;  %v2772_v30 = vmul.f32 %v2756_v60, %v5990_v28  ;;  %v3288_v33 = vmul.f32 %v6007_v18, %v6007_v18  ;;  %v6019_v48 = vadd.f32 %v2989_v50, %v5689_v49  ;;  %v2992_v31 = vadd.f32 %v2706_v10, %v6820_v54  ;;  %v6821_v54 = vld [vmem:[#allocation47_spill] sm:$0xff] }
 0x66f   :  { %v3038_v34 = vmul.f32 %v3022_v55, %v5997_v25  ;;  %v6023_v37 = vadd.f32 %v5689_v49, %v2725_v16  ;;  %v2755_v11 = vmul.f32 %v6002_v27, %v6002_v27  ;;  %v3258_v36 = vadd.f32 %v2706_v10, %v6815_v9 }
 0x670   :  { %v2788_v7 = vmul.f32 0.044715, %v2772_v30  ;;  %v3304_v60 = vmul.f32 %v3288_v33, %v6007_v18  ;;  %v6033_v50 = vadd.f32 %v3255_v12, %v5689_v49  ;;  %v6038_v16 = vadd.f32 %v2992_v31, %v5689_v49 }
 0x671   :  { %v2758_v55 = vmul.f32 %v6023_v37, %v6023_v37  ;;  %v2724_v38 = vadd.f32 %v2655_v35, %v6821_v54  ;;  %v6041_v29 = vpop.eup %4010  ;;  %v3054_v33 = vmul.f32 0.044715, %v3038_v34  ;;  %v6045_v10 = vadd.f32 %v3258_v36, %v5689_v49  ;;  %v6824_v34 = vld [vmem:[#allocation48_spill] sm:$0xff] }
 0x672   :  { %6822 = vst [vmem:[#allocation64_spill] sm:$0xff] %v6041_v29  ;;  %v2804_v30 = vadd.f32 %v2788_v7, %v5990_v28  ;;  %v3320_v53 = vmul.f32 0.044715, %v3304_v60  ;;  %4022 = vtanh.f32 %v3350_v40  ;;  %v3024_v47 = vmul.f32 %v6038_v16, %v6038_v16 }
 0x673   :  { %6823 = vst [vmem:[#allocation65_spill] sm:$0xff] %v6045_v10  ;;  %v2774_v12 = vmul.f32 %v2758_v55, %v6023_v37  ;;  %v6051_v31 = vadd.f32 %v5689_v49, %v2724_v38  ;;  %v6053_v56 = vpop.eup %4012  ;;  %v3301_v54 = vmul.f32 %v3285_v61, %v5987_v21  ;;  %v3290_v7 = vmul.f32 %v6045_v10, %v6045_v10 }
 0x674   :  { %v2820_v29 = vmul.f32 0.7978846, %v2804_v30  ;;  %v2991_v36 = vadd.f32 %v2655_v35, %v6824_v34  ;;  %v6059_v60 = vpop.eup %4014  ;;  %v3021_v40 = vmul.f32 %v6019_v48, %v6019_v48  ;;  %v3040_v13 = vmul.f32 %v3024_v47, %v6038_v16 }
 0x675   :  { %v2790_v55 = vmul.f32 0.044715, %v2774_v12  ;;  %v2757_v38 = vmul.f32 %v6051_v31, %v6051_v31  ;;  %v6066_v58 = vpop.eup %4016  ;;  %v2771_v61 = vmul.f32 %v2755_v11, %v6002_v27  ;;  %v3070_v30 = vadd.f32 %v3054_v33, %v5997_v25 }
 0x676   :  { %6825 = vst [vmem:[#allocation79_spill] sm:$0xff] %v6066_v58  ;;  %v3336_v21 = vadd.f32 %v3320_v53, %v6007_v18  ;;  %v3306_v34 = vmul.f32 %v3290_v7, %v6045_v10  ;;  %4024 = vtanh.f32 %v2820_v29  ;;  %v3056_v12 = vmul.f32 0.044715, %v3040_v13  ;;  %v6827_v29 = vld [vmem:[#allocation49_spill] sm:$0xff] }
 0x677   :  { %v2806_v45 = vadd.f32 %v2790_v55, %v6023_v37  ;;  %v2773_v47 = vmul.f32 %v2757_v38, %v6051_v31  ;;  %v4019_v24 = vpop.eup %4018  ;;  %v6074_v63 = vmul.f32 0.044715, %v3301_v54  ;;  %v3287_v58 = vmul.f32 %v6033_v50, %v6033_v50 }
 0x678   :  { %v3322_v11 = vmul.f32 0.044715, %v3306_v34  ;;  %v6079_v33 = vadd.f32 %v2991_v36, %v5689_v49  ;;  %v3257_v7 = vadd.f32 %v2655_v35, %v6815_v9  ;;  %v2726_v25 = vadd.f32 %v2708_v4, %v6827_v29 }
 0x679   :  { %6826 = vst [vmem:[#allocation13_spill] sm:$0xff] %v6074_v63  ;;  %v2822_v53 = vmul.f32 0.7978846, %v2806_v45  ;;  %v2789_v18 = vmul.f32 0.044715, %v2773_v47  ;;  %v6083_v55 = vpop.eup %4020  ;;  %v3037_v13 = vmul.f32 %v3021_v40, %v6019_v48  ;;  %v3072_v54 = vadd.f32 %v3056_v12, %v6038_v16  ;;  %v6828_v63 = vld [vmem:[#allocation50_spill] sm:$0xff] }
 0x67a   :  { %v3086_v38 = vmul.f32 0.7978846, %v3070_v30  ;;  %v2993_v42 = vadd.f32 %v2708_v4, %v6828_v63  ;;  %v2787_v51 = vmul.f32 0.044715, %v2771_v61  ;;  %v3352_v34 = vmul.f32 0.7978846, %v3336_v21 }
 0x67b   :  { %4026 = vtanh.f32 %v2822_v53  ;;  %v6089_v36 = vadd.f32 %v5689_v49, %v2726_v25  ;;  %v3303_v45 = vmul.f32 %v3287_v58, %v6033_v50  ;;  %v3338_v35 = vadd.f32 %v3322_v11, %v6045_v10 }
 0x67c   :  { %v6094_v47 = vadd.f32 %v2993_v42, %v5689_v49  ;;  %v2801_v40 = vadd.f32 %v5993_v22, %v5937_v39  ;;  %v3023_v30 = vmul.f32 %v6079_v33, %v6079_v33  ;;  %v6101_v63 = vadd.f32 %v3257_v7, %v5689_v49 }
 0x67d   :  { %v2759_v21 = vmul.f32 %v6089_v36, %v6089_v36  ;;  %v2805_v25 = vadd.f32 %v2789_v18, %v6051_v31  ;;  %4028 = vtanh.f32 %v3086_v38  ;;  %v3088_v58 = vmul.f32 0.7978846, %v3072_v54 }
 0x67e   :  { %v3259_v61 = vadd.f32 %v2708_v4, %v6815_v9  ;;  %v2817_v42 = vmul.f32 0.7978846, %v2801_v40  ;;  %4030 = vtanh.f32 %v3352_v34  ;;  %v2803_v11 = vadd.f32 %v2787_v51, %v6002_v27 }
 0x67f   :  { %v2775_v12 = vmul.f32 %v2759_v21, %v6089_v36  ;;  %v2821_v22 = vmul.f32 0.7978846, %v2805_v25  ;;  %v6109_v53 = vpop.eup %4022  ;;  %v3053_v7 = vmul.f32 0.044715, %v3037_v13  ;;  %v3354_v29 = vmul.f32 0.7978846, %v3338_v35 }
 0x680   :  { %v3025_v10 = vmul.f32 %v6094_v47, %v6094_v47  ;;  %4032 = vtanh.f32 %v2817_v42  ;;  %v3289_v18 = vmul.f32 %v6101_v63, %v6101_v63  ;;  %v2819_v4 = vmul.f32 0.7978846, %v2803_v11 }
 0x681   :  { %v2791_v38 = vmul.f32 0.044715, %v2775_v12  ;;  %4034 = vtanh.f32 %v2821_v22  ;;  %v6116_v9 = vadd.f32 %v3259_v61, %v5689_v49  ;;  %v2848_v51 = vadd.f32 1.0, %v6053_v56 }
 0x682   :  { %4036 = vtanh.f32 %v3088_v58  ;;  %v2793_v13 = vadd.f32 %v5762_v46, %v5727_v57  ;;  %v3039_v54 = vmul.f32 %v3023_v30, %v6079_v33  ;;  %v2797_v35 = vadd.f32 %v5866_v23, %v5817_v43 }
 0x683   :  { %v2807_v34 = vadd.f32 %v2791_v38, %v6089_v36  ;;  %4038 = vtanh.f32 %v2819_v4  ;;  %v4025_v40 = vpop.eup %4024  ;;  %v3041_v21 = vmul.f32 %v3025_v10, %v6094_v47  ;;  %v2850_v25 = vadd.f32 1.0, %v4019_v24 }
 0x684   :  { %4040 = vtanh.f32 %v3354_v29  ;;  %v2809_v49 = vmul.f32 0.7978846, %v2793_v13  ;;  %v2813_v61 = vmul.f32 0.7978846, %v2797_v35  ;;  %v2795_v56 = vadd.f32 %v5850_v0, %v5765_v20 }
 0x685   :  { %v2823_v58 = vmul.f32 0.7978846, %v2807_v34  ;;  %v2799_v46 = vadd.f32 %v5976_v15, %v5883_v41  ;;  %v3305_v30 = vmul.f32 %v3289_v18, %v6101_v63  ;;  %v3291_v42 = vmul.f32 %v6116_v9, %v6116_v9 }
 0x686   :  { %v2864_v23 = vmul.f32 0.5, %v2848_v51  ;;  %4042 = vtanh.f32 %v2809_v49  ;;  %v2852_v12 = vadd.f32 1.0, %v4025_v40  ;;  %v2811_v10 = vmul.f32 0.7978846, %v2795_v56 }
 0x687   :  { %4044 = vtanh.f32 %v2823_v58  ;;  %v2815_v24 = vmul.f32 0.7978846, %v2799_v46  ;;  %v3055_v11 = vmul.f32 0.044715, %v3039_v54  ;;  %v3057_v29 = vmul.f32 0.044715, %v3041_v21 }
 0x688   :  { %v4027_v22 = vpop.eup %4026  ;;  %4046 = vtanh.f32 %v2813_v61  ;;  %v2844_v0 = vadd.f32 1.0, %v5939_v26  ;;  %v6134_v38 = vmul.f32 0.044715, %v3303_v45  ;;  %v2866_v15 = vmul.f32 0.5, %v2850_v25 }
 0x689   :  { %4048 = vtanh.f32 %v2811_v10  ;;  %v2840_v18 = vadd.f32 1.0, %v5835_v3  ;;  %v6137_v4 = vmul.f32 0.044715, %v3305_v30  ;;  %v6140_v51 = vmul.f32 %v3291_v42, %v6116_v9 }
 0x68a   :  { %v2854_v13 = vadd.f32 1.0, %v4027_v22  ;;  %4050 = vtanh.f32 %v2815_v24  ;;  %v4029_v34 = vpop.eup %4028  ;;  %v2868_v35 = vmul.f32 0.5, %v2852_v12  ;;  %v6143_v54 = vmul.f32 %v2864_v23, %v5874_v1 }
 0x68b   :  { %v2842_v26 = vadd.f32 1.0, %v5906_v52  ;;  %v3067_v45 = vadd.f32 %v5999_v6, %v5947_v14  ;;  %v6148_v40 = vpop.eup %4030  ;;  %v2860_v3 = vmul.f32 0.5, %v2844_v0  ;;  %v3071_v21 = vadd.f32 %v3055_v11, %v6079_v33 }
 0x68c   :  { %v3069_v25 = vadd.f32 %v3053_v7, %v6019_v48  ;;  %v3073_v49 = vadd.f32 %v3057_v29, %v6094_v47  ;;  %v6154_v61 = vmul.f32 %v2866_v15, %v5895_v5  ;;  %v2856_v1 = vmul.f32 0.5, %v2840_v18 }
 0x68d   :  { %v4033_v58 = vpop.eup %4032  ;;  %v2846_v56 = vadd.f32 1.0, %v6030_v2  ;;  %v3083_v52 = vmul.f32 0.7978846, %v3067_v45  ;;  %v2870_v6 = vmul.f32 0.5, %v2854_v13  ;;  %v3087_v42 = vmul.f32 0.7978846, %v3071_v21 }
 0x68e   :  { %v4035_v46 = vpop.eup %4034  ;;  %v2849_v30 = vadd.f32 1.0, %v4033_v58  ;;  %v3085_v23 = vmul.f32 0.7978846, %v3069_v25  ;;  %v2884_v24 = vmul.f32 %v2868_v35, %v5990_v28  ;;  %v2858_v7 = vmul.f32 0.5, %v2842_v26 }
 0x68f   :  { %v4037_v12 = vpop.eup %4036  ;;  %v2853_v10 = vadd.f32 1.0, %v4035_v46  ;;  %4052 = vtanh.f32 %v3083_v52  ;;  %v6159_v5 = vmul.f32 %v2860_v3, %v5769_v62  ;;  %v3089_v29 = vmul.f32 0.7978846, %v3073_v49 }
 0x690   :  { %v4039_v22 = vpop.eup %4038  ;;  %v2865_v11 = vmul.f32 0.5, %v2849_v30  ;;  %4054 = vtanh.f32 %v3087_v42  ;;  %v2862_v18 = vmul.f32 0.5, %v2846_v56  ;;  %v2886_v13 = vmul.f32 %v2870_v6, %v6023_v37 }
 0x691   :  { %v6161_v2 = vpop.eup %4040  ;;  %v2869_v0 = vmul.f32 0.5, %v2853_v10  ;;  %v2851_v15 = vadd.f32 1.0, %v4039_v22  ;;  %4056 = vtanh.f32 %v3085_v23  ;;  %v6165_v45 = vmul.f32 %v2856_v1, %v5695_v17 }
 0x692   :  { %4058 = vtanh.f32 %v3089_v29  ;;  %v3118_v28 = vadd.f32 1.0, %v4029_v34  ;;  %v2881_v26 = vmul.f32 %v2865_v11, %v5937_v39  ;;  %v2892_v3 = vpack.c.bf16 %v2884_v24, %v6143_v54 }
 0x693   :  { %v4043_v35 = vpop.eup %4042  ;;  %v2885_v62 = vmul.f32 %v2869_v0, %v6051_v31  ;;  %v6171_v21 = vmul.f32 %v2858_v7, %v5714_v32  ;;  %v2867_v49 = vmul.f32 0.5, %v2851_v15  ;;  %v2888_v37 = vpack.c.bf16 %v6159_v5, %v6165_v45 }
 0x694   :  { %v4045_v25 = vpop.eup %4044  ;;  %v2841_v58 = vadd.f32 1.0, %v4043_v35  ;;  %v3059_v17 = vadd.f32 %v5844_v44, %v5738_v59  ;;  %v6178_v39 = vmul.f32 %v2862_v18, %v5796_v8  ;;  %v3114_v31 = vadd.f32 1.0, %v6059_v60  ;;  %v6829_v44 = vld [vmem:[#allocation74_spill] sm:$0xff]  ;;  %v6831_v18 = vld [vmem:[#allocation81_spill] sm:$0xff]  ;;  %v6833_v35 = vld [vmem:[#allocation80_spill] sm:$0xff] }
 0x695   :  { %v4047_v34 = vpop.eup %4046  ;;  %v2893_v1 = vpack.c.bf16 %v2885_v62, %v2881_v26  ;;  %v2855_v56 = vadd.f32 1.0, %v4045_v25  ;;  %v2894_v32 = vpack.c.bf16 %v2886_v13, %v6154_v61  ;;  %v3134_v30 = vmul.f32 0.5, %v3118_v28 }
 0x696   :  { %v4049_v54 = vpop.eup %4048  ;;  %v2845_v52 = vadd.f32 1.0, %v4047_v34  ;;  %v2857_v46 = vmul.f32 0.5, %v2841_v58  ;;  %v3120_v10 = vadd.f32 1.0, %v4037_v12  ;;  %v3063_v24 = vadd.f32 %v6829_v44, %v5833_v19  ;;  %v6830_v12 = vld [vmem:[#allocation8_spill] sm:$0xff]  ;;  %v6834_v58 = vld [vmem:[#allocation59_spill] sm:$0xff] }
 0x697   :  { %v4051_v6 = vpop.eup %4050  ;;  %2908 = vmatprep.subr.bf16.mxu0 %v2893_v1  ;;  %v2871_v42 = vmul.f32 0.5, %v2855_v56  ;;  %v2843_v23 = vadd.f32 1.0, %v4049_v54  ;;  %v2883_v7 = vmul.f32 %v2867_v49, %v6002_v27  ;;  %v3075_v60 = vmul.f32 0.7978846, %v3059_v17  ;;  %v6832_v27 = vld [vmem:[#allocation85_spill] sm:$0xff] }
 0x698   :  { %2909 = vmatpush1.bf16.msra.mxu0 %v2892_v3  ;;  %v2861_v8 = vmul.f32 0.5, %v2845_v52  ;;  %v2847_v22 = vadd.f32 1.0, %v4051_v6  ;;  %v2873_v61 = vmul.f32 %v2857_v46, %v5727_v57  ;;  %v3079_v29 = vmul.f32 0.7978846, %v3063_v24  ;;  %v6835_v6 = vld [vmem:[#allocation56_spill] sm:$0xff]  ;;  %v6836_v24 = vld [vmem:[#allocation57_spill] sm:$0xff] }
 0x699   :  { %v2887_v11 = vmul.f32 %v2871_v42, %v6089_v36  ;;  %v2859_v5 = vmul.f32 0.5, %v2843_v23  ;;  %4060 = vtanh.f32 %v3075_v60  ;;  %v3061_v13 = vadd.f32 %v6831_v18, %v6830_v12 }
 0x69a   :  { %v2877_v0 = vmul.f32 %v2861_v8, %v5817_v43  ;;  %v2863_v15 = vmul.f32 0.5, %v2847_v22  ;;  %v3130_v28 = vmul.f32 0.5, %v3114_v31  ;;  %4062 = vtanh.f32 %v3079_v29  ;;  %v6837_v8 = vld [vmem:[#allocation71_spill] sm:$0xff] }
 0x69b   :  { %v2895_v45 = vpack.c.bf16 %v2887_v11, %v2883_v7  ;;  %v3065_v26 = vadd.f32 %v6833_v35, %v6832_v27  ;;  %v2875_v36 = vmul.f32 %v2859_v5, %v5765_v20  ;;  %v3077_v25 = vmul.f32 0.7978846, %v3061_v13 }
 0x69c   :  { %v4053_v62 = vpop.eup %4052  ;;  %v2889_v3 = vpack.c.bf16 %v2877_v0, %v2873_v61  ;;  %v2879_v57 = vmul.f32 %v2863_v15, %v5883_v41  ;;  %v3150_v17 = vmul.f32 %v3134_v30, %v6834_v58  ;;  %v3116_v34 = vadd.f32 1.0, %v6083_v55 }
 0x69d   :  { %v4055_v49 = vpop.eup %4054  ;;  %2949 = vmatprep.subr.bf16.mxu1 %v2895_v45  ;;  %v3115_v43 = vadd.f32 1.0, %v4053_v62  ;;  %v3081_v1 = vmul.f32 0.7978846, %v3065_v26  ;;  %v3136_v52 = vmul.f32 0.5, %v3120_v10  ;;  %4064 = vtanh.f32 %v3077_v25 }
 0x69e   :  { %v4057_v56 = vpop.eup %4056  ;;  %2950 = vmatpush1.bf16.msra.mxu1 %v2894_v32  ;;  %2910 = vmatprep.subr.bf16.mxu0 %v2889_v3  ;;  %v2891_v31 = vpack.c.bf16 %v2879_v57, %v2875_v36  ;;  %v3119_v54 = vadd.f32 1.0, %v4055_v49  ;;  %v3110_v42 = vadd.f32 1.0, %v6835_v6  ;;  %v3323_v23 = vmul.f32 0.044715, %v6140_v51  ;;  %v6207_v51 = vld [vmem:[%s6320_s8] sm:$0x3] }
 0x69f   :  { %v4059_v46 = vpop.eup %4058  ;;  %2911 = vmatpush1.bf16.msra.mxu0 %v2888_v37  ;;  %v3131_v20 = vmul.f32 0.5, %v3115_v43  ;;  %v3117_v41 = vadd.f32 1.0, %v4057_v56  ;;  %4066 = vtanh.f32 %v3081_v1  ;;  %v2890_v55 = vpack.c.bf16 %v6178_v39, %v6171_v21  ;;  %v6838_v21 = vld [vmem:[#allocation69_spill] sm:$0xff]  ;;  %v6845_v1 = vld [vmem:[#allocation66_spill] sm:$0xff] }
 0x6a0   :  { %2951 = vmatprep.subr.bf16.mxu1 %v2891_v31  ;;  %v3135_v30 = vmul.f32 0.5, %v3119_v54  ;;  %v3121_v32 = vadd.f32 1.0, %v4059_v46  ;;  %v3146_v7 = vmul.f32 %v3130_v28, %v6836_v24  ;;  %v3132_v10 = vmul.f32 0.5, %v3116_v34  ;;  %v6839_v39 = vld [vmem:[#allocation13_spill] sm:$0xff]  ;;  %v6841_v28 = vld [vmem:[#allocation83_spill] sm:$0xff]  ;;  %v6846_v31 = vld [vmem:[#allocation64_spill] sm:$0xff] }
 0x6a1   :  { %v3133_v44 = vmul.f32 0.5, %v3117_v41  ;;  %v3106_v22 = vadd.f32 1.0, %v6837_v8  ;;  %v3147_v37 = vmul.f32 %v3131_v20, %v5947_v14  ;;  %v3333_v61 = vadd.f32 %v6839_v39, %v6838_v21  ;;  %v6843_v3 = vld [vmem:[#allocation73_spill] sm:$0xff]  ;;  %v6848_v41 = vld [vmem:[#allocation82_spill] sm:$0xff]  ;;  %v6851_v24 = vld [vmem:[#allocation52_spill] sm:$0xff] }
 0x6a2   :  { %2952 = vmatpush1.bf16.msra.mxu1 %v2890_v55  ;;  %v3151_v60 = vmul.f32 %v3135_v30, %v6079_v33  ;;  %v3137_v11 = vmul.f32 0.5, %v3121_v32  ;;  %3766 = vmatmul.mubr.msk.bf16.vlgmr.msra.gmra.mxu0 %vm915_vm4, %v6207_v51  ;;  %v3158_v5 = vpack.c.bf16 %v3150_v17, %v3146_v7  ;;  %v3152_v29 = vmul.f32 %v3136_v52, %v6038_v16  ;;  %v6844_v17 = vld [vmem:[#allocation70_spill] sm:$0xff]  ;;  %v6847_v52 = vld [vmem:[#allocation68_spill] sm:$0xff] }
 0x6a3   :  { %v3126_v0 = vmul.f32 0.5, %v3110_v42  ;;  %v3337_v14 = vadd.f32 %v6137_v4, %v6101_v63  ;;  %v6840_v33 = vmov 0   ;;  %v3149_v18 = vmul.f32 %v3133_v44, %v6019_v48  ;;  %v6842_v4 = vld [vmem:[#allocation11_spill] sm:$0xff]  ;;  %v6849_v6 = vld [vmem:[#allocation58_spill] sm:$0xff]  ;;  %v6853_v8 = vld [vmem:[#allocation84_spill] sm:$0xff] }
 0x6a4   :  { %3194 = vmatprep.mubr.bf16.mxu0 %v6840_v33  ;;  %v3159_v15 = vpack.c.bf16 %v3151_v60, %v3147_v37  ;;  %v3153_v13 = vmul.f32 %v3137_v11, %v6094_v47  ;;  %v3349_v45 = vmul.f32 0.7978846, %v3333_v61  ;;  %v3148_v35 = vmul.f32 %v3132_v10, %v6841_v28  ;;  %v6850_v30 = vld [vmem:[#allocation34_spill] sm:$0xff]  ;;  %v6852_v10 = vld [vmem:[#allocation63_spill] sm:$0xff] }
 0x6a5   :  { %3767 = vmatmul.mubr.msk.bf16.vlgmr.msra.gmra.mxu1 %vm915_vm4, %v6207_v51  ;;  %v3353_v26 = vmul.f32 0.7978846, %v3337_v14  ;;  %v3335_v16 = vadd.f32 %v6134_v38, %v6033_v50  ;;  %v3339_v62 = vadd.f32 %v3323_v23, %v6116_v9  ;;  %v3299_v36 = vmul.f32 %v6843_v3, %v6842_v4 }
 0x6a6   :  { %3174 = vmatprep.subr.bf16.mxu0 %v3159_v15  ;;  %v3161_v57 = vpack.c.bf16 %v3153_v13, %v3149_v18  ;;  %v3122_v48 = vmul.f32 0.5, %v3106_v22  ;;  %4068 = vtanh.f32 %v3349_v45  ;;  %3235 = vmatprep.mubr.bf16.mxu1 %v6840_v33  ;;  %v4061_v47 = vpop.eup %4060  ;;  %v3160_v25 = vpack.c.bf16 %v3152_v29, %v3148_v35  ;;  %v6854_v13 = vld [vmem:[#allocation62_spill] sm:$0xff] }
 0x6a7   :  { %3175 = vmatpush1.bf16.msra.mxu0 %v3158_v5  ;;  %4070 = vtanh.f32 %v3353_v26  ;;  %v3351_v49 = vmul.f32 0.7978846, %v3335_v16  ;;  %v3355_v43 = vmul.f32 0.7978846, %v3339_v62  ;;  %v4063_v58 = vpop.eup %4062  ;;  %v3107_v38 = vadd.f32 1.0, %v4061_v47  ;;  %v6855_v62 = vld [vmem:[#allocation32_spill] sm:$0xff] }
 0x6a8   :  { %3215 = vmatprep.subr.bf16.mxu1 %v3161_v57  ;;  %v3142_v34 = vmul.f32 %v3126_v0, %v6844_v17  ;;  %v3108_v56 = vadd.f32 1.0, %v6845_v1  ;;  %v3112_v54 = vadd.f32 1.0, %v6846_v31  ;;  %v3311_v46 = vmul.f32 0.044715, %v6847_v52 }
 0x6a9   :  { %3216 = vmatpush1.bf16.msra.mxu1 %v3160_v25  ;;  %v3111_v20 = vadd.f32 1.0, %v4063_v58  ;;  %4072 = vtanh.f32 %v3351_v49  ;;  %v3325_v42 = vadd.f32 %v6849_v6, %v6848_v41  ;;  %v3315_v23 = vmul.f32 0.044715, %v3299_v36  ;;  %v6856_v36 = vld [vmem:[#allocation79_spill] sm:$0xff]  ;;  %v6857_v25 = vld [vmem:[#allocation76_spill] sm:$0xff] }
 0x6aa   :  { %v3123_v55 = vmul.f32 0.5, %v3107_v38  ;;  %v3138_v32 = vmul.f32 %v3122_v48, %v6850_v30  ;;  %4074 = vtanh.f32 %v3355_v43  ;;  %v4065_v44 = vpop.eup %4064  ;;  %v3329_v22 = vadd.f32 %v6853_v8, %v6852_v10  ;;  %v6859_v30 = vld [vmem:[#allocation77_spill] sm:$0xff] }
 0x6ab   :  { %4076 = vtanh.f32 %v6851_v24  ;;  %v3127_v7 = vmul.f32 0.5, %v3111_v20  ;;  %v3341_v37 = vmul.f32 0.7978846, %v3325_v42  ;;  %v3109_v11 = vadd.f32 1.0, %v4065_v44  ;;  %v6858_v20 = vld [vmem:[#allocation54_spill] sm:$0xff]  ;;  %v6860_v44 = vld [vmem:[#allocation67_spill] sm:$0xff] }
 0x6ac   :  { %v4067_v60 = vpop.eup %4066  ;;  %v3154_v39 = vpack.c.bf16 %v3142_v34, %v3138_v32  ;;  %v3124_v61 = vmul.f32 0.5, %v3108_v56  ;;  %v3128_v5 = vmul.f32 0.5, %v3112_v54  ;;  %v3139_v29 = vmul.f32 %v3123_v55, %v5738_v59 }
 0x6ad   :  { %v3143_v0 = vmul.f32 %v3127_v7, %v5833_v19  ;;  %v3113_v14 = vadd.f32 1.0, %v4067_v60  ;;  %v3345_v15 = vmul.f32 0.7978846, %v3329_v22  ;;  %v3125_v18 = vmul.f32 0.5, %v3109_v11  ;;  %v6861_v60 = vld [vmem:[#allocation33_spill] sm:$0xff] }
 0x6ae   :  { %4078 = vtanh.f32 %v3341_v37  ;;  %v3327_v45 = vadd.f32 %v3311_v46, %v6854_v13  ;;  %v3331_v28 = vadd.f32 %v3315_v23, %v6842_v4  ;;  %v3384_v16 = vadd.f32 1.0, %v6148_v40 }
 0x6af   :  { %v3155_v35 = vpack.c.bf16 %v3143_v0, %v3139_v29  ;;  %v3129_v26 = vmul.f32 0.5, %v3113_v14  ;;  %4080 = vtanh.f32 %v3345_v15  ;;  %v3144_v3 = vmul.f32 %v3128_v5, %v6855_v62  ;;  %v6862_v29 = vld [vmem:[#allocation65_spill] sm:$0xff] }
 0x6b0   :  { %v3380_v57 = vadd.f32 1.0, %v6856_v36  ;;  %v3343_v59 = vmul.f32 0.7978846, %v3327_v45  ;;  %v3347_v48 = vmul.f32 0.7978846, %v3331_v28  ;;  %v3141_v19 = vmul.f32 %v3125_v18, %v6830_v12  ;;  %v6863_v28 = vld [vmem:[#allocation55_spill] sm:$0xff] }
 0x6b1   :  { %3176 = vmatprep.subr.bf16.mxu0 %v3155_v35  ;;  %v3145_v47 = vmul.f32 %v3129_v26, %v6832_v27  ;;  %v3140_v49 = vmul.f32 %v3124_v61, %v6857_v25  ;;  %v3400_v38 = vmul.f32 0.5, %v3384_v16  ;;  %v3386_v40 = vadd.f32 1.0, %v6161_v2  ;;  %v6864_v36 = vld [vmem:[#allocation86_spill] sm:$0xff]  ;;  %v6865_v25 = vld [vmem:[#allocation60_spill] sm:$0xff] }
 0x6b2   :  { %3177 = vmatpush1.bf16.msra.mxu0 %v3154_v39  ;;  %4082 = vtanh.f32 %v3343_v59  ;;  %v3396_v56 = vmul.f32 0.5, %v3380_v57  ;;  %v3382_v12 = vadd.f32 1.0, %v6109_v53  ;;  %v3376_v24 = vadd.f32 1.0, %v6860_v44 }
 0x6b3   :  { %v4069_v43 = vpop.eup %4068  ;;  %v3157_v58 = vpack.c.bf16 %v3145_v47, %v3141_v19  ;;  %4084 = vtanh.f32 %v3347_v48  ;;  %v3156_v34 = vpack.c.bf16 %v3144_v3, %v3140_v49  ;;  %v3416_v6 = vmul.f32 %v3400_v38, %v6858_v20 }
 0x6b4   :  { %v4071_v17 = vpop.eup %4070  ;;  %v3381_v1 = vadd.f32 1.0, %v4069_v43  ;;  %v3402_v42 = vmul.f32 0.5, %v3386_v40  ;;  %v3412_v32 = vmul.f32 %v3396_v56, %v6859_v30  ;;  %v3398_v22 = vmul.f32 0.5, %v3382_v12 }
 0x6b5   :  { %3217 = vmatprep.subr.bf16.mxu1 %v3157_v58  ;;  %v3385_v31 = vadd.f32 1.0, %v4071_v17  ;;  %3768 = vmatmul.mubr.msk.bf16.vlgmr.msra.gmra.mxu0 %vm915_vm4, %v6207_v51  ;;  %v3372_v11 = vadd.f32 1.0, %v6861_v60  ;;  %v3392_v45 = vmul.f32 0.5, %v3376_v24  ;;  %v3374_v57 = vadd.f32 1.0, %v6864_v36  ;;  %v6866_v17 = vld [vmem:[#allocation35_spill] sm:$0xff] }
 0x6b6   :  { %v4073_v27 = vpop.eup %4072  ;;  %3218 = vmatpush1.bf16.msra.mxu1 %v3156_v34  ;;  %v3397_v54 = vmul.f32 0.5, %v3381_v1  ;;  %3460 = vmatprep.mubr.bf16.mxu0 %v6840_v33  ;;  %v3424_v5 = vpack.c.bf16 %v3416_v6, %v3412_v32  ;;  %v3418_v0 = vmul.f32 %v3402_v42, %v6862_v29  ;;  %v3414_v35 = vmul.f32 %v3398_v22, %v6863_v28 }
 0x6b7   :  { %v4075_v52 = vpop.eup %4074  ;;  %v3401_v46 = vmul.f32 0.5, %v3385_v31  ;;  %v3383_v2 = vadd.f32 1.0, %v4073_v27  ;;  %v3388_v3 = vmul.f32 0.5, %v3372_v11  ;;  %v3390_v1 = vmul.f32 0.5, %v3374_v57  ;;  %v6867_v27 = vld [vmem:[#allocation10_spill] sm:$0xff] }
 0x6b8   :  { %v4077_v23 = vpop.eup %4076  ;;  %v3387_v55 = vadd.f32 1.0, %v4075_v52  ;;  %v3413_v7 = vmul.f32 %v3397_v54, %v6838_v21  ;;  %v3426_v48 = vpack.c.bf16 %v3418_v0, %v3414_v35  ;;  %v3527_v0 = vstv %s3759_s23 }
 0x6b9   :  { %v3417_v53 = vmul.f32 %v3401_v46, %v6101_v63  ;;  %v3399_v8 = vmul.f32 0.5, %v3383_v2  ;;  %3769 = vmatmul.mubr.msk.bf16.vlgmr.msra.gmra.mxu1 %vm915_vm4, %v6207_v51  ;;  %v3378_v14 = vadd.f32 1.0, %v4077_v23  ;;  %v3404_v34 = vmul.f32 %v3388_v3, %v6866_v17  ;;  %v6868_v2 = vld [vmem:[#allocation9_spill] sm:$0xff] }
 0x6ba   :  { %v3403_v37 = vmul.f32 0.5, %v3387_v55  ;;  %3501 = vmatprep.mubr.bf16.mxu1 %v6840_v33 }
 0x6bb   :  { %v4079_v39 = vpop.eup %4078  ;;  %v3425_v61 = vpack.c.bf16 %v3417_v53, %v3413_v7  ;;  %v3415_v21 = vmul.f32 %v3399_v8, %v6033_v50  ;;  %v3394_v49 = vmul.f32 0.5, %v3378_v14 }
 0x6bc   :  { %v4081_v15 = vpop.eup %4080  ;;  %v3419_v63 = vmul.f32 %v3403_v37, %v6116_v9  ;;  %v3373_v18 = vadd.f32 1.0, %v4079_v39  ;;  %v3408_v9 = vmul.f32 %v3392_v45, %v6865_v25 }
 0x6bd   :  { %3440 = vmatprep.subr.bf16.mxu0 %v3425_v61  ;;  %v3377_v26 = vadd.f32 1.0, %v4081_v15  ;;  %v3410_v54 = vmul.f32 %v3394_v49, %v6867_v27 }
 0x6be   :  { %v3427_v16 = vpack.c.bf16 %v3419_v63, %v3415_v21  ;;  %3441 = vmatpush1.bf16.msra.mxu0 %v3424_v5  ;;  %v3389_v62 = vmul.f32 0.5, %v3373_v18  ;;  %v3420_v12 = vpack.c.bf16 %v3408_v9, %v3404_v34 }
 0x6bf   :  { %v4083_v59 = vpop.eup %4082  ;;  %v3393_v19 = vmul.f32 0.5, %v3377_v26 }
 0x6c0   :  { %v4085_v47 = vpop.eup %4084  ;;  %3481 = vmatprep.subr.bf16.mxu1 %v3427_v16  ;;  %v3375_v50 = vadd.f32 1.0, %v4083_v59  ;;  %v3405_v43 = vmul.f32 %v3389_v62, %v6848_v41  ;;  %v3406_v41 = vmul.f32 %v3390_v1, %v6868_v2 }
 0x6c1   :  { %3482 = vmatpush1.bf16.msra.mxu1 %v3426_v48  ;;  %v3409_v58 = vmul.f32 %v3393_v19, %v6852_v10  ;;  %v3379_v38 = vadd.f32 1.0, %v4085_v47  ;;  %v3540_v48 = vstv %s3753_s24 }
 0x6c2   :  { %v3391_v40 = vmul.f32 0.5, %v3375_v50  ;;  %v3422_v10 = vpack.c.bf16 %v3410_v54, %v3406_v41  ;;  %v6869_v50 = vld [vmem:[#allocation75_spill] sm:$0xff]  ;;  %v6870_v54 = vld [vmem:[#allocation53_spill] sm:$0xff]  ;;  %v3559_v41 = vstv %s6287_s26 }
 0x6c3   :  { %v3421_v56 = vpack.c.bf16 %v3409_v58, %v3405_v43  ;;  %v3395_v31 = vmul.f32 0.5, %v3379_v38 }
 0x6c4   :  { %v3407_v52 = vmul.f32 %v3391_v40, %v6854_v13  ;;  %v4127_v13 = vmov 4  }
 0x6c5   :  { %3442 = vmatprep.subr.bf16.mxu0 %v3421_v56  ;;  %v3411_v46 = vmul.f32 %v3395_v31, %v6842_v4  ;;  %v6284_v4 = vld [vmem:[%s6323_s11] sm:$0x7]  ;;  %3792 = vset.pattern.permute.xlu1 %v4127_v13  ;;  %s3758_s11 = sld [smem:[#allocation2 + $0x105]]  ;;  %v3549_v56 = vstv %s3754_s25 }
 0x6c6   :  { %3443 = vmatpush1.bf16.msra.mxu0 %v3420_v12  ;;  %3793 = vset.pattern.permute.xlu0 %v4127_v13 }
 0x6c7   :  { %v3423_v20 = vpack.c.bf16 %v3411_v46, %v3407_v52  ;;  %3580 = vperm.xlu1 %3792, %v6284_v4  }
 0x6c9   :  { %3483 = vmatprep.subr.bf16.mxu1 %v3423_v20  ;;  %3770 = vmatmul.mubr.msk.bf16.vlgmr.msra.gmra.mxu0 %vm915_vm4, %v6207_v51 }
 0x6ca   :  { %3484 = vmatpush1.bf16.msra.mxu1 %v3422_v10  ;;  %3630 = vmatprep.mubr.bf16.mxu0 %v6840_v33  ;;  %v3554_v10 = vstv %s3755_s27 }
 0x6cb   :  { %v3514_v39 = vstv %s3758_s11 }
 0x6cd   :  { %3771 = vmatmul.mubr.msk.bf16.vlgmr.msra.gmra.mxu1 %vm915_vm4, %v6207_v51 }
 0x6ce   :  { %3671 = vmatprep.mubr.bf16.mxu1 %v6840_v33 }
 0x762   :  { %v2930_v6 = vpop.f32.mrf.mxu0 }
 0x764   :  { %v2932_v42 = vpop.f32.mrf.mxu0 }
 0x765   :  { %v2971_v23 = vpop.f32.mrf.mxu1 }
 0x766   :  { %v2934_v55 = vpop.f32.mrf.mxu0 }
 0x767   :  { %v2973_v30 = vpop.f32.mrf.mxu1 }
 0x768   :  { %v2935_v32 = vpop.f32.mrf.mxu0 }
 0x769   :  { %v2975_v44 = vpop.f32.mrf.mxu1  ;;  %v6872_v32 = vld [vmem:[#allocation72_spill] sm:$0xff] }
 0x76b   :  { %v2976_v51 = vpop.f32.mrf.mxu1 }
 0x775   :  { %v3196_v24 = vpop.f32.mrf.mxu0 }
 0x776   :  { %v3510_v11 = vsub.f32 %v2930_v6, %v3196_v24  ;;  %v6871_v6 = vld [vmem:[#allocation61_spill] sm:$0xff] }
 0x777   :  { %v3198_v33 = vpop.f32.mrf.mxu0 }
 0x778   :  { %v3511_v61 = vsub.f32 %v2932_v42, %v3198_v33  ;;  %v3515_v14 = vmul.f32 %v3514_v39, %v3510_v11 }
 0x779   :  { %v3237_v7 = vpop.f32.mrf.mxu1  ;;  %v3200_v53 = vpop.f32.mrf.mxu0 }
 0x77a   :  { %v3512_v5 = vsub.f32 %v2971_v23, %v3237_v7  ;;  %v3516_v45 = vmul.f32 %v3514_v39, %v3511_v61 }
 0x77b   :  { %v3239_v8 = vpop.f32.mrf.mxu1  ;;  %v3201_v22 = vpop.f32.mrf.mxu0 }
 0x77c   :  { %v3513_v35 = vsub.f32 %v2973_v30, %v3239_v8  ;;  %v3517_v16 = vmul.f32 %v3514_v39, %v3512_v5 }
 0x77d   :  { %v3241_v37 = vpop.f32.mrf.mxu1 }
 0x77e   :  { %v3518_v58 = vmul.f32 %v3514_v39, %v3513_v35  ;;  %v6873_v37 = vld [vmem:[#allocation31_spill] sm:$0xff] }
 0x77f   :  { %v3242_v60 = vpop.f32.mrf.mxu1 }
 0x789   :  { %v3462_v29 = vpop.f32.mrf.mxu0 }
 0x78a   :  { %v3523_v15 = vsub.f32 %v3196_v24, %v3462_v29  ;;  %v3519_v63 = vadd.f32 %v3515_v14, %v3462_v29 }
 0x78b   :  { %v3464_v21 = vpop.f32.mrf.mxu0 }
 0x78c   :  { %v3528_v18 = vmul.f32 %v3527_v0, %v3523_v15  ;;  %v3524_v28 = vsub.f32 %v3198_v33, %v3464_v21  ;;  %v3520_v57 = vadd.f32 %v3516_v45, %v3464_v21 }
 0x78d   :  { %v3503_v26 = vpop.f32.mrf.mxu1  ;;  %v3466_v62 = vpop.f32.mrf.mxu0 }
 0x78e   :  { %v3532_v3 = vadd.f32 %v3528_v18, %v3519_v63  ;;  %v3525_v36 = vsub.f32 %v3237_v7, %v3503_v26  ;;  %v3529_v59 = vmul.f32 %v3527_v0, %v3524_v28  ;;  %v3521_v9 = vadd.f32 %v3517_v16, %v3503_v26 }
 0x78f   :  { %v3505_v19 = vpop.f32.mrf.mxu1  ;;  %v3467_v47 = vpop.f32.mrf.mxu0  ;;  %v3569_v26 = vpack.c.bf16 %v6284_v4, %v6284_v4 }
 0x790   :  { %v3536_v25 = vadd.f32 %v3532_v3, %v6869_v50  ;;  %v3530_v49 = vmul.f32 %v3527_v0, %v3525_v36  ;;  %v3533_v43 = vadd.f32 %v3529_v59, %v3520_v57  ;;  %v3526_v38 = vsub.f32 %v3239_v8, %v3505_v19  ;;  %v3581_v59 = vpop.permute.xlu1 %3580 }
 0x791   :  { %v3507_v40 = vpop.f32.mrf.mxu1  ;;  %v3522_v31 = vadd.f32 %v3518_v58, %v3505_v19 }
 0x792   :  { %v3541_v17 = vmul.f32 %v3540_v48, %v3536_v25  ;;  %v3534_v34 = vadd.f32 %v3530_v49, %v3521_v9  ;;  %v3537_v1 = vadd.f32 %v3533_v43, %v6869_v50  ;;  %v3531_v12 = vmul.f32 %v3527_v0, %v3526_v38 }
 0x793   :  { %v3508_v27 = vpop.f32.mrf.mxu1  ;;  %v3560_v30 = vmul.f32 %v3559_v41, %v3536_v25 }
 0x794   :  { %v3545_v52 = vsub.f32 %v6870_v54, %v3541_v17  ;;  %v3538_v46 = vadd.f32 %v3534_v34, %v6869_v50  ;;  %v3542_v2 = vmul.f32 %v3540_v48, %v3537_v1  ;;  %v3535_v20 = vadd.f32 %v3531_v12, %v3522_v31 }
 0x795   :  { %v3561_v7 = vmul.f32 %v3559_v41, %v3537_v1 }
 0x796   :  { %v3543_v13 = vmul.f32 %v3540_v48, %v3538_v46  ;;  %v3546_v42 = vsub.f32 %v6871_v6, %v3542_v2  ;;  %v3550_v23 = vmul.f32 %v3549_v56, %v3545_v52  ;;  %v3539_v55 = vadd.f32 %v3535_v20, %v6869_v50 }
 0x797   :  { %v3562_v11 = vmul.f32 %v3559_v41, %v3538_v46 }
 0x798   :  { %v3547_v44 = vsub.f32 %v6872_v32, %v3543_v13  ;;  %v3551_v51 = vmul.f32 %v3549_v56, %v3546_v42  ;;  %v3555_v24 = vmul.f32 %v3554_v10, %v3550_v23  ;;  %v3544_v33 = vmul.f32 %v3540_v48, %v3539_v55 }
 0x799   :  { %v3563_v21 = vmul.f32 %v3559_v41, %v3539_v55 }
 0x79a   :  { %v3556_v53 = vmul.f32 %v3554_v10, %v3551_v51  ;;  %v3564_v8 = vadd.f32 %v3560_v30, %v3555_v24  ;;  %v3552_v22 = vmul.f32 %v3549_v56, %v3547_v44  ;;  %v3548_v60 = vsub.f32 %v6873_v37, %v3544_v33 }
 0x79c   :  { %v3565_v39 = vadd.f32 %v3561_v7, %v3556_v53  ;;  %v3570_v61 = vmul.f32 5.4899807, %v3564_v8  ;;  %v3557_v5 = vmul.f32 %v3554_v10, %v3552_v22  ;;  %v3553_v29 = vmul.f32 %v3549_v56, %v3548_v60 }
 0x79e   :  { %v3571_v0 = vmul.f32 5.4899807, %v3565_v39  ;;  %v3574_v14 = vpack.c.bf16 %v3570_v61, %v3570_v61  ;;  %v3566_v15 = vadd.f32 %v3562_v11, %v3557_v5  ;;  %v3558_v63 = vmul.f32 %v3554_v10, %v3553_v29 }
 0x7a0   :  { %v3575_v18 = vpack.c.bf16 %v3571_v0, %v3571_v0  ;;  %v3572_v45 = vmul.f32 5.4899807, %v3566_v15  ;;  %v3567_v28 = vadd.f32 %v3563_v21, %v3558_v63  ;;  %v3587_v35 = vsel %vm114_vm1, %v3574_v14, 0 }
 0x7a2   :  { %3772 = vmatprep.subr.msk.bf16.mxu0 %vm114_vm1, %v3575_v18  ;;  %v3573_v16 = vmul.f32 5.4899807, %v3567_v28  ;;  %v3576_v62 = vpack.c.bf16 %v3572_v45, %v3572_v45 }
 0x7a3   :  { %3613 = vmatpush1.bf16.msra.mxu0 %v3587_v35 }
 0x7a4   :  { %v3577_v3 = vpack.c.bf16 %v3573_v16, %v3573_v16  ;;  %v3593_v36 = vsel %vm114_vm1, %v3576_v62, 0 }
 0x7a6   :  { %3773 = vmatmul.mubr.msk.bf16.vlgmr.msra.gmra.mxu0 %vm368_vm3, %v3569_v26  ;;  %3774 = vmatprep.subr.msk.bf16.mxu1 %vm114_vm1, %v3577_v3 }
 0x7a7   :  { %3654 = vmatpush1.bf16.msra.mxu1 %v3593_v36 }
 0x7aa   :  { %3775 = vmatmul.mubr.msk.bf16.vlgmr.msra.gmra.mxu1 %vm368_vm3, %v3569_v26 }
 0x866   :  { %v3632_v57 = vpop.f32.mrf.mxu0 }
 0x867   :  { %v3633_v19 = vadd.f32 %v3632_v57, %v3581_v59 }
 0x868   :  { %v3634_v48 = vpop.f32.mrf.mxu0 }
 0x869   :  { %v3635_v47 = vadd.f32 %v3634_v48, %v3581_v59 }
 0x86a   :  { %v3636_v50 = vpop.f32.mrf.mxu0  ;;  %v3673_v4 = vpop.f32.mrf.mxu1 }
 0x86b   :  { %v3684_v25 = vcombine.low %v3633_v19, %v3635_v47  ;;  %v3674_v43 = vadd.f32 %v3673_v4, %v3581_v59 }
 0x86c   :  { %v3637_v9 = vpop.f32.mrf.mxu0  ;;  %v3675_v49 = vpop.f32.mrf.mxu1 }
 0x86d   :  { %3688 = vst [vmem:[%s6324_s12] sm:$0x77] %v3684_v25  ;;  %v3676_v58 = vadd.f32 %v3675_v49, %v3581_v59 }
 0x86e   :  { %v3677_v38 = vpop.f32.mrf.mxu1 }
 0x86f   :  { %v3685_v40 = vcombine.low %v3674_v43, %v3676_v58 }
 0x870   :  { %v3678_v17 = vpop.f32.mrf.mxu1 }
 0x871   :  { %3689 = vst [vmem:[%s6324_s12 + $0x8] sm:$0x77] %v3685_v40 }
 0x872   :  { %3694 = vsyncpa [#allocation3], 1 }
 0x873   :  { %3695 = vsyncpa [#allocation5], 1 }

</bundles_post_ra>
